<compile_context>
chip_gen: v7x
topology: tpu7x:2x2x1
jax: 0.10.0
libtpu: 0.0.40
codegen_flags: <defaults>
</compile_context>

<pallas_src>
import functools

import jax
import jax.numpy as jnp
import numpy as np
from jax.experimental import pallas as pl
from jax.experimental.pallas import tpu as pltpu


def _round_up(x, m):
    return (x + m - 1) // m * m


# ---------------------------------------------------------------------------
# Generation-aware sizing
# ---------------------------------------------------------------------------
def _vmem_capacity_bytes():
    try:
        return int(pltpu.get_tpu_info().vmem_capacity_bytes)
    except Exception:
        return 64 * 1024 * 1024          # conservative (v7x-sized) fallback


_VMEM_CAP = _vmem_capacity_bytes()
# v7x exposes 64 MiB per TensorCore and has 2 TCs/chip; v5e/v6e have 128 MiB, 1 TC.
_IS_MULTI_TC = _VMEM_CAP < 100 * 1024 * 1024
_TILE_BUDGET = min(40 * 1024 * 1024, _VMEM_CAP // 3)
_VMEM_LIMIT = min(96 * 1024 * 1024, (_VMEM_CAP * 3) // 4)


# ---------------------------------------------------------------------------
# Pallas kernels: fused matmul (bf16 MXU -> f32 acc) + bias + optional ReLU
# ---------------------------------------------------------------------------
def _mm_bias_kernel(x_ref, w_ref, b_ref, o_ref, *, apply_relu):
    acc = jnp.dot(x_ref[...], w_ref[...], preferred_element_type=jnp.float32)
    acc = acc + b_ref[...]                       # f32 epilogue (v5e has no bf16 VPU)
    if apply_relu:
        acc = jnp.maximum(acc, 0.0)
    o_ref[...] = acc.astype(o_ref.dtype)


def _mm_kernel(x_ref, w_ref, o_ref, *, apply_relu):
    acc = jnp.dot(x_ref[...], w_ref[...], preferred_element_type=jnp.float32)
    if apply_relu:
        acc = jnp.maximum(acc, 0.0)
    o_ref[...] = acc.astype(o_ref.dtype)


def _choose_tm(M, K, Npad, out_itemsize):
    """Row-tile: multiple of 16 (bf16 sublanes), VMEM-budgeted, megacore-aware."""
    def fits(t):
        est = (2 * t * K * 2                  # LHS tile, bf16, double-buffered
               + 2 * t * Npad * out_itemsize  # output tile, double-buffered
               + 2 * K * Npad * 2             # weight, bf16 (Pallas double-buffers it too)
               + 2 * Npad * 4)                # bias row
        return est <= _TILE_BUDGET

    tm = max(16, min(1024, _round_up(M, 16)))
    while tm > 16 and not fits(tm):
        tm = max(16, _round_up(tm // 2, 16))
    if _IS_MULTI_TC and M >= 32:
        # v7x: force an even number of grid steps so both TensorCores stay busy.
        steps = max(2, -(-M // tm))
        steps += steps % 2
        tm = max(16, _round_up(-(-M // steps), 16))
    return tm


def fused_matmul_bias_act(x, w, b, *, apply_relu, out_dtype):
    """(M,K) @ (K,Npad) [+ b] [ReLU] with bf16 operands, f32 accumulate.

    `w` is pre-transformed/padded/bf16 (shape (K, Npad), Npad % 128 == 0) and
    `b` is a pre-padded (1, Npad) f32 row (or None)."""
    M, K = x.shape
    Kw, Npad = w.shape
    assert Kw == K and Npad % 128 == 0
    out_itemsize = jnp.dtype(out_dtype).itemsize

    TM = _choose_tm(M, K, Npad, out_itemsize)
    Mp = _round_up(M, TM)
    x = x.astype(jnp.bfloat16)
    if Mp != M:
        x = jnp.pad(x, ((0, Mp - M), (0, 0)))

    has_bias = b is not None
    kernel = functools.partial(_mm_bias_kernel if has_bias else _mm_kernel,
                               apply_relu=apply_relu)
    in_specs = [
        pl.BlockSpec((TM, K), lambda i: (i, 0)),      # activation row tile
        pl.BlockSpec((K, Npad), lambda i: (0, 0)),    # full weight, resident
    ]
    operands = [x, w]
    if has_bias:
        in_specs.append(pl.BlockSpec((1, Npad), lambda i: (0, 0)))
        operands.append(b)

    bytes_accessed = (Mp * K * 2 + K * Npad * 2 + (Npad * 4 if has_bias else 0)
                      + Mp * Npad * out_itemsize)
    out = pl.pallas_call(
        kernel,
        out_shape=jax.ShapeDtypeStruct((Mp, Npad), out_dtype),
        grid=(Mp // TM,),
        in_specs=in_specs,
        out_specs=pl.BlockSpec((TM, Npad), lambda i: (i, 0)),
        compiler_params=pltpu.CompilerParams(
            dimension_semantics=("parallel",),
            vmem_limit_bytes=_VMEM_LIMIT,
        ),
        cost_estimate=pl.CostEstimate(
            flops=2 * Mp * K * Npad,
            transcendentals=0,
            bytes_accessed=bytes_accessed,
        ),
    )(*operands)
    return out[:M] if Mp != M else out


# ---------------------------------------------------------------------------
# One-time parameter preparation (host side, outside the jitted forward)
# ---------------------------------------------------------------------------
def _deconv_row_toeplitz(w, w_in, stride):
    """ConvTranspose2d weight (CI,CO,KH,KW) -> WT[(a,w,ci), (ph,ow,co)].

    A window of A = ceil(KH/stride) consecutive input rows matmul'd with WT
    produces both height-phases of one output-row pair, all output columns,
    all output channels, directly in NHWC order (width overlap-add is folded
    into the Toeplitz structure, height overlap-add into the K reduction)."""
    CI, CO, KH, KW = w.shape
    s = stride
    A = -(-KH // s)
    OW = (w_in - 1) * s + KW
    WT = np.zeros((A, w_in, CI, s, OW, CO), np.float32)
    for a in range(A):
        for ph in range(s):
            kh = s * a + ph
            if kh >= KH:
                continue                        # zero tap (odd KH)
            for wi in range(w_in):
                for kw in range(KW):
                    WT[a, wi, :, ph, s * wi + kw, :] = w[:, :, kh, kw]
    return WT.reshape(A * w_in * CI, s * OW * CO)


def prepare_params(params, depth, out_shape=(64, 64, 3)):
    """Pre-transform every weight once: relayout/Toeplitz-expand, pad N to a
    multiple of 128, cast to bf16; biases become pre-tiled (1, Npad) f32 rows."""
    def pack(wm, bv):
        n = wm.shape[1]
        npad = _round_up(n, 128)
        wm = np.pad(wm, ((0, 0), (0, npad - n)))
        bv = np.pad(bv, (0, npad - n)).reshape(1, npad)
        return jnp.asarray(wm, jnp.bfloat16), jnp.asarray(bv, jnp.float32)

    prepped = {}

    # h1: Linear (in_features, 32d)
    w1 = np.asarray(params["h1_w"], np.float32)
    b1 = np.asarray(params["h1_b"], np.float32)
    prepped["h1_w"], prepped["h1_b"] = pack(w1, b1)

    # h2: 1x1-spatial-input deconv == dense matmul; columns ordered (kh, kw, co)
    w2 = np.asarray(params["h2_w"], np.float32)
    b2 = np.asarray(params["h2_b"], np.float32)
    ci, co, kh, kw = w2.shape
    assert ci == 32 * depth
    w2m = w2.transpose(0, 2, 3, 1).reshape(ci, kh * kw * co)
    prepped["h2_w"], prepped["h2_b"] = pack(w2m, np.tile(b2, kh * kw))

    # h3..h5: stride-2 deconvs as row-Toeplitz matmuls
    size = 5                                    # spatial size after h2
    for name in ("h3", "h4", "h5"):
        w = np.asarray(params[name + "_w"], np.float32)
        b = np.asarray(params[name + "_b"], np.float32)
        ci, co, k, _ = w.shape
        ow = (size - 1) * 2 + k
        wt = _deconv_row_toeplitz(w, size, 2)
        prepped[name + "_w"], prepped[name + "_b"] = pack(wt, np.tile(b, 2 * ow))
        size = ow
    assert size == out_shape[0] == out_shape[1]
    return prepped


# ---------------------------------------------------------------------------
# Forward
# ---------------------------------------------------------------------------
def _height_im2col(x, A):
    """x: (B,H,W,CI) -> (B*OHp, A*W*CI) with OHp = H + A - 1; K order (a,w,ci).
    Only a 3-deep (A=3) height window -> ~3x the *input* size, all in bf16."""
    B, H, W, CI = x.shape
    OHp = H + A - 1
    xp = jnp.pad(x, ((0, 0), (A - 1, A - 1), (0, 0), (0, 0)))
    cols = [xp[:, A - 1 - a: A - 1 - a + OHp] for a in range(A)]
    P = jnp.stack(cols, axis=2)                 # (B, OHp, A, W, CI)
    return P.reshape(B * OHp, A * W * CI)


def conv_decoder_forward(prepped, features, depth, out_shape=(64, 64, 3)):
    B = features.shape[0]
    out_channels = out_shape[2]
    s = 2

    # h1: Linear (no activation) -- bf16 store feeds the next matmul directly
    x = fused_matmul_bias_act(features, prepped["h1_w"], prepped["h1_b"],
                              apply_relu=False, out_dtype=jnp.bfloat16)
    if x.shape[1] != 32 * depth:
        x = x[:, :32 * depth]

    # h2: 1x1-input deconv == dense matmul + bias + ReLU -> NHWC (B,5,5,4d)
    y = fused_matmul_bias_act(x, prepped["h2_w"], prepped["h2_b"],
                              apply_relu=True, out_dtype=jnp.bfloat16)
    n2 = 25 * 4 * depth
    if y.shape[1] != n2:
        y = y[:, :n2]
    x = y.reshape(B, 5, 5, 4 * depth)

    # h3..h5: stride-2 ConvTranspose2d, fully fused matmul + bias (+ ReLU)
    layer_defs = (("h3", 5, 2 * depth, True, jnp.bfloat16),
                  ("h4", 6, 1 * depth, True, jnp.bfloat16),
                  ("h5", 6, out_channels, False, jnp.float32))
    for name, KH, CO, relu, dt in layer_defs:
        _, H, W, _ = x.shape
        A = -(-KH // s)
        OH = (H - 1) * s + KH
        OW = (W - 1) * s + KH
        OHp = H + A - 1
        N = s * OW * CO

        P = _height_im2col(x, A)                               # (B*OHp, A*W*CI)
        r = fused_matmul_bias_act(P, prepped[name + "_w"], prepped[name + "_b"],
                                  apply_relu=relu, out_dtype=dt)
        if r.shape[1] != N:
            r = r[:, :N]
        x = r.reshape(B, OHp, s, OW, CO).reshape(B, OHp * s, OW, CO)
        if OHp * s != OH:
            x = x[:, :OH]

    mean = x.transpose(0, 3, 1, 2)              # single NHWC -> NCHW relayout
    assert mean.shape == (B, out_channels, out_shape[0], out_shape[1])
    std = jnp.ones_like(mean)
    # TODO(synk): Independent(Normal(mean, 1), 3) distribution object has no
    # Pallas equivalent; we return its parameters (mean, std=1) instead.
    return mean, std


# ---------------------------------------------------------------------------
# Parameters (PyTorch-style init) + pure-XLA f32 reference for verification
# ---------------------------------------------------------------------------
def init_params(key, in_features, depth, out_channels):
    keys = jax.random.split(key, 10)

    def u(k, shape, fan_in):
        bound = 1.0 / np.sqrt(fan_in)
        return jax.random.uniform(k, shape, jnp.float32, -bound, bound)

    p = {}
    p["h1_w"] = u(keys[0], (in_features, 32 * depth), in_features)   # (in, out)
    p["h1_b"] = u(keys[1], (32 * depth,), in_features)
    p["h2_w"] = u(keys[2], (32 * depth, 4 * depth, 5, 5), 32 * depth * 25)
    p["h2_b"] = u(keys[3], (4 * depth,), 32 * depth * 25)
    p["h3_w"] = u(keys[4], (4 * depth, 2 * depth, 5, 5), 4 * depth * 25)
    p["h3_b"] = u(keys[5], (2 * depth,), 4 * depth * 25)
    p["h4_w"] = u(keys[6], (2 * depth, 1 * depth, 6, 6), 2 * depth * 36)
    p["h4_b"] = u(keys[7], (1 * depth,), 2 * depth * 36)
    p["h5_w"] = u(keys[8], (1 * depth, out_channels, 6, 6), 1 * depth * 36)
    p["h5_b"] = u(keys[9], (out_channels,), 1 * depth * 36)
    return p


def ref_forward(params, features, depth, out_shape=(64, 64, 3)):
    def ct(x, w, b, st):
        _, _, KH, KW = w.shape
        rhs = jnp.flip(w, axis=(2, 3)).transpose(1, 0, 2, 3)   # (CO, CI, KH, KW)
        out = jax.lax.conv_general_dilated(
            x, rhs, window_strides=(1, 1),
            padding=[(KH - 1, KH - 1), (KW - 1, KW - 1)],
            lhs_dilation=(st, st),
            dimension_numbers=("NCHW", "OIHW", "NCHW"))
        return out + b.reshape(1, -1, 1, 1)

    B = features.shape[0]
    x = features @ params["h1_w"] + params["h1_b"]
    x = x.reshape(B, 32 * depth, 1, 1)
    x = jax.nn.relu(ct(x, params["h2_w"], params["h2_b"], 2))
    x = jax.nn.relu(ct(x, params["h3_w"], params["h3_b"], 2))
    x = jax.nn.relu(ct(x, params["h4_w"], params["h4_b"], 2))
    x = ct(x, params["h5_w"], params["h5_b"], 2)
    return x.reshape(B, out_shape[2], out_shape[0], out_shape[1])


if __name__ == "__main__":
    depth = 8            # small "depth" (module default is 32); architecture identical
    in_features = 32     # latent feature size fed to the decoder
    batch = 2
    out_shape = (64, 64, 3)

    key = jax.random.PRNGKey(0)
    k_params, k_feat = jax.random.split(key)
    params = init_params(k_params, in_features, depth, out_shape[2])
    features = jax.random.normal(k_feat, (batch, in_features), jnp.float32)

    # One-time weight relayout/pad/cast (host side, outside the jitted forward).
    prepped = prepare_params(params, depth, out_shape)

    fwd = jax.jit(functools.partial(conv_decoder_forward, depth=depth, out_shape=out_shape))
    mean, std = fwd(prepped, features)
    mean = jax.block_until_ready(mean)
    std = jax.block_until_ready(std)

    assert mean.shape == (batch, out_shape[2], out_shape[0], out_shape[1])
    assert std.shape == mean.shape

    ref = jax.block_until_ready(ref_forward(params, features, depth, out_shape))
    np.testing.assert_allclose(np.asarray(mean), np.asarray(ref), rtol=5e-2, atol=5e-2)

    print("KERNEL_OK")
</pallas_src>

<mosaic_0001>
module attributes {stable_mosaic.version = 11 : i64} {
  func.func @_mm_bias_kernel(%arg0: i32, %arg1: memref<16x32xbf16, #tpu.memory_space<vmem>>, %arg2: memref<32x256xbf16, #tpu.memory_space<vmem>>, %arg3: memref<1x256xf32, #tpu.memory_space<vmem>>, %arg4: memref<16x256xbf16, #tpu.memory_space<vmem>>) attributes {dimension_semantics = [#tpu.dimension_semantics<parallel>], iteration_bounds = array<i64: 1>, scalar_prefetch = 0 : i64, scratch_operands = 0 : i64, tpu.core_type = #tpu.core_type<tc>, window_params = [{transform_indices = @transform_0, window_bounds = array<i64: 16, 32>}, {pipeline_mode = #tpu.pipeline_mode<synchronous>, transform_indices = @transform_1, window_bounds = array<i64: 32, 256>}, {pipeline_mode = #tpu.pipeline_mode<synchronous>, transform_indices = @transform_2, window_bounds = array<i64: 1, 256>}, {transform_indices = @transform_3, window_bounds = array<i64: 16, 256>}]} {
    %c0 = arith.constant 0 : index
    %c0_0 = arith.constant 0 : index
    %0 = vector.load %arg1[%c0, %c0_0] : memref<16x32xbf16, #tpu.memory_space<vmem>>, vector<16x32xbf16>
    %c0_1 = arith.constant 0 : index
    %c0_2 = arith.constant 0 : index
    %1 = vector.load %arg2[%c0_1, %c0_2] : memref<32x256xbf16, #tpu.memory_space<vmem>>, vector<32x256xbf16>
    %cst = arith.constant dense<0.000000e+00> : vector<16x256xf32>
    %2 = tpu.matmul %0, %1, %cst {dimension_numbers = #tpu.dot_dimension_numbers<[1], [0], [0], [1], [0, 0, 1, 1], [], []>} : vector<16x32xbf16>, vector<32x256xbf16>, vector<16x256xf32> -> vector<16x256xf32>
    %c0_3 = arith.constant 0 : index
    %c0_4 = arith.constant 0 : index
    %3 = vector.load %arg3[%c0_3, %c0_4] : memref<1x256xf32, #tpu.memory_space<vmem>>, vector<1x256xf32>
    %4 = vector.broadcast %3 : vector<1x256xf32> to vector<16x256xf32>
    %5 = arith.addf %2, %4 : vector<16x256xf32>
    %6 = arith.truncf %5 : vector<16x256xf32> to vector<16x256xbf16>
    %c0_5 = arith.constant 0 : index
    %c0_6 = arith.constant 0 : index
    %7 = vector.load %arg4[%c0_5, %c0_6] : memref<16x256xbf16, #tpu.memory_space<vmem>>, vector<16x256xbf16>
    tpu.vector_store %arg4[%c0_5, %c0_6], %6 {strides = array<i32>} : memref<16x256xbf16, #tpu.memory_space<vmem>>, vector<16x256xbf16>,
    return
  }
  func.func @transform_0(%arg0: i32) -> (i32, i32) {
    %c0_i32 = arith.constant 0 : i32
    %c0_i32_0 = arith.constant 0 : i32
    return %arg0, %c0_i32 : i32, i32
  }
  func.func @transform_1(%arg0: i32) -> (i32, i32) {
    %c0_i32 = arith.constant 0 : i32
    %c0_i32_0 = arith.constant 0 : i32
    %c0_i32_1 = arith.constant 0 : i32
    return %c0_i32, %c0_i32_0 : i32, i32
  }
  func.func @transform_2(%arg0: i32) -> (i32, i32) {
    %c0_i32 = arith.constant 0 : i32
    %c0_i32_0 = arith.constant 0 : i32
    %c0_i32_1 = arith.constant 0 : i32
    return %c0_i32, %c0_i32_0 : i32, i32
  }
  func.func @transform_3(%arg0: i32) -> (i32, i32) {
    %c0_i32 = arith.constant 0 : i32
    %c0_i32_0 = arith.constant 0 : i32
    return %arg0, %c0_i32 : i32, i32
  }
}

module attributes {stable_mosaic.version = 11 : i64} {
  func.func @_mm_bias_kernel(%arg0: i32, %arg1: memref<16x256xbf16, #tpu.memory_space<vmem>>, %arg2: memref<256x896xbf16, #tpu.memory_space<vmem>>, %arg3: memref<1x896xf32, #tpu.memory_space<vmem>>, %arg4: memref<16x896xbf16, #tpu.memory_space<vmem>>) attributes {dimension_semantics = [#tpu.dimension_semantics<parallel>], iteration_bounds = array<i64: 1>, scalar_prefetch = 0 : i64, scratch_operands = 0 : i64, tpu.core_type = #tpu.core_type<tc>, window_params = [{transform_indices = @transform_0, window_bounds = array<i64: 16, 256>}, {pipeline_mode = #tpu.pipeline_mode<synchronous>, transform_indices = @transform_1, window_bounds = array<i64: 256, 896>}, {pipeline_mode = #tpu.pipeline_mode<synchronous>, transform_indices = @transform_2, window_bounds = array<i64: 1, 896>}, {transform_indices = @transform_3, window_bounds = array<i64: 16, 896>}]} {
    %c0 = arith.constant 0 : index
    %c0_0 = arith.constant 0 : index
    %0 = vector.load %arg1[%c0, %c0_0] : memref<16x256xbf16, #tpu.memory_space<vmem>>, vector<16x256xbf16>
    %c0_1 = arith.constant 0 : index
    %c0_2 = arith.constant 0 : index
    %1 = vector.load %arg2[%c0_1, %c0_2] : memref<256x896xbf16, #tpu.memory_space<vmem>>, vector<256x896xbf16>
    %cst = arith.constant dense<0.000000e+00> : vector<16x896xf32>
    %2 = tpu.matmul %0, %1, %cst {dimension_numbers = #tpu.dot_dimension_numbers<[1], [0], [0], [1], [0, 0, 1, 1], [], []>} : vector<16x256xbf16>, vector<256x896xbf16>, vector<16x896xf32> -> vector<16x896xf32>
    %c0_3 = arith.constant 0 : index
    %c0_4 = arith.constant 0 : index
    %3 = vector.load %arg3[%c0_3, %c0_4] : memref<1x896xf32, #tpu.memory_space<vmem>>, vector<1x896xf32>
    %4 = vector.broadcast %3 : vector<1x896xf32> to vector<16x896xf32>
    %5 = arith.addf %2, %4 : vector<16x896xf32>
    %cst_5 = arith.constant 0.000000e+00 : f32
    %6 = vector.broadcast %cst_5 : f32 to vector<16x896xf32>
    %7 = arith.maximumf %5, %6 : vector<16x896xf32>
    %8 = arith.truncf %7 : vector<16x896xf32> to vector<16x896xbf16>
    %c0_6 = arith.constant 0 : index
    %c0_7 = arith.constant 0 : index
    %9 = vector.load %arg4[%c0_6, %c0_7] : memref<16x896xbf16, #tpu.memory_space<vmem>>, vector<16x896xbf16>
    tpu.vector_store %arg4[%c0_6, %c0_7], %8 {strides = array<i32>} : memref<16x896xbf16, #tpu.memory_space<vmem>>, vector<16x896xbf16>,
    return
  }
  func.func @transform_0(%arg0: i32) -> (i32, i32) {
    %c0_i32 = arith.constant 0 : i32
    %c0_i32_0 = arith.constant 0 : i32
    return %arg0, %c0_i32 : i32, i32
  }
  func.func @transform_1(%arg0: i32) -> (i32, i32) {
    %c0_i32 = arith.constant 0 : i32
    %c0_i32_0 = arith.constant 0 : i32
    %c0_i32_1 = arith.constant 0 : i32
    return %c0_i32, %c0_i32_0 : i32, i32
  }
  func.func @transform_2(%arg0: i32) -> (i32, i32) {
    %c0_i32 = arith.constant 0 : i32
    %c0_i32_0 = arith.constant 0 : i32
    %c0_i32_1 = arith.constant 0 : i32
    return %c0_i32, %c0_i32_0 : i32, i32
  }
  func.func @transform_3(%arg0: i32) -> (i32, i32) {
    %c0_i32 = arith.constant 0 : i32
    %c0_i32_0 = arith.constant 0 : i32
    return %arg0, %c0_i32 : i32, i32
  }
}

module attributes {stable_mosaic.version = 11 : i64} {
  func.func @_mm_bias_kernel(%arg0: i32, %arg1: memref<16x480xbf16, #tpu.memory_space<vmem>>, %arg2: memref<480x512xbf16, #tpu.memory_space<vmem>>, %arg3: memref<1x512xf32, #tpu.memory_space<vmem>>, %arg4: memref<16x512xbf16, #tpu.memory_space<vmem>>) attributes {dimension_semantics = [#tpu.dimension_semantics<parallel>], iteration_bounds = array<i64: 1>, scalar_prefetch = 0 : i64, scratch_operands = 0 : i64, tpu.core_type = #tpu.core_type<tc>, window_params = [{transform_indices = @transform_0, window_bounds = array<i64: 16, 480>}, {pipeline_mode = #tpu.pipeline_mode<synchronous>, transform_indices = @transform_1, window_bounds = array<i64: 480, 512>}, {pipeline_mode = #tpu.pipeline_mode<synchronous>, transform_indices = @transform_2, window_bounds = array<i64: 1, 512>}, {transform_indices = @transform_3, window_bounds = array<i64: 16, 512>}]} {
    %c0 = arith.constant 0 : index
    %c0_0 = arith.constant 0 : index
    %0 = vector.load %arg1[%c0, %c0_0] : memref<16x480xbf16, #tpu.memory_space<vmem>>, vector<16x480xbf16>
    %c0_1 = arith.constant 0 : index
    %c0_2 = arith.constant 0 : index
    %1 = vector.load %arg2[%c0_1, %c0_2] : memref<480x512xbf16, #tpu.memory_space<vmem>>, vector<480x512xbf16>
    %cst = arith.constant dense<0.000000e+00> : vector<16x512xf32>
    %2 = tpu.matmul %0, %1, %cst {dimension_numbers = #tpu.dot_dimension_numbers<[1], [0], [0], [1], [0, 0, 1, 1], [], []>} : vector<16x480xbf16>, vector<480x512xbf16>, vector<16x512xf32> -> vector<16x512xf32>
    %c0_3 = arith.constant 0 : index
    %c0_4 = arith.constant 0 : index
    %3 = vector.load %arg3[%c0_3, %c0_4] : memref<1x512xf32, #tpu.memory_space<vmem>>, vector<1x512xf32>
    %4 = vector.broadcast %3 : vector<1x512xf32> to vector<16x512xf32>
    %5 = arith.addf %2, %4 : vector<16x512xf32>
    %cst_5 = arith.constant 0.000000e+00 : f32
    %6 = vector.broadcast %cst_5 : f32 to vector<16x512xf32>
    %7 = arith.maximumf %5, %6 : vector<16x512xf32>
    %8 = arith.truncf %7 : vector<16x512xf32> to vector<16x512xbf16>
    %c0_6 = arith.constant 0 : index
    %c0_7 = arith.constant 0 : index
    %9 = vector.load %arg4[%c0_6, %c0_7] : memref<16x512xbf16, #tpu.memory_space<vmem>>, vector<16x512xbf16>
    tpu.vector_store %arg4[%c0_6, %c0_7], %8 {strides = array<i32>} : memref<16x512xbf16, #tpu.memory_space<vmem>>, vector<16x512xbf16>,
    return
  }
  func.func @transform_0(%arg0: i32) -> (i32, i32) {
    %c0_i32 = arith.constant 0 : i32
    %c0_i32_0 = arith.constant 0 : i32
    return %arg0, %c0_i32 : i32, i32
  }
  func.func @transform_1(%arg0: i32) -> (i32, i32) {
    %c0_i32 = arith.constant 0 : i32
    %c0_i32_0 = arith.constant 0 : i32
    %c0_i32_1 = arith.constant 0 : i32
    return %c0_i32, %c0_i32_0 : i32, i32
  }
  func.func @transform_2(%arg0: i32) -> (i32, i32) {
    %c0_i32 = arith.constant 0 : i32
    %c0_i32_0 = arith.constant 0 : i32
    %c0_i32_1 = arith.constant 0 : i32
    return %c0_i32, %c0_i32_0 : i32, i32
  }
  func.func @transform_3(%arg0: i32) -> (i32, i32) {
    %c0_i32 = arith.constant 0 : i32
    %c0_i32_0 = arith.constant 0 : i32
    return %arg0, %c0_i32 : i32, i32
  }
}

module attributes {stable_mosaic.version = 11 : i64} {
  func.func @_mm_bias_kernel(%arg0: i32, %arg1: memref<32x624xbf16, #tpu.memory_space<vmem>>, %arg2: memref<624x512xbf16, #tpu.memory_space<vmem>>, %arg3: memref<1x512xf32, #tpu.memory_space<vmem>>, %arg4: memref<32x512xbf16, #tpu.memory_space<vmem>>) attributes {dimension_semantics = [#tpu.dimension_semantics<parallel>], iteration_bounds = array<i64: 1>, scalar_prefetch = 0 : i64, scratch_operands = 0 : i64, tpu.core_type = #tpu.core_type<tc>, window_params = [{transform_indices = @transform_0, window_bounds = array<i64: 32, 624>}, {pipeline_mode = #tpu.pipeline_mode<synchronous>, transform_indices = @transform_1, window_bounds = array<i64: 624, 512>}, {pipeline_mode = #tpu.pipeline_mode<synchronous>, transform_indices = @transform_2, window_bounds = array<i64: 1, 512>}, {transform_indices = @transform_3, window_bounds = array<i64: 32, 512>}]} {
    %c0 = arith.constant 0 : index
    %c0_0 = arith.constant 0 : index
    %0 = vector.load %arg1[%c0, %c0_0] : memref<32x624xbf16, #tpu.memory_space<vmem>>, vector<32x624xbf16>
    %c0_1 = arith.constant 0 : index
    %c0_2 = arith.constant 0 : index
    %1 = vector.load %arg2[%c0_1, %c0_2] : memref<624x512xbf16, #tpu.memory_space<vmem>>, vector<624x512xbf16>
    %cst = arith.constant dense<0.000000e+00> : vector<32x512xf32>
    %2 = tpu.matmul %0, %1, %cst {dimension_numbers = #tpu.dot_dimension_numbers<[1], [0], [0], [1], [0, 0, 1, 1], [], []>} : vector<32x624xbf16>, vector<624x512xbf16>, vector<32x512xf32> -> vector<32x512xf32>
    %c0_3 = arith.constant 0 : index
    %c0_4 = arith.constant 0 : index
    %3 = vector.load %arg3[%c0_3, %c0_4] : memref<1x512xf32, #tpu.memory_space<vmem>>, vector<1x512xf32>
    %4 = vector.broadcast %3 : vector<1x512xf32> to vector<32x512xf32>
    %5 = arith.addf %2, %4 : vector<32x512xf32>
    %cst_5 = arith.constant 0.000000e+00 : f32
    %6 = vector.broadcast %cst_5 : f32 to vector<32x512xf32>
    %7 = arith.maximumf %5, %6 : vector<32x512xf32>
    %8 = arith.truncf %7 : vector<32x512xf32> to vector<32x512xbf16>
    %c0_6 = arith.constant 0 : index
    %c0_7 = arith.constant 0 : index
    %9 = vector.load %arg4[%c0_6, %c0_7] : memref<32x512xbf16, #tpu.memory_space<vmem>>, vector<32x512xbf16>
    tpu.vector_store %arg4[%c0_6, %c0_7], %8 {strides = array<i32>} : memref<32x512xbf16, #tpu.memory_space<vmem>>, vector<32x512xbf16>,
    return
  }
  func.func @transform_0(%arg0: i32) -> (i32, i32) {
    %c0_i32 = arith.constant 0 : i32
    %c0_i32_0 = arith.constant 0 : i32
    return %arg0, %c0_i32 : i32, i32
  }
  func.func @transform_1(%arg0: i32) -> (i32, i32) {
    %c0_i32 = arith.constant 0 : i32
    %c0_i32_0 = arith.constant 0 : i32
    %c0_i32_1 = arith.constant 0 : i32
    return %c0_i32, %c0_i32_0 : i32, i32
  }
  func.func @transform_2(%arg0: i32) -> (i32, i32) {
    %c0_i32 = arith.constant 0 : i32
    %c0_i32_0 = arith.constant 0 : i32
    %c0_i32_1 = arith.constant 0 : i32
    return %c0_i32, %c0_i32_0 : i32, i32
  }
  func.func @transform_3(%arg0: i32) -> (i32, i32) {
    %c0_i32 = arith.constant 0 : i32
    %c0_i32_0 = arith.constant 0 : i32
    return %arg0, %c0_i32 : i32, i32
  }
}

module attributes {stable_mosaic.version = 11 : i64} {
  func.func @_mm_bias_kernel(%arg0: i32, %arg1: memref<32x720xbf16, #tpu.memory_space<vmem>>, %arg2: memref<720x384xbf16, #tpu.memory_space<vmem>>, %arg3: memref<1x384xf32, #tpu.memory_space<vmem>>, %arg4: memref<32x384xf32, #tpu.memory_space<vmem>>) attributes {dimension_semantics = [#tpu.dimension_semantics<parallel>], iteration_bounds = array<i64: 2>, scalar_prefetch = 0 : i64, scratch_operands = 0 : i64, tpu.core_type = #tpu.core_type<tc>, window_params = [{transform_indices = @transform_0, window_bounds = array<i64: 32, 720>}, {pipeline_mode = #tpu.pipeline_mode<synchronous>, transform_indices = @transform_1, window_bounds = array<i64: 720, 384>}, {pipeline_mode = #tpu.pipeline_mode<synchronous>, transform_indices = @transform_2, window_bounds = array<i64: 1, 384>}, {transform_indices = @transform_3, window_bounds = array<i64: 32, 384>}]} {
    %c0 = arith.constant 0 : index
    %c0_0 = arith.constant 0 : index
    %0 = vector.load %arg1[%c0, %c0_0] : memref<32x720xbf16, #tpu.memory_space<vmem>>, vector<32x720xbf16>
    %c0_1 = arith.constant 0 : index
    %c0_2 = arith.constant 0 : index
    %1 = vector.load %arg2[%c0_1, %c0_2] : memref<720x384xbf16, #tpu.memory_space<vmem>>, vector<720x384xbf16>
    %cst = arith.constant dense<0.000000e+00> : vector<32x384xf32>
    %2 = tpu.matmul %0, %1, %cst {dimension_numbers = #tpu.dot_dimension_numbers<[1], [0], [0], [1], [0, 0, 1, 1], [], []>} : vector<32x720xbf16>, vector<720x384xbf16>, vector<32x384xf32> -> vector<32x384xf32>
    %c0_3 = arith.constant 0 : index
    %c0_4 = arith.constant 0 : index
    %3 = vector.load %arg3[%c0_3, %c0_4] : memref<1x384xf32, #tpu.memory_space<vmem>>, vector<1x384xf32>
    %4 = vector.broadcast %3 : vector<1x384xf32> to vector<32x384xf32>
    %5 = arith.addf %2, %4 : vector<32x384xf32>
    %c0_5 = arith.constant 0 : index
    %c0_6 = arith.constant 0 : index
    %6 = vector.load %arg4[%c0_5, %c0_6] : memref<32x384xf32, #tpu.memory_space<vmem>>, vector<32x384xf32>
    tpu.vector_store %arg4[%c0_5, %c0_6], %5 {strides = array<i32>} : memref<32x384xf32, #tpu.memory_space<vmem>>, vector<32x384xf32>,
    return
  }
  func.func @transform_0(%arg0: i32) -> (i32, i32) {
    %c0_i32 = arith.constant 0 : i32
    %c0_i32_0 = arith.constant 0 : i32
    return %arg0, %c0_i32 : i32, i32
  }
  func.func @transform_1(%arg0: i32) -> (i32, i32) {
    %c0_i32 = arith.constant 0 : i32
    %c0_i32_0 = arith.constant 0 : i32
    %c0_i32_1 = arith.constant 0 : i32
    return %c0_i32, %c0_i32_0 : i32, i32
  }
  func.func @transform_2(%arg0: i32) -> (i32, i32) {
    %c0_i32 = arith.constant 0 : i32
    %c0_i32_0 = arith.constant 0 : i32
    %c0_i32_1 = arith.constant 0 : i32
    return %c0_i32, %c0_i32_0 : i32, i32
  }
  func.func @transform_3(%arg0: i32) -> (i32, i32) {
    %c0_i32 = arith.constant 0 : i32
    %c0_i32_0 = arith.constant 0 : i32
    return %arg0, %c0_i32 : i32, i32
  }
}

</mosaic_0001>

<bundles_post_ra>
// kernel: conv_decoder_forward.5
= control target key start
LH: loop header
LB: loop body
LE: loop exit
PB: predicated region body
PF: predicated region fallthrough
CT: control target
= control target key end

     0   :  { %8 = vsyncpa [#allocation3], 0  ;;  %s279_s0 = inlined_call_operand.vmem [shape: bf16[16,32], index: 0, kind: input, shape index: {}]   ;;  %s280_s1 = inlined_call_operand.hbm [shape: bf16[32,256], index: 1, kind: input, shape index: {}]   ;;  %s281_s2 = inlined_call_operand.hbm [shape: f32[1,256], index: 2, kind: input, shape index: {}]   ;;  %s282_s3 = inlined_call_operand.vmem [shape: bf16[16,256], index: 3, kind: output, shape index: {}]  }
   0x1   :  { %9 = vsyncpa [#allocation5], 0  ;;  %s221_s12 = smov [#allocation2]   ;;  %s173_s16 = scalar_lea.hbm %s280_s1, 512 }
   0x2   :  { %s17_s13 = sshll.u32 %s221_s12, 4  ;;  %p174_p0 = scmp.ne.s32.totalorder %s280_s1, %s173_s16  ;;  %s18_s13 = int_to_ptr.vmem [resolvable:$true] %s17_s13 }
   0x3   :  { %p177_p1 = scmp.lt.u32.totalorder %s173_s16, %s280_s1 }
   0x5   :  { %p179_p2 = pnand %p177_p1, %p174_p0 }
   0x7   :  { %182 = shalt.err (!%p179_p2)
}
   0x8   :  { %s183_s21 = scalar_lea.vmem %s18_s13, 512  ;;  %p188_p4 = scmp.lt.s32.totalorder %s18_s13, %s18_s13 }
   0x9   :  { %p184_p3 = scmp.ne.s32.totalorder %s18_s13, %s183_s21  ;;  %p189_p5 = scmp.lt.s32.totalorder %s183_s21, %s183_s21 }
   0xb   :  { %p190_p6 = por %p189_p5, %p188_p4 }
   0xd   :  { %p191_p7 = pnand %p190_p6, %p184_p3 }
   0xf   :  { %194 = shalt.err (!%p191_p7)
}
  0x10   :  { %s222_s22 = smov 128   ;;  %s223_s23 = smov 8  }
  0x11   :  { %23 = dma.hbm_to_vmem [thread:$0]  %s280_s1, 512, %s18_s13, [#allocation3], %s222_s22, %s222_s22, %s223_s23  }
  0x12   :  { %s224_s26 = smov [#allocation4]   ;;  %s195_s30 = scalar_lea.hbm %s281_s2, 32 }
  0x13   :  { %s30_s27 = sshll.u32 %s224_s26, 4  ;;  %p196_p8 = scmp.ne.s32.totalorder %s281_s2, %s195_s30  ;;  %s31_s27 = int_to_ptr.vmem [resolvable:$true] %s30_s27 }
  0x14   :  { %p199_p9 = scmp.lt.u32.totalorder %s195_s30, %s281_s2 }
  0x16   :  { %p201_p10 = pnand %p199_p9, %p196_p8 }
  0x18   :  { %204 = shalt.err (!%p201_p10)
}
  0x19   :  { %s205_s8 = scalar_lea.vmem %s31_s27, 32  ;;  %p210_p12 = scmp.lt.s32.totalorder %s31_s27, %s31_s27 }
  0x1a   :  { %p206_p11 = scmp.ne.s32.totalorder %s31_s27, %s205_s8  ;;  %p211_p13 = scmp.lt.s32.totalorder %s205_s8, %s205_s8 }
  0x1c   :  { %p212_p0 = por %p211_p13, %p210_p12 }
  0x1e   :  { %p213_p1 = pnand %p212_p0, %p206_p11 }
  0x20   :  { %216 = shalt.err (!%p213_p1)
}
  0x21   :  { %33 = dma.hbm_to_vmem [thread:$0]  %s281_s2, 32, %s31_s27, [#allocation5]  }
  0x22   :  { %217 = dma.done.wait [#allocation3], 512  }
  0x23   :  { %218 = vsyncadd [#allocation3], 4294966784 }
  0x24   :  { %219 = dma.done.wait [#allocation5], 32  }
  0x25   :  { %220 = vsyncadd [#allocation5], 4294967264  ;;  %v225_v0 = vmov 0   ;;  %v166_v1 = vld [vmem:[#allocation2 + $0x4] ss:$8 sps:$4 sm:$0xff]   ;;  %vm84_vm0 = vcmask 261120   ;;  %v49_v6 = vlaneseq }
  0x26   :  { %120 = vmatprep.mubr.bf16.mxu0 %v225_v0  ;;  %v168_v2 = vld [vmem:[#allocation2] ss:$8 sps:$4 sm:$0xff]   ;;  %88 = vmatprep.subr.bf16.mxu0 %v166_v1  ;;  %v169_v3 = vld [vmem:[#allocation2 + $0x14] ss:$8 sps:$4 sm:$0xff]   ;;  %v171_v4 = vld [vmem:[#allocation2 + $0x10] ss:$8 sps:$4 sm:$0xff]  }
  0x27   :  { %89 = vmatpush1.bf16.msra.mxu0 %v168_v2  ;;  %v172_v5 = vld [vmem:[%s279_s0] sm:$0xff]   ;;  %v50_v7 = vshrl.u32 %v49_v6, 7 }
  0x28   :  { %90 = vmatprep.subr.bf16.mxu0 %v169_v3  ;;  %v47_v9 = vld [vmem:[#allocation4] sm:$0x3] }
  0x29   :  { %v51_v8 = vsub.s32 0, %v50_v7  ;;  %v55_v10 = vsub.s32 1, %v50_v7 }
  0x2b   :  { %91 = vmatpush1.bf16.msra.mxu0 %v171_v4  ;;  %v52_v11 = vrot.slane %v47_v9, %v51_v8  ;;  %v56_v12 = vrot.slane %v47_v9, %v55_v10 }
  0x2e   :  { %156 = vmatmul.mubr.msk.bf16.vlgmr.msra.gmra.mrb[0].mxu0 %vm84_vm0, %v172_v5 }
 0x101   :  { %v122_v13 = vpop.f32.mrb[0].mxu0 }
 0x102   :  { %v123_v14 = vadd.f32 %v122_v13, %v52_v11  ;;  %v124_v15 = vpop.f32.mrb[1].mxu0 }
 0x103   :  { %v125_v16 = vadd.f32 %v124_v15, %v56_v12  ;;  %v126_v17 = vpop.f32.mrb[2].mxu0 }
 0x104   :  { %v127_v18 = vadd.f32 %v126_v17, %v52_v11  ;;  %v128_v19 = vpop.f32.mrb[3].mxu0 }
 0x105   :  { %v159_v20 = vpack.c.bf16 %v125_v16, %v123_v14  ;;  %v129_v21 = vadd.f32 %v128_v19, %v56_v12 }
 0x107   :  { %143 = vst [vmem:[%s282_s3] sm:$0xff] %v159_v20  ;;  %v160_v22 = vpack.c.bf16 %v129_v21, %v127_v18 }
 0x109   :  { %144 = vst [vmem:[%s282_s3 + $0x8] sm:$0xff] %v160_v22 }
 0x10a   :  { %149 = vsyncpa [#allocation3], 1 }
 0x10b   :  { %150 = vsyncpa [#allocation5], 1 }

// kernel: conv_decoder_forward.6
= control target key start
LH: loop header
LB: loop body
LE: loop exit
PB: predicated region body
PF: predicated region fallthrough
CT: control target
= control target key end

     0   :  { %8 = vsyncpa [#allocation3], 0  ;;  %s1501_s0 = inlined_call_operand.vmem [shape: bf16[16,256], index: 0, kind: input, shape index: {}]   ;;  %s1502_s1 = inlined_call_operand.hbm [shape: bf16[256,896], index: 1, kind: input, shape index: {}]   ;;  %s1503_s2 = inlined_call_operand.hbm [shape: f32[1,896], index: 2, kind: input, shape index: {}]   ;;  %s1504_s3 = inlined_call_operand.vmem [shape: bf16[16,896], index: 3, kind: output, shape index: {}]  }
   0x1   :  { %9 = vsyncpa [#allocation5], 0  ;;  %s1403_s12 = smov [#allocation2]   ;;  %s1355_s16 = scalar_lea.hbm %s1502_s1, 14336 }
   0x2   :  { %s17_s13 = sshll.u32 %s1403_s12, 4  ;;  %p1356_p0 = scmp.ne.s32.totalorder %s1502_s1, %s1355_s16  ;;  %s18_s13 = int_to_ptr.vmem [resolvable:$true] %s17_s13 }
   0x3   :  { %p1359_p1 = scmp.lt.u32.totalorder %s1355_s16, %s1502_s1 }
   0x5   :  { %p1361_p2 = pnand %p1359_p1, %p1356_p0 }
   0x7   :  { %1364 = shalt.err (!%p1361_p2)
}
   0x8   :  { %s1365_s21 = scalar_lea.vmem %s18_s13, 14336  ;;  %p1370_p4 = scmp.lt.s32.totalorder %s18_s13, %s18_s13 }
   0x9   :  { %p1366_p3 = scmp.ne.s32.totalorder %s18_s13, %s1365_s21  ;;  %p1371_p5 = scmp.lt.s32.totalorder %s1365_s21, %s1365_s21 }
   0xb   :  { %p1372_p6 = por %p1371_p5, %p1370_p4 }
   0xd   :  { %p1373_p7 = pnand %p1372_p6, %p1366_p3 }
   0xf   :  { %1376 = shalt.err (!%p1373_p7)
}
  0x10   :  { %s1404_s22 = smov 448   ;;  %s1405_s23 = smov 28  }
  0x11   :  { %23 = dma.hbm_to_vmem [thread:$0]  %s1502_s1, 14336, %s18_s13, [#allocation3], %s1404_s22, %s1404_s22, %s1405_s23  }
  0x12   :  { %s1406_s26 = smov [#allocation4]   ;;  %s1377_s30 = scalar_lea.hbm %s1503_s2, 112 }
  0x13   :  { %s30_s27 = sshll.u32 %s1406_s26, 4  ;;  %p1378_p8 = scmp.ne.s32.totalorder %s1503_s2, %s1377_s30  ;;  %s31_s27 = int_to_ptr.vmem [resolvable:$true] %s30_s27 }
  0x14   :  { %p1381_p9 = scmp.lt.u32.totalorder %s1377_s30, %s1503_s2 }
  0x16   :  { %p1383_p10 = pnand %p1381_p9, %p1378_p8 }
  0x18   :  { %1386 = shalt.err (!%p1383_p10)
}
  0x19   :  { %s1387_s8 = scalar_lea.vmem %s31_s27, 112  ;;  %s1391_s1 = scalar_lea.vmem %s31_s27, 128 }
  0x1a   :  { %p1388_p11 = scmp.ne.s32.totalorder %s31_s27, %s1387_s8  ;;  %p1392_p12 = scmp.lt.s32.totalorder %s31_s27, %s31_s27 }
  0x1b   :  { %p1393_p13 = scmp.lt.s32.totalorder %s1391_s1, %s1387_s8 }
  0x1d   :  { %p1394_p0 = por %p1393_p13, %p1392_p12 }
  0x1f   :  { %p1395_p1 = pnand %p1394_p0, %p1388_p11 }
  0x21   :  { %1398 = shalt.err (!%p1395_p1)
}
  0x22   :  { %33 = dma.hbm_to_vmem [thread:$0]  %s1503_s2, 112, %s31_s27, [#allocation5]  }
  0x23   :  { %1399 = dma.done.wait [#allocation3], 14336  }
  0x24   :  { %1400 = vsyncadd [#allocation3], 4294952960 }
  0x25   :  { %1401 = dma.done.wait [#allocation5], 112  }
  0x26   :  { %1402 = vsyncadd [#allocation5], 4294967184  ;;  %v1192_v0 = vld [vmem:[#allocation2 + $0x4] ss:$28 sps:$4 sm:$0xff]   ;;  %v1195_v2 = vld [vmem:[#allocation2 + $0x3c] ss:$28 sps:$4 sm:$0xff]  }
  0x27   :  { %v1194_v1 = vld [vmem:[#allocation2] ss:$28 sps:$4 sm:$0xff]   ;;  %794 = vmatprep.subr.bf16.mxu0 %v1192_v0  ;;  %v1197_v3 = vld [vmem:[#allocation2 + $0x38] ss:$28 sps:$4 sm:$0xff]   ;;  %v1200_v5 = vld [vmem:[#allocation2 + $0x70] ss:$28 sps:$4 sm:$0xff]  }
  0x28   :  { %795 = vmatpush1.bf16.msra.mxu0 %v1194_v1  ;;  %v1198_v4 = vld [vmem:[#allocation2 + $0x74] ss:$28 sps:$4 sm:$0xff]   ;;  %v1201_v6 = vld [vmem:[#allocation2 + $0xac] ss:$28 sps:$4 sm:$0xff]   ;;  %v1204_v9 = vld [vmem:[#allocation2 + $0xe4] ss:$28 sps:$4 sm:$0xff]  }
  0x29   :  { %796 = vmatprep.subr.bf16.mxu0 %v1195_v2  ;;  %v1213_v7 = vld [vmem:[#allocation2 + $0xc] ss:$28 sps:$4 sm:$0xff]   ;;  %v1219_v11 = vld [vmem:[#allocation2 + $0x44] ss:$28 sps:$4 sm:$0xff]   ;;  %v1225_v14 = vld [vmem:[#allocation2 + $0x7c] ss:$28 sps:$4 sm:$0xff]  }
  0x2a   :  { %v1203_v8 = vld [vmem:[#allocation2 + $0xa8] ss:$28 sps:$4 sm:$0xff]   ;;  %837 = vmatprep.subr.bf16.mxu1 %v1213_v7  ;;  %v1206_v12 = vld [vmem:[#allocation2 + $0xe0] ss:$28 sps:$4 sm:$0xff]   ;;  %v1229_v16 = vld [vmem:[#allocation2 + $0x78] ss:$28 sps:$4 sm:$0xff]  }
  0x2b   :  { %v1217_v10 = vld [vmem:[#allocation2 + $0x8] ss:$28 sps:$4 sm:$0xff]   ;;  %v1223_v13 = vld [vmem:[#allocation2 + $0x40] ss:$28 sps:$4 sm:$0xff]   ;;  %v1231_v17 = vld [vmem:[#allocation2 + $0xb4] ss:$28 sps:$4 sm:$0xff]  }
  0x2c   :  { %797 = vmatpush1.bf16.msra.mxu0 %v1197_v3  ;;  %838 = vmatpush1.bf16.msra.mxu1 %v1217_v10  ;;  %v1207_v15 = vld [vmem:[#allocation2 + $0x11c] ss:$28 sps:$4 sm:$0xff]   ;;  %v1210_v19 = vld [vmem:[#allocation2 + $0x154] ss:$28 sps:$4 sm:$0xff]   ;;  %v1237_v21 = vld [vmem:[#allocation2 + $0xec] ss:$28 sps:$4 sm:$0xff]  }
  0x2d   :  { %798 = vmatprep.subr.bf16.mxu0 %v1198_v4  ;;  %839 = vmatprep.subr.bf16.mxu1 %v1219_v11  ;;  %v1209_v18 = vld [vmem:[#allocation2 + $0x118] ss:$28 sps:$4 sm:$0xff]   ;;  %v1235_v20 = vld [vmem:[#allocation2 + $0xb0] ss:$28 sps:$4 sm:$0xff]   ;;  %v1241_v24 = vld [vmem:[#allocation2 + $0xe8] ss:$28 sps:$4 sm:$0xff]  }
  0x2e   :  { %v1212_v22 = vld [vmem:[#allocation2 + $0x150] ss:$28 sps:$4 sm:$0xff]   ;;  %v1243_v25 = vld [vmem:[#allocation2 + $0x124] ss:$28 sps:$4 sm:$0xff]   ;;  %v1249_v29 = vld [vmem:[#allocation2 + $0x15c] ss:$28 sps:$4 sm:$0xff]  }
  0x2f   :  { %v1215_v23 = vld [vmem:[#allocation2 + $0x18c] ss:$28 sps:$4 sm:$0xff]   ;;  %v1221_v27 = vld [vmem:[#allocation2 + $0x1c4] ss:$28 sps:$4 sm:$0xff]   ;;  %v1227_v31 = vld [vmem:[#allocation2 + $0x1fc] ss:$28 sps:$4 sm:$0xff]  }
  0x30   :  { %799 = vmatpush1.bf16.msra.mxu0 %v1200_v5  ;;  %840 = vmatpush1.bf16.msra.mxu1 %v1223_v13  ;;  %v1218_v26 = vld [vmem:[#allocation2 + $0x188] ss:$28 sps:$4 sm:$0xff]   ;;  %v1247_v28 = vld [vmem:[#allocation2 + $0x120] ss:$28 sps:$4 sm:$0xff]   ;;  %v1253_v32 = vld [vmem:[#allocation2 + $0x158] ss:$28 sps:$4 sm:$0xff]  }
  0x31   :  { %800 = vmatprep.subr.bf16.mxu0 %v1201_v6  ;;  %841 = vmatprep.subr.bf16.mxu1 %v1225_v14  ;;  %v1224_v30 = vld [vmem:[#allocation2 + $0x1c0] ss:$28 sps:$4 sm:$0xff]   ;;  %v1255_v33 = vld [vmem:[#allocation2 + $0x194] ss:$28 sps:$4 sm:$0xff]   ;;  %v1454_v34 = vld [vmem:[%s1501_s0 + $0x4] ss:$8 sps:$4 sm:$0xff]  }
  0x32   :  { %v1230_v35 = vld [vmem:[#allocation2 + $0x1f8] ss:$28 sps:$4 sm:$0xff]   ;;  %826 = vmatprep.mubr.bf16.mxu0 %v1454_v34  ;;  %v1259_v37 = vld [vmem:[#allocation2 + $0x190] ss:$28 sps:$4 sm:$0xff]   ;;  %869 = vmatprep.mubr.bf16.mxu1 %v1454_v34  ;;  %v1265_v41 = vld [vmem:[#allocation2 + $0x1c8] ss:$28 sps:$4 sm:$0xff]  }
  0x33   :  { %v1233_v36 = vld [vmem:[#allocation2 + $0x234] ss:$28 sps:$4 sm:$0xff]   ;;  %v1261_v38 = vld [vmem:[#allocation2 + $0x1cc] ss:$28 sps:$4 sm:$0xff]   ;;  %v1269_v42 = vld [vmem:[#allocation2 + $0x204] ss:$28 sps:$4 sm:$0xff]  }
  0x34   :  { %801 = vmatpush1.bf16.msra.mxu0 %v1203_v8  ;;  %842 = vmatpush1.bf16.msra.mxu1 %v1229_v16  ;;  %v1236_v39 = vld [vmem:[#allocation2 + $0x230] ss:$28 sps:$4 sm:$0xff]   ;;  %v1242_v43 = vld [vmem:[#allocation2 + $0x268] ss:$28 sps:$4 sm:$0xff]   ;;  %v1272_v45 = vld [vmem:[#allocation2 + $0x200] ss:$28 sps:$4 sm:$0xff]  }
  0x35   :  { %802 = vmatprep.subr.bf16.mxu0 %v1204_v9  ;;  %843 = vmatprep.subr.bf16.mxu1 %v1231_v17  ;;  %v1239_v40 = vld [vmem:[#allocation2 + $0x26c] ss:$28 sps:$4 sm:$0xff]   ;;  %v1245_v44 = vld [vmem:[#allocation2 + $0x2a4] ss:$28 sps:$4 sm:$0xff]   ;;  %v1276_v46 = vld [vmem:[#allocation2 + $0x23c] ss:$28 sps:$4 sm:$0xff]  }
  0x36   :  { %v1248_v47 = vld [vmem:[#allocation2 + $0x2a0] ss:$28 sps:$4 sm:$0xff]   ;;  %v1278_v49 = vld [vmem:[#allocation2 + $0x238] ss:$28 sps:$4 sm:$0xff]   ;;  %v1284_v53 = vld [vmem:[#allocation2 + $0x270] ss:$28 sps:$4 sm:$0xff]  }
  0x37   :  { %v1251_v48 = vld [vmem:[#allocation2 + $0x2dc] ss:$28 sps:$4 sm:$0xff]   ;;  %v1282_v50 = vld [vmem:[#allocation2 + $0x274] ss:$28 sps:$4 sm:$0xff]   ;;  %v1288_v54 = vld [vmem:[#allocation2 + $0x2ac] ss:$28 sps:$4 sm:$0xff]  }
  0x38   :  { %803 = vmatpush1.bf16.msra.mxu0 %v1206_v12  ;;  %844 = vmatpush1.bf16.msra.mxu1 %v1235_v20  ;;  %v1254_v51 = vld [vmem:[#allocation2 + $0x2d8] ss:$28 sps:$4 sm:$0xff]   ;;  %v1260_v55 = vld [vmem:[#allocation2 + $0x310] ss:$28 sps:$4 sm:$0xff]   ;;  %v1290_v57 = vld [vmem:[#allocation2 + $0x2a8] ss:$28 sps:$4 sm:$0xff]  }
  0x39   :  { %804 = vmatprep.subr.bf16.mxu0 %v1207_v15  ;;  %845 = vmatprep.subr.bf16.mxu1 %v1237_v21  ;;  %v1257_v52 = vld [vmem:[#allocation2 + $0x314] ss:$28 sps:$4 sm:$0xff]   ;;  %v1263_v56 = vld [vmem:[#allocation2 + $0x34c] ss:$28 sps:$4 sm:$0xff]   ;;  %v1294_v58 = vld [vmem:[#allocation2 + $0x2e4] ss:$28 sps:$4 sm:$0xff]  }
  0x3a   :  { %v1266_v59 = vld [vmem:[#allocation2 + $0x348] ss:$28 sps:$4 sm:$0xff]   ;;  %v1275_v61 = vld [vmem:[#allocation2 + $0x14] ss:$28 sps:$4 sm:$0xff]   ;;  %v1296_v62 = vld [vmem:[#allocation2 + $0x2e0] ss:$28 sps:$4 sm:$0xff]  }
  0x3b   :  { %v1461_v60 = vld [vmem:[%s1501_s0] ss:$8 sps:$4 sm:$0xff]   ;;  %v1300_v63 = vld [vmem:[#allocation2 + $0x31c] ss:$28 sps:$4 sm:$0xff]   ;;  %v1273_v0 = vld [vmem:[#allocation2 + $0x10] ss:$28 sps:$4 sm:$0xff]  }
  0x3c   :  { %805 = vmatpush1.bf16.msra.mxu0 %v1209_v18  ;;  %846 = vmatpush1.bf16.msra.mxu1 %v1241_v24  ;;  %v1281_v1 = vld [vmem:[#allocation2 + $0x4c] ss:$28 sps:$4 sm:$0xff]   ;;  %v1302_v2 = vld [vmem:[#allocation2 + $0x318] ss:$28 sps:$4 sm:$0xff]   ;;  %v1287_v5 = vld [vmem:[#allocation2 + $0x84] ss:$28 sps:$4 sm:$0xff]  }
  0x3d   :  { %806 = vmatprep.subr.bf16.mxu0 %v1210_v19  ;;  %847 = vmatprep.subr.bf16.mxu1 %v1243_v25  ;;  %v1306_v3 = vld [vmem:[#allocation2 + $0x354] ss:$28 sps:$4 sm:$0xff]   ;;  %v1279_v4 = vld [vmem:[#allocation2 + $0x48] ss:$28 sps:$4 sm:$0xff]   ;;  %v1285_v8 = vld [vmem:[#allocation2 + $0x80] ss:$28 sps:$4 sm:$0xff]  }
  0x3e   :  { %v1308_v6 = vld [vmem:[#allocation2 + $0x350] ss:$28 sps:$4 sm:$0xff]   ;;  %v1312_v7 = vld [vmem:[#allocation2 + $0x1d8] ss:$28 sps:$4 sm:$0xff]   ;;  %v1322_v15 = vld [vmem:[#allocation2 + $0x248] ss:$28 sps:$4 sm:$0xff]  }
  0x3f   :  { %v1293_v9 = vld [vmem:[#allocation2 + $0xbc] ss:$28 sps:$4 sm:$0xff]   ;;  %v1317_v11 = vld [vmem:[#allocation2 + $0x210] ss:$28 sps:$4 sm:$0xff]   ;;  %v1326_v18 = vld [vmem:[#allocation2 + $0x88] ss:$28 sps:$4 sm:$0xff]  }
  0x40   :  { %807 = vmatpush1.bf16.msra.mxu0 %v1212_v22  ;;  %848 = vmatpush1.bf16.msra.mxu1 %v1247_v28  ;;  %v1316_v10 = vld [vmem:[#allocation2 + $0x18] ss:$28 sps:$4 sm:$0xff]   ;;  %v1321_v14 = vld [vmem:[#allocation2 + $0x50] ss:$28 sps:$4 sm:$0xff]   ;;  %v1327_v19 = vld [vmem:[#allocation2 + $0x280] ss:$28 sps:$4 sm:$0xff]  }
  0x41   :  { %808 = vmatprep.subr.bf16.mxu0 %v1215_v23  ;;  %849 = vmatprep.subr.bf16.mxu1 %v1249_v29  ;;  %v1291_v12 = vld [vmem:[#allocation2 + $0xb8] ss:$28 sps:$4 sm:$0xff]   ;;  %v1297_v16 = vld [vmem:[#allocation2 + $0xf0] ss:$28 sps:$4 sm:$0xff]   ;;  %v1303_v20 = vld [vmem:[#allocation2 + $0x128] ss:$28 sps:$4 sm:$0xff]  }
  0x42   :  { %v1299_v13 = vld [vmem:[#allocation2 + $0xf4] ss:$28 sps:$4 sm:$0xff]   ;;  %v1305_v17 = vld [vmem:[#allocation2 + $0x12c] ss:$28 sps:$4 sm:$0xff]   ;;  %v1311_v21 = vld [vmem:[#allocation2 + $0x164] ss:$28 sps:$4 sm:$0xff]  }
  0x43   :  { %v1331_v22 = vld [vmem:[#allocation2 + $0xc0] ss:$28 sps:$4 sm:$0xff]   ;;  %v1332_v23 = vld [vmem:[#allocation2 + $0x2b8] ss:$28 sps:$4 sm:$0xff]  }
  0x44   :  { %809 = vmatpush1.bf16.msra.mxu0 %v1218_v26  ;;  %850 = vmatpush1.bf16.msra.mxu1 %v1253_v32  ;;  %v1309_v24 = vld [vmem:[#allocation2 + $0x160] ss:$28 sps:$4 sm:$0xff]   ;;  %v1336_v26 = vld [vmem:[#allocation2 + $0xf8] ss:$28 sps:$4 sm:$0xff]   ;;  %v1318_v32 = vld [vmem:[#allocation2 + $0x1d0] ss:$28 sps:$4 sm:$0xff]  }
  0x45   :  { %810 = vmatprep.subr.bf16.mxu0 %v1221_v27  ;;  %851 = vmatprep.subr.bf16.mxu1 %v1255_v33  ;;  %v1315_v25 = vld [vmem:[#allocation2 + $0x19c] ss:$28 sps:$4 sm:$0xff]   ;;  %v1337_v27 = vld [vmem:[#allocation2 + $0x2f0] ss:$28 sps:$4 sm:$0xff]  }
  0x46   :  { %v1313_v28 = vld [vmem:[#allocation2 + $0x198] ss:$28 sps:$4 sm:$0xff]   ;;  %v1325_v33 = vld [vmem:[#allocation2 + $0x20c] ss:$28 sps:$4 sm:$0xff]  }
  0x47   :  { %v1320_v29 = vld [vmem:[#allocation2 + $0x1d4] ss:$28 sps:$4 sm:$0xff]  }
  0x48   :  { %811 = vmatpush1.bf16.msra.mxu0 %v1224_v30  ;;  %852 = vmatpush1.bf16.msra.mxu1 %v1259_v37  ;;  %v1341_v30 = vld [vmem:[#allocation2 + $0x130] ss:$28 sps:$4 sm:$0xff]   ;;  %v1330_v37 = vld [vmem:[#allocation2 + $0x244] ss:$28 sps:$4 sm:$0xff]  }
  0x49   :  { %812 = vmatprep.subr.bf16.mxu0 %v1227_v31  ;;  %853 = vmatprep.subr.bf16.mxu1 %v1261_v38  ;;  %v1342_v31 = vld [vmem:[#allocation2 + $0x328] ss:$28 sps:$4 sm:$0xff]   ;;  %v1351_v38 = vld [vmem:[#allocation2 + $0x1a0] ss:$28 sps:$4 sm:$0xff]  }
  0x4c   :  { %813 = vmatpush1.bf16.msra.mxu0 %v1230_v35  ;;  %854 = vmatpush1.bf16.msra.mxu1 %v1265_v41  ;;  %v1347_v35 = vld [vmem:[#allocation2 + $0x360] ss:$28 sps:$4 sm:$0xff]   ;;  %v1333_v41 = vld [vmem:[#allocation2 + $0x278] ss:$28 sps:$4 sm:$0xff]  }
  0x4d   :  { %814 = vmatprep.subr.bf16.mxu0 %v1233_v36  ;;  %855 = vmatprep.subr.bf16.mxu1 %v1269_v42  ;;  %v1323_v36 = vld [vmem:[#allocation2 + $0x208] ss:$28 sps:$4 sm:$0xff]   ;;  %v1340_v42 = vld [vmem:[#allocation2 + $0x2b4] ss:$28 sps:$4 sm:$0xff]  }
  0x50   :  { %815 = vmatpush1.bf16.msra.mxu0 %v1236_v39  ;;  %856 = vmatpush1.bf16.msra.mxu1 %v1272_v45  ;;  %v1328_v39 = vld [vmem:[#allocation2 + $0x240] ss:$28 sps:$4 sm:$0xff]   ;;  %v1343_v45 = vld [vmem:[#allocation2 + $0x2e8] ss:$28 sps:$4 sm:$0xff]  }
  0x51   :  { %816 = vmatprep.subr.bf16.mxu0 %v1239_v40  ;;  %857 = vmatprep.subr.bf16.mxu1 %v1276_v46  ;;  %v1335_v40 = vld [vmem:[#allocation2 + $0x27c] ss:$28 sps:$4 sm:$0xff]   ;;  %v1350_v46 = vld [vmem:[#allocation2 + $0x324] ss:$28 sps:$4 sm:$0xff]  }
  0x54   :  { %817 = vmatpush1.bf16.msra.mxu0 %v1242_v43  ;;  %858 = vmatpush1.bf16.msra.mxu1 %v1278_v49  ;;  %v1338_v43 = vld [vmem:[#allocation2 + $0x2b0] ss:$28 sps:$4 sm:$0xff]   ;;  %v1352_v49 = vld [vmem:[#allocation2 + $0x358] ss:$28 sps:$4 sm:$0xff]  }
  0x55   :  { %818 = vmatprep.subr.bf16.mxu0 %v1245_v44  ;;  %859 = vmatprep.subr.bf16.mxu1 %v1282_v50  ;;  %v1345_v44 = vld [vmem:[#allocation2 + $0x2ec] ss:$28 sps:$4 sm:$0xff]   ;;  %v173_v50 = vlaneseq }
  0x58   :  { %819 = vmatpush1.bf16.msra.mxu0 %v1248_v47  ;;  %860 = vmatpush1.bf16.msra.mxu1 %v1284_v53  ;;  %v1348_v47 = vld [vmem:[#allocation2 + $0x320] ss:$28 sps:$4 sm:$0xff]  }
  0x59   :  { %820 = vmatprep.subr.bf16.mxu0 %v1251_v48  ;;  %861 = vmatprep.subr.bf16.mxu1 %v1288_v54  ;;  %v1354_v48 = vld [vmem:[#allocation2 + $0x35c] ss:$28 sps:$4 sm:$0xff]   ;;  %v171_v53 = vld [vmem:[#allocation4] sm:$0xff] }
  0x5c   :  { %821 = vmatpush1.bf16.msra.mxu0 %v1254_v51  ;;  %862 = vmatpush1.bf16.msra.mxu1 %v1290_v57  ;;  %v174_v51 = vshrl.u32 %v173_v50, 7 }
  0x5d   :  { %822 = vmatprep.subr.bf16.mxu0 %v1257_v52  ;;  %863 = vmatprep.subr.bf16.mxu1 %v1294_v58 }
  0x5e   :  { %v191_v52 = vsub.s32 4, %v174_v51  ;;  %v175_v57 = vsub.s32 0, %v174_v51  ;;  %v179_v58 = vsub.s32 1, %v174_v51 }
  0x60   :  { %823 = vmatpush1.bf16.msra.mxu0 %v1260_v55  ;;  %864 = vmatpush1.bf16.msra.mxu1 %v1296_v62  ;;  %v1469_v54 = vrot.slane %v171_v53, %v191_v52  ;;  %v195_v55 = vsub.s32 5, %v174_v51 }
  0x61   :  { %824 = vmatprep.subr.bf16.mxu0 %v1263_v56  ;;  %865 = vmatprep.subr.bf16.mxu1 %v1300_v63 }
  0x62   :  { %v1471_v56 = vrot.slane %v171_v53, %v195_v55 }
  0x64   :  { %825 = vmatpush1.bf16.msra.mxu0 %v1266_v59  ;;  %866 = vmatpush1.bf16.msra.mxu1 %v1302_v2  ;;  %v176_v59 = vrot.slane %v171_v53, %v175_v57 }
  0x65   :  { %880 = vmatprep.subr.bf16.mxu0 %v1275_v61  ;;  %867 = vmatprep.subr.bf16.mxu1 %v1306_v3  ;;  %v180_v61 = vrot.slane %v171_v53, %v179_v58 }
  0x67   :  { %827 = vmatmul.mubr.bf16.vlgmr.msra.gmra.mrb[0].mxu0 %v1461_v60 }
  0x68   :  { %881 = vmatpush1.bf16.msra.mxu0 %v1273_v0  ;;  %912 = vmatprep.mubr.bf16.mxu0 %v1454_v34 }
  0x69   :  { %882 = vmatprep.subr.bf16.mxu0 %v1281_v1  ;;  %868 = vmatpush1.bf16.msra.mxu1 %v1308_v6 }
  0x6a   :  { %1166 = vmatprep.subr.bf16.mxu1 %v1312_v7 }
  0x6c   :  { %883 = vmatpush1.bf16.msra.mxu0 %v1279_v4  ;;  %870 = vmatmul.mubr.bf16.vlgmr.msra.gmra.mrb[0].mxu1 %v1461_v60 }
  0x6d   :  { %884 = vmatprep.subr.bf16.mxu0 %v1287_v5  ;;  %1167 = vmatpush3.bf16.msra.mxu1 %v1316_v10  ;;  %v183_v5 = vsub.s32 2, %v174_v51 }
  0x6e   :  { %955 = vmatprep.mubr.bf16.mxu1 %v1454_v34  ;;  %1168 = vmatprep.subr.bf16.mxu1 %v1317_v11  ;;  %v1346_v34 = vld [vmem:[#allocation2 + $0x168] ss:$28 sps:$4 sm:$0xff]  }
  0x70   :  { %885 = vmatpush1.bf16.msra.mxu0 %v1285_v8  ;;  %v187_v8 = vsub.s32 3, %v174_v51 }
  0x71   :  { %886 = vmatprep.subr.bf16.mxu0 %v1293_v9  ;;  %1169 = vmatpush3.bf16.msra.mxu1 %v1321_v14 }
  0x72   :  { %1170 = vmatprep.subr.bf16.mxu1 %v1322_v15  ;;  %v188_v14 = vrot.slane %v171_v53, %v187_v8 }
  0x74   :  { %887 = vmatpush1.bf16.msra.mxu0 %v1291_v12  ;;  %v184_v12 = vrot.slane %v171_v53, %v183_v5 }
  0x75   :  { %888 = vmatprep.subr.bf16.mxu0 %v1299_v13  ;;  %1171 = vmatpush3.bf16.msra.mxu1 %v1326_v18 }
  0x76   :  { %1172 = vmatprep.subr.bf16.mxu1 %v1327_v19 }
  0x78   :  { %889 = vmatpush1.bf16.msra.mxu0 %v1297_v16 }
  0x79   :  { %890 = vmatprep.subr.bf16.mxu0 %v1305_v17  ;;  %1173 = vmatpush3.bf16.msra.mxu1 %v1331_v22 }
  0x7a   :  { %1174 = vmatprep.subr.bf16.mxu1 %v1332_v23 }
  0x7c   :  { %891 = vmatpush1.bf16.msra.mxu0 %v1303_v20 }
  0x7d   :  { %892 = vmatprep.subr.bf16.mxu0 %v1311_v21  ;;  %1175 = vmatpush3.bf16.msra.mxu1 %v1336_v26 }
  0x7e   :  { %1176 = vmatprep.subr.bf16.mxu1 %v1337_v27 }
  0x80   :  { %893 = vmatpush1.bf16.msra.mxu0 %v1309_v24 }
  0x81   :  { %894 = vmatprep.subr.bf16.mxu0 %v1315_v25  ;;  %1177 = vmatpush3.bf16.msra.mxu1 %v1341_v30 }
  0x82   :  { %1178 = vmatprep.subr.bf16.mxu1 %v1342_v31 }
  0x84   :  { %895 = vmatpush1.bf16.msra.mxu0 %v1313_v28 }
  0x85   :  { %896 = vmatprep.subr.bf16.mxu0 %v1320_v29  ;;  %1179 = vmatpush3.bf16.msra.mxu1 %v1346_v34  ;;  %v199_v29 = vsub.s32 6, %v174_v51 }
  0x86   :  { %1180 = vmatprep.subr.bf16.mxu1 %v1347_v35 }
  0x87   :  { %v200_v31 = vrot.slane %v171_v53, %v199_v29 }
  0x88   :  { %897 = vmatpush1.bf16.msra.mxu0 %v1318_v32 }
  0x89   :  { %898 = vmatprep.subr.bf16.mxu0 %v1325_v33  ;;  %1181 = vmatpush3.bf16.msra.mxu1 %v1351_v38 }
  0x8c   :  { %899 = vmatpush1.bf16.msra.mxu0 %v1323_v36  ;;  %956 = vmatmul.mubr.bf16.vlgmr.msra.gmra.mrb[4].mxu1 %v1461_v60 }
  0x8d   :  { %900 = vmatprep.subr.bf16.mxu0 %v1330_v37 }
  0x90   :  { %901 = vmatpush1.bf16.msra.mxu0 %v1328_v39 }
  0x91   :  { %902 = vmatprep.subr.bf16.mxu0 %v1335_v40 }
  0x94   :  { %903 = vmatpush1.bf16.msra.mxu0 %v1333_v41 }
  0x95   :  { %904 = vmatprep.subr.bf16.mxu0 %v1340_v42 }
  0x98   :  { %905 = vmatpush1.bf16.msra.mxu0 %v1338_v43 }
  0x99   :  { %906 = vmatprep.subr.bf16.mxu0 %v1345_v44 }
  0x9c   :  { %907 = vmatpush1.bf16.msra.mxu0 %v1343_v45 }
  0x9d   :  { %908 = vmatprep.subr.bf16.mxu0 %v1350_v46 }
  0xa0   :  { %909 = vmatpush1.bf16.msra.mxu0 %v1348_v47 }
  0xa1   :  { %910 = vmatprep.subr.bf16.mxu0 %v1354_v48 }
  0xa4   :  { %911 = vmatpush1.bf16.msra.mxu0 %v1352_v49 }
  0xa7   :  { %913 = vmatmul.mubr.bf16.vlgmr.msra.gmra.mrb[4].mxu0 %v1461_v60 }
 0x13a   :  { %v828_v62 = vpop.f32.mrb[0].mxu0 }
 0x13b   :  { %v829_v63 = vadd.f32 %v828_v62, %v176_v59  ;;  %v830_v0 = vpop.f32.mrb[1].mxu0 }
 0x13c   :  { %v831_v1 = vadd.f32 %v830_v0, %v180_v61  ;;  %v832_v2 = vpop.f32.mrb[2].mxu0 }
 0x13d   :  { %v964_v3 = vmax.f32 %v829_v63, 0.0  ;;  %v833_v60 = vadd.f32 %v832_v2, %v176_v59  ;;  %v834_v4 = vpop.f32.mrb[3].mxu0 }
 0x13e   :  { %v965_v6 = vmax.f32 %v831_v1, 0.0  ;;  %v835_v7 = vadd.f32 %v834_v4, %v180_v61 }
 0x13f   :  { %v971_v9 = vmax.f32 %v833_v60, 0.0  ;;  %v871_v15 = vpop.f32.mrb[0].mxu1 }
 0x140   :  { %v1158_v10 = vpack.c.bf16 %v965_v6, %v964_v3  ;;  %v972_v11 = vmax.f32 %v835_v7, 0.0  ;;  %v872_v16 = vadd.f32 %v871_v15, %v184_v12  ;;  %v873_v17 = vpop.f32.mrb[1].mxu1 }
 0x141   :  { %v874_v18 = vadd.f32 %v873_v17, %v188_v14  ;;  %v875_v19 = vpop.f32.mrb[2].mxu1 }
 0x142   :  { %1022 = vst [vmem:[%s1504_s3] sm:$0xff] %v1158_v10  ;;  %v1162_v13 = vpack.c.bf16 %v972_v11, %v971_v9  ;;  %v966_v20 = vmax.f32 %v872_v16, 0.0  ;;  %v876_v21 = vadd.f32 %v875_v19, %v184_v12  ;;  %v877_v22 = vpop.f32.mrb[3].mxu1 }
 0x143   :  { %v967_v23 = vmax.f32 %v874_v18, 0.0  ;;  %v878_v24 = vadd.f32 %v877_v22, %v188_v14 }
 0x144   :  { %1026 = vst [vmem:[%s1504_s3 + $0x1c] sm:$0xff] %v1162_v13  ;;  %v973_v25 = vmax.f32 %v876_v21, 0.0 }
 0x145   :  { %v1159_v26 = vpack.c.bf16 %v967_v23, %v966_v20  ;;  %v974_v27 = vmax.f32 %v878_v24, 0.0 }
 0x147   :  { %1023 = vst [vmem:[%s1504_s3 + $0x8] sm:$0xff] %v1159_v26  ;;  %v1163_v28 = vpack.c.bf16 %v974_v27, %v973_v25 }
 0x149   :  { %1027 = vst [vmem:[%s1504_s3 + $0x24] sm:$0xff] %v1163_v28 }
 0x15f   :  { %v1182_v30 = vpop.f32.mrb[4].mxu1 }
 0x160   :  { %v1183_v32 = vpop.f32.mrb[5].mxu1 }
 0x161   :  { %v1184_v33 = vadd.f32 %v1183_v32, %v1182_v30  ;;  %v1185_v34 = vpop.f32.mrb[6].mxu1 }
 0x162   :  { %v1186_v35 = vpop.f32.mrb[7].mxu1 }
 0x163   :  { %v958_v36 = vadd.f32 %v1184_v33, %v200_v31  ;;  %v1187_v37 = vadd.f32 %v1186_v35, %v1185_v34 }
 0x165   :  { %v970_v38 = vmax.f32 %v958_v36, 0.0  ;;  %v961_v39 = vadd.f32 %v1187_v37, %v200_v31 }
 0x167   :  { %v1161_v40 = vpack.c.bf16 %v970_v38, %v970_v38  ;;  %v977_v41 = vmax.f32 %v961_v39, 0.0 }
 0x169   :  { %1025 = vst [vmem:[%s1504_s3 + $0x18] sm:$0xf] %v1161_v40  ;;  %v1165_v42 = vpack.c.bf16 %v977_v41, %v977_v41 }
 0x16b   :  { %1029 = vst [vmem:[%s1504_s3 + $0x34] sm:$0xf] %v1165_v42 }
 0x17a   :  { %v914_v43 = vpop.f32.mrb[4].mxu0 }
 0x17b   :  { %v915_v44 = vadd.f32 %v914_v43, %v1469_v54  ;;  %v916_v45 = vpop.f32.mrb[5].mxu0 }
 0x17c   :  { %v917_v46 = vadd.f32 %v916_v45, %v1471_v56  ;;  %v918_v47 = vpop.f32.mrb[6].mxu0 }
 0x17d   :  { %v968_v48 = vmax.f32 %v915_v44, 0.0  ;;  %v919_v49 = vadd.f32 %v918_v47, %v1469_v54  ;;  %v920_v50 = vpop.f32.mrb[7].mxu0 }
 0x17e   :  { %v969_v51 = vmax.f32 %v917_v46, 0.0  ;;  %v921_v52 = vadd.f32 %v920_v50, %v1471_v56 }
 0x17f   :  { %v975_v53 = vmax.f32 %v919_v49, 0.0 }
 0x180   :  { %v1160_v55 = vpack.c.bf16 %v969_v51, %v968_v48  ;;  %v976_v57 = vmax.f32 %v921_v52, 0.0 }
 0x182   :  { %1024 = vst [vmem:[%s1504_s3 + $0x10] sm:$0xff] %v1160_v55  ;;  %v1164_v58 = vpack.c.bf16 %v976_v57, %v975_v53 }
 0x184   :  { %1028 = vst [vmem:[%s1504_s3 + $0x2c] sm:$0xff] %v1164_v58 }
 0x185   :  { %1034 = vsyncpa [#allocation3], 1 }
 0x186   :  { %1035 = vsyncpa [#allocation5], 1 }

// kernel: conv_decoder_forward.7
= control target key start
LH: loop header
LB: loop body
LE: loop exit
PB: predicated region body
PF: predicated region fallthrough
CT: control target
= control target key end

     0   :  { %8 = vsyncpa [#allocation3], 0  ;;  %s1484_s0 = inlined_call_operand.vmem [shape: bf16[16,480], index: 0, kind: input, shape index: {}]   ;;  %s1485_s1 = inlined_call_operand.hbm [shape: bf16[480,512], index: 1, kind: input, shape index: {}]   ;;  %s1486_s2 = inlined_call_operand.hbm [shape: f32[1,512], index: 2, kind: input, shape index: {}]   ;;  %s1487_s3 = inlined_call_operand.vmem [shape: bf16[16,512], index: 3, kind: output, shape index: {}]  }
   0x1   :  { %9 = vsyncpa [#allocation5], 0  ;;  %s1412_s12 = smov [#allocation2]   ;;  %s1364_s16 = scalar_lea.hbm %s1485_s1, 15360 }
   0x2   :  { %s17_s13 = sshll.u32 %s1412_s12, 4  ;;  %p1365_p0 = scmp.ne.s32.totalorder %s1485_s1, %s1364_s16  ;;  %s18_s13 = int_to_ptr.vmem [resolvable:$true] %s17_s13 }
   0x3   :  { %p1368_p1 = scmp.lt.u32.totalorder %s1364_s16, %s1485_s1 }
   0x5   :  { %p1370_p2 = pnand %p1368_p1, %p1365_p0 }
   0x7   :  { %1373 = shalt.err (!%p1370_p2)
}
   0x8   :  { %s1374_s21 = scalar_lea.vmem %s18_s13, 15360  ;;  %p1379_p4 = scmp.lt.s32.totalorder %s18_s13, %s18_s13 }
   0x9   :  { %p1375_p3 = scmp.ne.s32.totalorder %s18_s13, %s1374_s21  ;;  %p1380_p5 = scmp.lt.s32.totalorder %s1374_s21, %s1374_s21 }
   0xb   :  { %p1381_p6 = por %p1380_p5, %p1379_p4 }
   0xd   :  { %p1382_p7 = pnand %p1381_p6, %p1375_p3 }
   0xf   :  { %1385 = shalt.err (!%p1382_p7)
}
  0x10   :  { %s1413_s22 = smov 256   ;;  %s1414_s23 = smov 16  }
  0x11   :  { %23 = dma.hbm_to_vmem [thread:$0]  %s1485_s1, 15360, %s18_s13, [#allocation3], %s1413_s22, %s1413_s22, %s1414_s23  }
  0x12   :  { %s1415_s26 = smov [#allocation4]   ;;  %s1386_s30 = scalar_lea.hbm %s1486_s2, 64 }
  0x13   :  { %s30_s27 = sshll.u32 %s1415_s26, 4  ;;  %p1387_p8 = scmp.ne.s32.totalorder %s1486_s2, %s1386_s30  ;;  %s31_s27 = int_to_ptr.vmem [resolvable:$true] %s30_s27 }
  0x14   :  { %p1390_p9 = scmp.lt.u32.totalorder %s1386_s30, %s1486_s2 }
  0x16   :  { %p1392_p10 = pnand %p1390_p9, %p1387_p8 }
  0x18   :  { %1395 = shalt.err (!%p1392_p10)
}
  0x19   :  { %s1396_s8 = scalar_lea.vmem %s31_s27, 64  ;;  %p1401_p12 = scmp.lt.s32.totalorder %s31_s27, %s31_s27 }
  0x1a   :  { %p1397_p11 = scmp.ne.s32.totalorder %s31_s27, %s1396_s8  ;;  %p1402_p13 = scmp.lt.s32.totalorder %s1396_s8, %s1396_s8 }
  0x1c   :  { %p1403_p0 = por %p1402_p13, %p1401_p12 }
  0x1e   :  { %p1404_p1 = pnand %p1403_p0, %p1397_p11 }
  0x20   :  { %1407 = shalt.err (!%p1404_p1)
}
  0x21   :  { %33 = dma.hbm_to_vmem [thread:$0]  %s1486_s2, 64, %s31_s27, [#allocation5]  }
  0x22   :  { %1408 = dma.done.wait [#allocation3], 15360  }
  0x23   :  { %1409 = vsyncadd [#allocation3], 4294951936 }
  0x24   :  { %1410 = dma.done.wait [#allocation5], 64  }
  0x25   :  { %1411 = vsyncadd [#allocation5], 4294967232  ;;  %v1178_v0 = vld [vmem:[#allocation2 + $0x4] ss:$16 sps:$4 sm:$0xff]   ;;  %v1180_v1 = vld [vmem:[#allocation2 + $0xc] ss:$16 sps:$4 sm:$0xff]  }
  0x26   :  { %810 = vmatprep.subr.bf16.mxu0 %v1178_v0  ;;  %v1182_v2 = vld [vmem:[#allocation2] ss:$16 sps:$4 sm:$0xff]   ;;  %v1183_v3 = vld [vmem:[#allocation2 + $0x8] ss:$16 sps:$4 sm:$0xff]   ;;  %896 = vmatprep.subr.bf16.mxu1 %v1180_v1  ;;  %v1184_v4 = vld [vmem:[#allocation2 + $0x24] ss:$16 sps:$4 sm:$0xff]  }
  0x27   :  { %811 = vmatpush1.bf16.msra.mxu0 %v1182_v2  ;;  %897 = vmatpush1.bf16.msra.mxu1 %v1183_v3  ;;  %v1186_v5 = vld [vmem:[#allocation2 + $0x2c] ss:$16 sps:$4 sm:$0xff]   ;;  %v1188_v6 = vld [vmem:[#allocation2 + $0x20] ss:$16 sps:$4 sm:$0xff]   ;;  %v1189_v7 = vld [vmem:[#allocation2 + $0x28] ss:$16 sps:$4 sm:$0xff]  }
  0x28   :  { %812 = vmatprep.subr.bf16.mxu0 %v1184_v4  ;;  %898 = vmatprep.subr.bf16.mxu1 %v1186_v5  ;;  %v1190_v8 = vld [vmem:[#allocation2 + $0x44] ss:$16 sps:$4 sm:$0xff]   ;;  %v1192_v9 = vld [vmem:[#allocation2 + $0x4c] ss:$16 sps:$4 sm:$0xff]   ;;  %v1194_v10 = vld [vmem:[#allocation2 + $0x40] ss:$16 sps:$4 sm:$0xff]  }
  0x29   :  { %v1195_v11 = vld [vmem:[#allocation2 + $0x48] ss:$16 sps:$4 sm:$0xff]   ;;  %v1196_v12 = vld [vmem:[#allocation2 + $0x64] ss:$16 sps:$4 sm:$0xff]   ;;  %v1198_v13 = vld [vmem:[#allocation2 + $0x6c] ss:$16 sps:$4 sm:$0xff]  }
  0x2a   :  { %v1200_v14 = vld [vmem:[#allocation2 + $0x60] ss:$16 sps:$4 sm:$0xff]   ;;  %v1201_v15 = vld [vmem:[#allocation2 + $0x68] ss:$16 sps:$4 sm:$0xff]   ;;  %v1202_v16 = vld [vmem:[#allocation2 + $0x84] ss:$16 sps:$4 sm:$0xff]  }
  0x2b   :  { %813 = vmatpush1.bf16.msra.mxu0 %v1188_v6  ;;  %899 = vmatpush1.bf16.msra.mxu1 %v1189_v7  ;;  %v1204_v17 = vld [vmem:[#allocation2 + $0x8c] ss:$16 sps:$4 sm:$0xff]   ;;  %v1206_v18 = vld [vmem:[#allocation2 + $0x80] ss:$16 sps:$4 sm:$0xff]   ;;  %v1207_v19 = vld [vmem:[#allocation2 + $0x88] ss:$16 sps:$4 sm:$0xff]  }
  0x2c   :  { %814 = vmatprep.subr.bf16.mxu0 %v1190_v8  ;;  %900 = vmatprep.subr.bf16.mxu1 %v1192_v9  ;;  %v1208_v20 = vld [vmem:[#allocation2 + $0xa4] ss:$16 sps:$4 sm:$0xff]   ;;  %v1210_v21 = vld [vmem:[#allocation2 + $0xac] ss:$16 sps:$4 sm:$0xff]   ;;  %v1212_v22 = vld [vmem:[#allocation2 + $0xa0] ss:$16 sps:$4 sm:$0xff]  }
  0x2d   :  { %v1213_v23 = vld [vmem:[#allocation2 + $0xa8] ss:$16 sps:$4 sm:$0xff]   ;;  %v1214_v24 = vld [vmem:[#allocation2 + $0xc4] ss:$16 sps:$4 sm:$0xff]   ;;  %v1216_v25 = vld [vmem:[#allocation2 + $0xcc] ss:$16 sps:$4 sm:$0xff]  }
  0x2e   :  { %v1218_v26 = vld [vmem:[#allocation2 + $0xc0] ss:$16 sps:$4 sm:$0xff]   ;;  %v1219_v27 = vld [vmem:[#allocation2 + $0xc8] ss:$16 sps:$4 sm:$0xff]   ;;  %v1220_v28 = vld [vmem:[#allocation2 + $0xe4] ss:$16 sps:$4 sm:$0xff]  }
  0x2f   :  { %815 = vmatpush1.bf16.msra.mxu0 %v1194_v10  ;;  %901 = vmatpush1.bf16.msra.mxu1 %v1195_v11  ;;  %v1222_v29 = vld [vmem:[#allocation2 + $0xec] ss:$16 sps:$4 sm:$0xff]   ;;  %v1224_v30 = vld [vmem:[#allocation2 + $0xe0] ss:$16 sps:$4 sm:$0xff]   ;;  %v1225_v31 = vld [vmem:[#allocation2 + $0xe8] ss:$16 sps:$4 sm:$0xff]  }
  0x30   :  { %816 = vmatprep.subr.bf16.mxu0 %v1196_v12  ;;  %902 = vmatprep.subr.bf16.mxu1 %v1198_v13  ;;  %v1226_v32 = vld [vmem:[#allocation2 + $0x104] ss:$16 sps:$4 sm:$0xff]   ;;  %v1228_v33 = vld [vmem:[#allocation2 + $0x10c] ss:$16 sps:$4 sm:$0xff]   ;;  %v1230_v34 = vld [vmem:[#allocation2 + $0x100] ss:$16 sps:$4 sm:$0xff]  }
  0x31   :  { %v1231_v35 = vld [vmem:[#allocation2 + $0x108] ss:$16 sps:$4 sm:$0xff]   ;;  %v1232_v36 = vld [vmem:[#allocation2 + $0x124] ss:$16 sps:$4 sm:$0xff]   ;;  %v1234_v37 = vld [vmem:[#allocation2 + $0x12c] ss:$16 sps:$4 sm:$0xff]  }
  0x32   :  { %v1236_v38 = vld [vmem:[#allocation2 + $0x120] ss:$16 sps:$4 sm:$0xff]   ;;  %v1237_v39 = vld [vmem:[#allocation2 + $0x128] ss:$16 sps:$4 sm:$0xff]   ;;  %v1238_v40 = vld [vmem:[#allocation2 + $0x144] ss:$16 sps:$4 sm:$0xff]  }
  0x33   :  { %817 = vmatpush1.bf16.msra.mxu0 %v1200_v14  ;;  %903 = vmatpush1.bf16.msra.mxu1 %v1201_v15  ;;  %v1240_v41 = vld [vmem:[#allocation2 + $0x14c] ss:$16 sps:$4 sm:$0xff]   ;;  %v1242_v42 = vld [vmem:[#allocation2 + $0x140] ss:$16 sps:$4 sm:$0xff]   ;;  %v1243_v43 = vld [vmem:[#allocation2 + $0x148] ss:$16 sps:$4 sm:$0xff]  }
  0x34   :  { %818 = vmatprep.subr.bf16.mxu0 %v1202_v16  ;;  %904 = vmatprep.subr.bf16.mxu1 %v1204_v17  ;;  %v1244_v44 = vld [vmem:[#allocation2 + $0x164] ss:$16 sps:$4 sm:$0xff]   ;;  %v1246_v45 = vld [vmem:[#allocation2 + $0x16c] ss:$16 sps:$4 sm:$0xff]   ;;  %v1248_v46 = vld [vmem:[#allocation2 + $0x160] ss:$16 sps:$4 sm:$0xff]  }
  0x35   :  { %v1249_v47 = vld [vmem:[#allocation2 + $0x168] ss:$16 sps:$4 sm:$0xff]   ;;  %v1276_v48 = vld [vmem:[%s1484_s0 + $0x4] ss:$16 sps:$4 sm:$0xff]   ;;  %v1252_v50 = vld [vmem:[#allocation2 + $0x18c] ss:$16 sps:$4 sm:$0xff]  }
  0x36   :  { %v1250_v49 = vld [vmem:[#allocation2 + $0x184] ss:$16 sps:$4 sm:$0xff]   ;;  %842 = vmatprep.mubr.bf16.mxu0 %v1276_v48  ;;  %928 = vmatprep.mubr.bf16.mxu1 %v1276_v48  ;;  %v1254_v51 = vld [vmem:[#allocation2 + $0x180] ss:$16 sps:$4 sm:$0xff]   ;;  %v1255_v52 = vld [vmem:[#allocation2 + $0x188] ss:$16 sps:$4 sm:$0xff]  }
  0x37   :  { %819 = vmatpush1.bf16.msra.mxu0 %v1206_v18  ;;  %905 = vmatpush1.bf16.msra.mxu1 %v1207_v19  ;;  %v1256_v53 = vld [vmem:[#allocation2 + $0x1a4] ss:$16 sps:$4 sm:$0xff]   ;;  %v1258_v54 = vld [vmem:[#allocation2 + $0x1ac] ss:$16 sps:$4 sm:$0xff]   ;;  %v1260_v55 = vld [vmem:[#allocation2 + $0x1a0] ss:$16 sps:$4 sm:$0xff]  }
  0x38   :  { %820 = vmatprep.subr.bf16.mxu0 %v1208_v20  ;;  %906 = vmatprep.subr.bf16.mxu1 %v1210_v21  ;;  %v1261_v56 = vld [vmem:[#allocation2 + $0x1a8] ss:$16 sps:$4 sm:$0xff]   ;;  %v1262_v57 = vld [vmem:[#allocation2 + $0x1c4] ss:$16 sps:$4 sm:$0xff]   ;;  %v1264_v58 = vld [vmem:[#allocation2 + $0x1cc] ss:$16 sps:$4 sm:$0xff]  }
  0x39   :  { %v1266_v59 = vld [vmem:[#allocation2 + $0x1c0] ss:$16 sps:$4 sm:$0xff]   ;;  %v1267_v60 = vld [vmem:[#allocation2 + $0x1c8] ss:$16 sps:$4 sm:$0xff]   ;;  %v1268_v61 = vld [vmem:[#allocation2 + $0x1e4] ss:$16 sps:$4 sm:$0xff]  }
  0x3a   :  { %v1270_v62 = vld [vmem:[#allocation2 + $0x1ec] ss:$16 sps:$4 sm:$0xff]   ;;  %v1272_v63 = vld [vmem:[#allocation2 + $0x1e0] ss:$16 sps:$4 sm:$0xff]   ;;  %v1273_v0 = vld [vmem:[#allocation2 + $0x1e8] ss:$16 sps:$4 sm:$0xff]  }
  0x3b   :  { %821 = vmatpush1.bf16.msra.mxu0 %v1212_v22  ;;  %907 = vmatpush1.bf16.msra.mxu1 %v1213_v23  ;;  %v1279_v1 = vld [vmem:[#allocation2 + $0x204] ss:$16 sps:$4 sm:$0xff]   ;;  %v1282_v2 = vld [vmem:[#allocation2 + $0x20c] ss:$16 sps:$4 sm:$0xff]   ;;  %v1274_v3 = vld [vmem:[%s1484_s0] ss:$16 sps:$4 sm:$0xff]  }
  0x3c   :  { %822 = vmatprep.subr.bf16.mxu0 %v1214_v24  ;;  %908 = vmatprep.subr.bf16.mxu1 %v1216_v25  ;;  %v1277_v4 = vld [vmem:[#allocation2 + $0x200] ss:$16 sps:$4 sm:$0xff]   ;;  %v1280_v5 = vld [vmem:[#allocation2 + $0x208] ss:$16 sps:$4 sm:$0xff]   ;;  %v1285_v6 = vld [vmem:[#allocation2 + $0x224] ss:$16 sps:$4 sm:$0xff]  }
  0x3d   :  { %v1288_v7 = vld [vmem:[#allocation2 + $0x22c] ss:$16 sps:$4 sm:$0xff]   ;;  %v1283_v8 = vld [vmem:[#allocation2 + $0x220] ss:$16 sps:$4 sm:$0xff]   ;;  %v1286_v9 = vld [vmem:[#allocation2 + $0x228] ss:$16 sps:$4 sm:$0xff]  }
  0x3e   :  { %v1291_v10 = vld [vmem:[#allocation2 + $0x244] ss:$16 sps:$4 sm:$0xff]   ;;  %v1294_v11 = vld [vmem:[#allocation2 + $0x24c] ss:$16 sps:$4 sm:$0xff]   ;;  %v1289_v12 = vld [vmem:[#allocation2 + $0x240] ss:$16 sps:$4 sm:$0xff]  }
  0x3f   :  { %823 = vmatpush1.bf16.msra.mxu0 %v1218_v26  ;;  %909 = vmatpush1.bf16.msra.mxu1 %v1219_v27  ;;  %v1292_v13 = vld [vmem:[#allocation2 + $0x248] ss:$16 sps:$4 sm:$0xff]   ;;  %v1297_v14 = vld [vmem:[#allocation2 + $0x264] ss:$16 sps:$4 sm:$0xff]   ;;  %v1300_v15 = vld [vmem:[#allocation2 + $0x26c] ss:$16 sps:$4 sm:$0xff]  }
  0x40   :  { %824 = vmatprep.subr.bf16.mxu0 %v1220_v28  ;;  %910 = vmatprep.subr.bf16.mxu1 %v1222_v29  ;;  %v1295_v16 = vld [vmem:[#allocation2 + $0x260] ss:$16 sps:$4 sm:$0xff]   ;;  %v1298_v17 = vld [vmem:[#allocation2 + $0x268] ss:$16 sps:$4 sm:$0xff]   ;;  %v1303_v18 = vld [vmem:[#allocation2 + $0x284] ss:$16 sps:$4 sm:$0xff]  }
  0x41   :  { %v1306_v19 = vld [vmem:[#allocation2 + $0x28c] ss:$16 sps:$4 sm:$0xff]   ;;  %v1301_v20 = vld [vmem:[#allocation2 + $0x280] ss:$16 sps:$4 sm:$0xff]   ;;  %v1304_v21 = vld [vmem:[#allocation2 + $0x288] ss:$16 sps:$4 sm:$0xff]  }
  0x42   :  { %v1309_v22 = vld [vmem:[#allocation2 + $0x2a4] ss:$16 sps:$4 sm:$0xff]   ;;  %v1312_v23 = vld [vmem:[#allocation2 + $0x2ac] ss:$16 sps:$4 sm:$0xff]   ;;  %vm806_vm0 = vcmask 785408  }
  0x43   :  { %825 = vmatpush1.bf16.msra.mxu0 %v1224_v30  ;;  %911 = vmatpush1.bf16.msra.mxu1 %v1225_v31  ;;  %v1361_v24 = vld [vmem:[%s1484_s0 + $0xc] ss:$16 sps:$4 sm:$0xff]   ;;  %v1307_v25 = vld [vmem:[#allocation2 + $0x2a0] ss:$16 sps:$4 sm:$0xff]   ;;  %v1310_v26 = vld [vmem:[#allocation2 + $0x2a8] ss:$16 sps:$4 sm:$0xff]  }
  0x44   :  { %826 = vmatprep.subr.bf16.mxu0 %v1226_v32  ;;  %912 = vmatprep.subr.bf16.mxu1 %v1228_v33  ;;  %v1315_v27 = vld [vmem:[#allocation2 + $0x2c4] ss:$16 sps:$4 sm:$0xff]   ;;  %v1318_v28 = vld [vmem:[#allocation2 + $0x2cc] ss:$16 sps:$4 sm:$0xff]   ;;  %v1313_v29 = vld [vmem:[#allocation2 + $0x2c0] ss:$16 sps:$4 sm:$0xff]  }
  0x45   :  { %v1316_v30 = vld [vmem:[#allocation2 + $0x2c8] ss:$16 sps:$4 sm:$0xff]   ;;  %v1321_v31 = vld [vmem:[#allocation2 + $0x2e4] ss:$16 sps:$4 sm:$0xff]   ;;  %v1324_v32 = vld [vmem:[#allocation2 + $0x2ec] ss:$16 sps:$4 sm:$0xff]  }
  0x46   :  { %v1319_v33 = vld [vmem:[#allocation2 + $0x2e0] ss:$16 sps:$4 sm:$0xff]   ;;  %v1348_v48 = vld [vmem:[#allocation2 + $0x36c] ss:$16 sps:$4 sm:$0xff]  }
  0x47   :  { %827 = vmatpush1.bf16.msra.mxu0 %v1230_v34  ;;  %913 = vmatpush1.bf16.msra.mxu1 %v1231_v35  ;;  %v1322_v34 = vld [vmem:[#allocation2 + $0x2e8] ss:$16 sps:$4 sm:$0xff]   ;;  %v1327_v35 = vld [vmem:[#allocation2 + $0x304] ss:$16 sps:$4 sm:$0xff]  }
  0x48   :  { %828 = vmatprep.subr.bf16.mxu0 %v1232_v36  ;;  %914 = vmatprep.subr.bf16.mxu1 %v1234_v37  ;;  %v1330_v36 = vld [vmem:[#allocation2 + $0x30c] ss:$16 sps:$4 sm:$0xff]   ;;  %v1325_v37 = vld [vmem:[#allocation2 + $0x300] ss:$16 sps:$4 sm:$0xff]  }
  0x4b   :  { %829 = vmatpush1.bf16.msra.mxu0 %v1236_v38  ;;  %915 = vmatpush1.bf16.msra.mxu1 %v1237_v39  ;;  %v1328_v38 = vld [vmem:[#allocation2 + $0x308] ss:$16 sps:$4 sm:$0xff]   ;;  %v1333_v39 = vld [vmem:[#allocation2 + $0x324] ss:$16 sps:$4 sm:$0xff]  }
  0x4c   :  { %830 = vmatprep.subr.bf16.mxu0 %v1238_v40  ;;  %916 = vmatprep.subr.bf16.mxu1 %v1240_v41  ;;  %v1336_v40 = vld [vmem:[#allocation2 + $0x32c] ss:$16 sps:$4 sm:$0xff]   ;;  %v1331_v41 = vld [vmem:[#allocation2 + $0x320] ss:$16 sps:$4 sm:$0xff]  }
  0x4f   :  { %831 = vmatpush1.bf16.msra.mxu0 %v1242_v42  ;;  %917 = vmatpush1.bf16.msra.mxu1 %v1243_v43  ;;  %v1334_v42 = vld [vmem:[#allocation2 + $0x328] ss:$16 sps:$4 sm:$0xff]   ;;  %v1339_v43 = vld [vmem:[#allocation2 + $0x344] ss:$16 sps:$4 sm:$0xff]  }
  0x50   :  { %832 = vmatprep.subr.bf16.mxu0 %v1244_v44  ;;  %918 = vmatprep.subr.bf16.mxu1 %v1246_v45  ;;  %v1342_v44 = vld [vmem:[#allocation2 + $0x34c] ss:$16 sps:$4 sm:$0xff]   ;;  %v1337_v45 = vld [vmem:[#allocation2 + $0x340] ss:$16 sps:$4 sm:$0xff]  }
  0x53   :  { %833 = vmatpush1.bf16.msra.mxu0 %v1248_v46  ;;  %919 = vmatpush1.bf16.msra.mxu1 %v1249_v47  ;;  %v1340_v46 = vld [vmem:[#allocation2 + $0x348] ss:$16 sps:$4 sm:$0xff]   ;;  %v1345_v47 = vld [vmem:[#allocation2 + $0x364] ss:$16 sps:$4 sm:$0xff]  }
  0x54   :  { %834 = vmatprep.subr.bf16.mxu0 %v1250_v49  ;;  %920 = vmatprep.subr.bf16.mxu1 %v1252_v50  ;;  %v1343_v49 = vld [vmem:[#allocation2 + $0x360] ss:$16 sps:$4 sm:$0xff]   ;;  %v1346_v50 = vld [vmem:[#allocation2 + $0x368] ss:$16 sps:$4 sm:$0xff]  }
  0x57   :  { %835 = vmatpush1.bf16.msra.mxu0 %v1254_v51  ;;  %921 = vmatpush1.bf16.msra.mxu1 %v1255_v52  ;;  %v1351_v51 = vld [vmem:[#allocation2 + $0x384] ss:$16 sps:$4 sm:$0xff]   ;;  %v1354_v52 = vld [vmem:[#allocation2 + $0x38c] ss:$16 sps:$4 sm:$0xff]  }
  0x58   :  { %836 = vmatprep.subr.bf16.mxu0 %v1256_v53  ;;  %922 = vmatprep.subr.bf16.mxu1 %v1258_v54  ;;  %v1349_v53 = vld [vmem:[#allocation2 + $0x380] ss:$16 sps:$4 sm:$0xff]   ;;  %v1352_v54 = vld [vmem:[#allocation2 + $0x388] ss:$16 sps:$4 sm:$0xff]  }
  0x5b   :  { %837 = vmatpush1.bf16.msra.mxu0 %v1260_v55  ;;  %923 = vmatpush1.bf16.msra.mxu1 %v1261_v56  ;;  %v1357_v55 = vld [vmem:[#allocation2 + $0x3a4] ss:$16 sps:$4 sm:$0xff]   ;;  %v1360_v56 = vld [vmem:[#allocation2 + $0x3ac] ss:$16 sps:$4 sm:$0xff]  }
  0x5c   :  { %838 = vmatprep.subr.bf16.mxu0 %v1262_v57  ;;  %924 = vmatprep.subr.bf16.mxu1 %v1264_v58  ;;  %v1355_v57 = vld [vmem:[#allocation2 + $0x3a0] ss:$16 sps:$4 sm:$0xff]   ;;  %v1358_v58 = vld [vmem:[#allocation2 + $0x3a8] ss:$16 sps:$4 sm:$0xff]  }
  0x5f   :  { %839 = vmatpush1.bf16.msra.mxu0 %v1266_v59  ;;  %925 = vmatpush1.bf16.msra.mxu1 %v1267_v60  ;;  %v1363_v59 = vld [vmem:[%s1484_s0 + $0x8] ss:$16 sps:$4 sm:$0xff]   ;;  %v167_v60 = vlaneseq }
  0x60   :  { %840 = vmatprep.subr.bf16.mxu0 %v1268_v61  ;;  %926 = vmatprep.subr.bf16.mxu1 %v1270_v62 }
  0x61   :  { %v168_v61 = vshrl.u32 %v167_v60, 7 }
  0x63   :  { %841 = vmatpush1.bf16.msra.mxu0 %v1272_v63  ;;  %927 = vmatpush1.bf16.msra.mxu1 %v1273_v0  ;;  %v169_v62 = vsub.s32 0, %v168_v61  ;;  %v177_v63 = vsub.s32 2, %v168_v61  ;;  %v165_v0 = vld [vmem:[#allocation4] sm:$0xf] }
  0x64   :  { %853 = vmatprep.subr.bf16.mxu0 %v1279_v1  ;;  %939 = vmatprep.subr.bf16.mxu1 %v1282_v2  ;;  %v173_v1 = vsub.s32 1, %v168_v61  ;;  %v181_v2 = vsub.s32 3, %v168_v61 }
  0x66   :  { %843 = vmatmul.mubr.bf16.vlgmr.msra.gmra.mrb[0].mxu0 %v1274_v3  ;;  %929 = vmatmul.mubr.bf16.vlgmr.msra.gmra.mrb[0].mxu1 %v1274_v3  ;;  %v170_v3 = vrot.slane %v165_v0, %v169_v62 }
  0x67   :  { %854 = vmatpush1.bf16.msra.mxu0 %v1277_v4  ;;  %940 = vmatpush1.bf16.msra.mxu1 %v1280_v5  ;;  %v178_v4 = vrot.slane %v165_v0, %v177_v63  ;;  %v174_v5 = vrot.slane %v165_v0, %v173_v1 }
  0x68   :  { %855 = vmatprep.subr.bf16.mxu0 %v1285_v6  ;;  %941 = vmatprep.subr.bf16.mxu1 %v1288_v7  ;;  %v182_v6 = vrot.slane %v165_v0, %v181_v2 }
  0x69   :  { %1148 = vmatprep.mubr.msk.bf16.mxu0 %vm806_vm0, %v1361_v24  ;;  %1149 = vmatprep.mubr.msk.bf16.mxu1 %vm806_vm0, %v1361_v24 }
  0x6b   :  { %856 = vmatpush1.bf16.msra.mxu0 %v1283_v8  ;;  %942 = vmatpush1.bf16.msra.mxu1 %v1286_v9 }
  0x6c   :  { %857 = vmatprep.subr.bf16.mxu0 %v1291_v10  ;;  %943 = vmatprep.subr.bf16.mxu1 %v1294_v11 }
  0x6f   :  { %858 = vmatpush1.bf16.msra.mxu0 %v1289_v12  ;;  %944 = vmatpush1.bf16.msra.mxu1 %v1292_v13 }
  0x70   :  { %859 = vmatprep.subr.bf16.mxu0 %v1297_v14  ;;  %945 = vmatprep.subr.bf16.mxu1 %v1300_v15 }
  0x73   :  { %860 = vmatpush1.bf16.msra.mxu0 %v1295_v16  ;;  %946 = vmatpush1.bf16.msra.mxu1 %v1298_v17 }
  0x74   :  { %861 = vmatprep.subr.bf16.mxu0 %v1303_v18  ;;  %947 = vmatprep.subr.bf16.mxu1 %v1306_v19 }
  0x77   :  { %862 = vmatpush1.bf16.msra.mxu0 %v1301_v20  ;;  %948 = vmatpush1.bf16.msra.mxu1 %v1304_v21 }
  0x78   :  { %863 = vmatprep.subr.bf16.mxu0 %v1309_v22  ;;  %949 = vmatprep.subr.bf16.mxu1 %v1312_v23 }
  0x7b   :  { %864 = vmatpush1.bf16.msra.mxu0 %v1307_v25  ;;  %950 = vmatpush1.bf16.msra.mxu1 %v1310_v26 }
  0x7c   :  { %865 = vmatprep.subr.bf16.mxu0 %v1315_v27  ;;  %951 = vmatprep.subr.bf16.mxu1 %v1318_v28 }
  0x7f   :  { %866 = vmatpush1.bf16.msra.mxu0 %v1313_v29  ;;  %952 = vmatpush1.bf16.msra.mxu1 %v1316_v30 }
  0x80   :  { %867 = vmatprep.subr.bf16.mxu0 %v1321_v31  ;;  %953 = vmatprep.subr.bf16.mxu1 %v1324_v32 }
  0x83   :  { %868 = vmatpush1.bf16.msra.mxu0 %v1319_v33  ;;  %954 = vmatpush1.bf16.msra.mxu1 %v1322_v34 }
  0x84   :  { %869 = vmatprep.subr.bf16.mxu0 %v1327_v35  ;;  %955 = vmatprep.subr.bf16.mxu1 %v1330_v36 }
  0x87   :  { %870 = vmatpush1.bf16.msra.mxu0 %v1325_v37  ;;  %956 = vmatpush1.bf16.msra.mxu1 %v1328_v38 }
  0x88   :  { %871 = vmatprep.subr.bf16.mxu0 %v1333_v39  ;;  %957 = vmatprep.subr.bf16.mxu1 %v1336_v40 }
  0x8b   :  { %872 = vmatpush1.bf16.msra.mxu0 %v1331_v41  ;;  %958 = vmatpush1.bf16.msra.mxu1 %v1334_v42 }
  0x8c   :  { %873 = vmatprep.subr.bf16.mxu0 %v1339_v43  ;;  %959 = vmatprep.subr.bf16.mxu1 %v1342_v44 }
  0x8f   :  { %874 = vmatpush1.bf16.msra.mxu0 %v1337_v45  ;;  %960 = vmatpush1.bf16.msra.mxu1 %v1340_v46 }
  0x90   :  { %875 = vmatprep.subr.bf16.mxu0 %v1345_v47  ;;  %961 = vmatprep.subr.bf16.mxu1 %v1348_v48 }
  0x93   :  { %876 = vmatpush1.bf16.msra.mxu0 %v1343_v49  ;;  %962 = vmatpush1.bf16.msra.mxu1 %v1346_v50 }
  0x94   :  { %877 = vmatprep.subr.bf16.mxu0 %v1351_v51  ;;  %963 = vmatprep.subr.bf16.mxu1 %v1354_v52 }
  0x97   :  { %878 = vmatpush1.bf16.msra.mxu0 %v1349_v53  ;;  %964 = vmatpush1.bf16.msra.mxu1 %v1352_v54 }
  0x98   :  { %879 = vmatprep.subr.bf16.mxu0 %v1357_v55  ;;  %965 = vmatprep.subr.bf16.mxu1 %v1360_v56 }
  0x9b   :  { %880 = vmatpush1.bf16.msra.mxu0 %v1355_v57  ;;  %966 = vmatpush1.bf16.msra.mxu1 %v1358_v58 }
  0x9e   :  { %886 = vmatmul.mubr.bf16.vlgmr.msra.gmra.mrb[0].mxu0 %v1363_v59  ;;  %972 = vmatmul.mubr.bf16.vlgmr.msra.gmra.mrb[0].mxu1 %v1363_v59 }
 0x171   :  { %v887_v7 = vpop.f32.mrb[0].mxu0  ;;  %v973_v8 = vpop.f32.mrb[0].mxu1 }
 0x172   :  { %v1158_v9 = vadd.f32 %v887_v7, %v170_v3  ;;  %v1162_v10 = vadd.f32 %v973_v8, %v178_v4  ;;  %v889_v11 = vpop.f32.mrb[1].mxu0  ;;  %v975_v12 = vpop.f32.mrb[1].mxu1 }
 0x173   :  { %v1159_v13 = vadd.f32 %v889_v11, %v174_v5  ;;  %v1163_v14 = vadd.f32 %v975_v12, %v182_v6  ;;  %v891_v15 = vpop.f32.mrb[2].mxu0  ;;  %v977_v16 = vpop.f32.mrb[2].mxu1 }
 0x174   :  { %v982_v17 = vmax.f32 %v1158_v9, 0.0  ;;  %v984_v18 = vmax.f32 %v1162_v10, 0.0  ;;  %v1160_v19 = vadd.f32 %v891_v15, %v170_v3  ;;  %v1164_v20 = vadd.f32 %v977_v16, %v178_v4  ;;  %v893_v21 = vpop.f32.mrb[3].mxu0  ;;  %v979_v22 = vpop.f32.mrb[3].mxu1 }
 0x175   :  { %v983_v23 = vmax.f32 %v1159_v13, 0.0  ;;  %v985_v24 = vmax.f32 %v1163_v14, 0.0  ;;  %v1161_v25 = vadd.f32 %v893_v21, %v174_v5  ;;  %v1165_v26 = vadd.f32 %v979_v22, %v182_v6 }
 0x176   :  { %v986_v27 = vmax.f32 %v1160_v19, 0.0  ;;  %v988_v28 = vmax.f32 %v1164_v20, 0.0 }
 0x177   :  { %v1154_v29 = vpack.c.bf16 %v983_v23, %v982_v17  ;;  %v1155_v30 = vpack.c.bf16 %v985_v24, %v984_v18  ;;  %v987_v31 = vmax.f32 %v1161_v25, 0.0  ;;  %v989_v32 = vmax.f32 %v1165_v26, 0.0 }
 0x179   :  { %1014 = vst [vmem:[%s1487_s3] sm:$0xff] %v1154_v29  ;;  %1015 = vst [vmem:[%s1487_s3 + $0x8] sm:$0xff] %v1155_v30  ;;  %v1156_v33 = vpack.c.bf16 %v987_v31, %v986_v27  ;;  %v1157_v34 = vpack.c.bf16 %v989_v32, %v988_v28 }
 0x17b   :  { %1016 = vst [vmem:[%s1487_s3 + $0x10] sm:$0xff] %v1156_v33  ;;  %1017 = vst [vmem:[%s1487_s3 + $0x18] sm:$0xff] %v1157_v34 }
 0x17c   :  { %1022 = vsyncpa [#allocation3], 1 }
 0x17d   :  { %1023 = vsyncpa [#allocation5], 1 }

// kernel: conv_decoder_forward.8
= control target key start
LH: loop header
LB: loop body
LE: loop exit
PB: predicated region body
PF: predicated region fallthrough
CT: control target
= control target key end

     0   :  { %vm1035_vm0 = vcmask 916480   ;;  %s2465_s1 = inlined_call_operand.vmem [shape: bf16[624,512], index: 1, kind: input, shape index: {}]   ;;  %s2466_s0 = inlined_call_operand.vmem [shape: bf16[32,624], index: 0, kind: input, shape index: {}]   ;;  %s2467_s2 = inlined_call_operand.vmem [shape: f32[1,512], index: 2, kind: input, shape index: {}]   ;;  %s2468_s3 = inlined_call_operand.vmem [shape: bf16[32,512], index: 3, kind: output, shape index: {}]  }
   0x1   :  { %v1671_v0 = vld [vmem:[%s2465_s1 + $0x4] ss:$16 sps:$4 sm:$0xff]   ;;  %v1673_v1 = vld [vmem:[%s2465_s1 + $0xc] ss:$16 sps:$4 sm:$0xff]   ;;  %v1675_v2 = vld [vmem:[%s2465_s1] ss:$16 sps:$4 sm:$0xff]  }
   0x2   :  { %1042 = vmatprep.subr.bf16.mxu0 %v1671_v0  ;;  %v1676_v3 = vld [vmem:[%s2465_s1 + $0x8] ss:$16 sps:$4 sm:$0xff]   ;;  %1201 = vmatprep.subr.bf16.mxu1 %v1673_v1  ;;  %v1677_v4 = vld [vmem:[%s2465_s1 + $0x24] ss:$16 sps:$4 sm:$0xff]   ;;  %v1679_v5 = vld [vmem:[%s2465_s1 + $0x2c] ss:$16 sps:$4 sm:$0xff]  }
   0x3   :  { %1043 = vmatpush1.bf16.msra.mxu0 %v1675_v2  ;;  %1202 = vmatpush1.bf16.msra.mxu1 %v1676_v3  ;;  %v1681_v6 = vld [vmem:[%s2465_s1 + $0x20] ss:$16 sps:$4 sm:$0xff]   ;;  %v1682_v7 = vld [vmem:[%s2465_s1 + $0x28] ss:$16 sps:$4 sm:$0xff]   ;;  %v1683_v8 = vld [vmem:[%s2465_s1 + $0x44] ss:$16 sps:$4 sm:$0xff]  }
   0x4   :  { %1044 = vmatprep.subr.bf16.mxu0 %v1677_v4  ;;  %1203 = vmatprep.subr.bf16.mxu1 %v1679_v5  ;;  %v1685_v9 = vld [vmem:[%s2465_s1 + $0x4c] ss:$16 sps:$4 sm:$0xff]   ;;  %v1687_v10 = vld [vmem:[%s2465_s1 + $0x40] ss:$16 sps:$4 sm:$0xff]   ;;  %v1688_v11 = vld [vmem:[%s2465_s1 + $0x48] ss:$16 sps:$4 sm:$0xff]  }
   0x5   :  { %v1689_v12 = vld [vmem:[%s2465_s1 + $0x64] ss:$16 sps:$4 sm:$0xff]   ;;  %v1691_v13 = vld [vmem:[%s2465_s1 + $0x6c] ss:$16 sps:$4 sm:$0xff]   ;;  %v1693_v14 = vld [vmem:[%s2465_s1 + $0x60] ss:$16 sps:$4 sm:$0xff]  }
   0x6   :  { %v1694_v15 = vld [vmem:[%s2465_s1 + $0x68] ss:$16 sps:$4 sm:$0xff]   ;;  %v1695_v16 = vld [vmem:[%s2465_s1 + $0x84] ss:$16 sps:$4 sm:$0xff]   ;;  %v1697_v17 = vld [vmem:[%s2465_s1 + $0x8c] ss:$16 sps:$4 sm:$0xff]  }
   0x7   :  { %1045 = vmatpush1.bf16.msra.mxu0 %v1681_v6  ;;  %1204 = vmatpush1.bf16.msra.mxu1 %v1682_v7  ;;  %v1699_v18 = vld [vmem:[%s2465_s1 + $0x80] ss:$16 sps:$4 sm:$0xff]   ;;  %v1700_v19 = vld [vmem:[%s2465_s1 + $0x88] ss:$16 sps:$4 sm:$0xff]   ;;  %v1701_v20 = vld [vmem:[%s2465_s1 + $0xa4] ss:$16 sps:$4 sm:$0xff]  }
   0x8   :  { %1046 = vmatprep.subr.bf16.mxu0 %v1683_v8  ;;  %1205 = vmatprep.subr.bf16.mxu1 %v1685_v9  ;;  %v1703_v21 = vld [vmem:[%s2465_s1 + $0xac] ss:$16 sps:$4 sm:$0xff]   ;;  %v1705_v22 = vld [vmem:[%s2465_s1 + $0xa0] ss:$16 sps:$4 sm:$0xff]   ;;  %v1706_v23 = vld [vmem:[%s2465_s1 + $0xa8] ss:$16 sps:$4 sm:$0xff]  }
   0x9   :  { %v1707_v24 = vld [vmem:[%s2465_s1 + $0xc4] ss:$16 sps:$4 sm:$0xff]   ;;  %v1709_v25 = vld [vmem:[%s2465_s1 + $0xcc] ss:$16 sps:$4 sm:$0xff]   ;;  %v1711_v26 = vld [vmem:[%s2465_s1 + $0xc0] ss:$16 sps:$4 sm:$0xff]  }
   0xa   :  { %v1712_v27 = vld [vmem:[%s2465_s1 + $0xc8] ss:$16 sps:$4 sm:$0xff]   ;;  %v1713_v28 = vld [vmem:[%s2465_s1 + $0xe4] ss:$16 sps:$4 sm:$0xff]   ;;  %v1715_v29 = vld [vmem:[%s2465_s1 + $0xec] ss:$16 sps:$4 sm:$0xff]  }
   0xb   :  { %1047 = vmatpush1.bf16.msra.mxu0 %v1687_v10  ;;  %1206 = vmatpush1.bf16.msra.mxu1 %v1688_v11  ;;  %v1717_v30 = vld [vmem:[%s2465_s1 + $0xe0] ss:$16 sps:$4 sm:$0xff]   ;;  %v1718_v31 = vld [vmem:[%s2465_s1 + $0xe8] ss:$16 sps:$4 sm:$0xff]   ;;  %v1719_v32 = vld [vmem:[%s2465_s1 + $0x104] ss:$16 sps:$4 sm:$0xff]  }
   0xc   :  { %1048 = vmatprep.subr.bf16.mxu0 %v1689_v12  ;;  %1207 = vmatprep.subr.bf16.mxu1 %v1691_v13  ;;  %v1721_v33 = vld [vmem:[%s2465_s1 + $0x10c] ss:$16 sps:$4 sm:$0xff]   ;;  %v1723_v34 = vld [vmem:[%s2465_s1 + $0x100] ss:$16 sps:$4 sm:$0xff]   ;;  %v1724_v35 = vld [vmem:[%s2465_s1 + $0x108] ss:$16 sps:$4 sm:$0xff]  }
   0xd   :  { %v1725_v36 = vld [vmem:[%s2465_s1 + $0x124] ss:$16 sps:$4 sm:$0xff]   ;;  %v1727_v37 = vld [vmem:[%s2465_s1 + $0x12c] ss:$16 sps:$4 sm:$0xff]   ;;  %v1729_v38 = vld [vmem:[%s2465_s1 + $0x120] ss:$16 sps:$4 sm:$0xff]  }
   0xe   :  { %v1730_v39 = vld [vmem:[%s2465_s1 + $0x128] ss:$16 sps:$4 sm:$0xff]   ;;  %v1731_v40 = vld [vmem:[%s2465_s1 + $0x144] ss:$16 sps:$4 sm:$0xff]   ;;  %v1733_v41 = vld [vmem:[%s2465_s1 + $0x14c] ss:$16 sps:$4 sm:$0xff]  }
   0xf   :  { %1049 = vmatpush1.bf16.msra.mxu0 %v1693_v14  ;;  %1208 = vmatpush1.bf16.msra.mxu1 %v1694_v15  ;;  %v1735_v42 = vld [vmem:[%s2465_s1 + $0x140] ss:$16 sps:$4 sm:$0xff]   ;;  %v1736_v43 = vld [vmem:[%s2465_s1 + $0x148] ss:$16 sps:$4 sm:$0xff]   ;;  %v1737_v44 = vld [vmem:[%s2465_s1 + $0x164] ss:$16 sps:$4 sm:$0xff]  }
  0x10   :  { %1050 = vmatprep.subr.bf16.mxu0 %v1695_v16  ;;  %1209 = vmatprep.subr.bf16.mxu1 %v1697_v17  ;;  %v1739_v45 = vld [vmem:[%s2465_s1 + $0x16c] ss:$16 sps:$4 sm:$0xff]   ;;  %v1741_v46 = vld [vmem:[%s2465_s1 + $0x160] ss:$16 sps:$4 sm:$0xff]   ;;  %v1742_v47 = vld [vmem:[%s2465_s1 + $0x168] ss:$16 sps:$4 sm:$0xff]  }
  0x11   :  { %v1769_v48 = vld [vmem:[%s2466_s0 + $0x4] ss:$20 sps:$4 sm:$0xff]   ;;  %v1745_v50 = vld [vmem:[%s2465_s1 + $0x18c] ss:$16 sps:$4 sm:$0xff]   ;;  %v1747_v51 = vld [vmem:[%s2465_s1 + $0x180] ss:$16 sps:$4 sm:$0xff]  }
  0x12   :  { %v1743_v49 = vld [vmem:[%s2465_s1 + $0x184] ss:$16 sps:$4 sm:$0xff]   ;;  %1074 = vmatprep.mubr.bf16.mxu0 %v1769_v48  ;;  %1233 = vmatprep.mubr.bf16.mxu1 %v1769_v48  ;;  %v1748_v52 = vld [vmem:[%s2465_s1 + $0x188] ss:$16 sps:$4 sm:$0xff]   ;;  %v1751_v54 = vld [vmem:[%s2465_s1 + $0x1ac] ss:$16 sps:$4 sm:$0xff]  }
  0x13   :  { %1051 = vmatpush1.bf16.msra.mxu0 %v1699_v18  ;;  %1210 = vmatpush1.bf16.msra.mxu1 %v1700_v19  ;;  %v1749_v53 = vld [vmem:[%s2465_s1 + $0x1a4] ss:$16 sps:$4 sm:$0xff]   ;;  %v1753_v55 = vld [vmem:[%s2465_s1 + $0x1a0] ss:$16 sps:$4 sm:$0xff]   ;;  %v1754_v56 = vld [vmem:[%s2465_s1 + $0x1a8] ss:$16 sps:$4 sm:$0xff]  }
  0x14   :  { %1052 = vmatprep.subr.bf16.mxu0 %v1701_v20  ;;  %1211 = vmatprep.subr.bf16.mxu1 %v1703_v21  ;;  %v1755_v57 = vld [vmem:[%s2465_s1 + $0x1c4] ss:$16 sps:$4 sm:$0xff]   ;;  %v1757_v58 = vld [vmem:[%s2465_s1 + $0x1cc] ss:$16 sps:$4 sm:$0xff]   ;;  %v1759_v59 = vld [vmem:[%s2465_s1 + $0x1c0] ss:$16 sps:$4 sm:$0xff]  }
  0x15   :  { %v1760_v60 = vld [vmem:[%s2465_s1 + $0x1c8] ss:$16 sps:$4 sm:$0xff]   ;;  %v1761_v61 = vld [vmem:[%s2465_s1 + $0x1e4] ss:$16 sps:$4 sm:$0xff]   ;;  %v1763_v62 = vld [vmem:[%s2465_s1 + $0x1ec] ss:$16 sps:$4 sm:$0xff]  }
  0x16   :  { %v1765_v63 = vld [vmem:[%s2465_s1 + $0x1e0] ss:$16 sps:$4 sm:$0xff]   ;;  %v1766_v0 = vld [vmem:[%s2465_s1 + $0x1e8] ss:$16 sps:$4 sm:$0xff]   ;;  %v1772_v1 = vld [vmem:[%s2465_s1 + $0x204] ss:$16 sps:$4 sm:$0xff]  }
  0x17   :  { %1053 = vmatpush1.bf16.msra.mxu0 %v1705_v22  ;;  %1212 = vmatpush1.bf16.msra.mxu1 %v1706_v23  ;;  %v1775_v2 = vld [vmem:[%s2465_s1 + $0x20c] ss:$16 sps:$4 sm:$0xff]   ;;  %v1767_v3 = vld [vmem:[%s2466_s0] ss:$20 sps:$4 sm:$0xff]   ;;  %v1773_v5 = vld [vmem:[%s2465_s1 + $0x208] ss:$16 sps:$4 sm:$0xff]  }
  0x18   :  { %1054 = vmatprep.subr.bf16.mxu0 %v1707_v24  ;;  %1213 = vmatprep.subr.bf16.mxu1 %v1709_v25  ;;  %v1770_v4 = vld [vmem:[%s2465_s1 + $0x200] ss:$16 sps:$4 sm:$0xff]   ;;  %v1778_v6 = vld [vmem:[%s2465_s1 + $0x224] ss:$16 sps:$4 sm:$0xff]   ;;  %v1781_v7 = vld [vmem:[%s2465_s1 + $0x22c] ss:$16 sps:$4 sm:$0xff]  }
  0x19   :  { %v1776_v8 = vld [vmem:[%s2465_s1 + $0x220] ss:$16 sps:$4 sm:$0xff]   ;;  %v1779_v9 = vld [vmem:[%s2465_s1 + $0x228] ss:$16 sps:$4 sm:$0xff]   ;;  %v1784_v10 = vld [vmem:[%s2465_s1 + $0x244] ss:$16 sps:$4 sm:$0xff]  }
  0x1a   :  { %v1787_v11 = vld [vmem:[%s2465_s1 + $0x24c] ss:$16 sps:$4 sm:$0xff]   ;;  %v1782_v12 = vld [vmem:[%s2465_s1 + $0x240] ss:$16 sps:$4 sm:$0xff]   ;;  %v1785_v13 = vld [vmem:[%s2465_s1 + $0x248] ss:$16 sps:$4 sm:$0xff]  }
  0x1b   :  { %1055 = vmatpush1.bf16.msra.mxu0 %v1711_v26  ;;  %1214 = vmatpush1.bf16.msra.mxu1 %v1712_v27  ;;  %v1790_v14 = vld [vmem:[%s2465_s1 + $0x264] ss:$16 sps:$4 sm:$0xff]   ;;  %v1793_v15 = vld [vmem:[%s2465_s1 + $0x26c] ss:$16 sps:$4 sm:$0xff]   ;;  %v1788_v16 = vld [vmem:[%s2465_s1 + $0x260] ss:$16 sps:$4 sm:$0xff]  }
  0x1c   :  { %1056 = vmatprep.subr.bf16.mxu0 %v1713_v28  ;;  %1215 = vmatprep.subr.bf16.mxu1 %v1715_v29  ;;  %v1791_v17 = vld [vmem:[%s2465_s1 + $0x268] ss:$16 sps:$4 sm:$0xff]   ;;  %v1796_v18 = vld [vmem:[%s2465_s1 + $0x284] ss:$16 sps:$4 sm:$0xff]   ;;  %v1799_v19 = vld [vmem:[%s2465_s1 + $0x28c] ss:$16 sps:$4 sm:$0xff]  }
  0x1d   :  { %v1794_v20 = vld [vmem:[%s2465_s1 + $0x280] ss:$16 sps:$4 sm:$0xff]   ;;  %v1797_v21 = vld [vmem:[%s2465_s1 + $0x288] ss:$16 sps:$4 sm:$0xff]   ;;  %v1802_v22 = vld [vmem:[%s2465_s1 + $0x2a4] ss:$16 sps:$4 sm:$0xff]  }
  0x1e   :  { %v1805_v23 = vld [vmem:[%s2465_s1 + $0x2ac] ss:$16 sps:$4 sm:$0xff]   ;;  %v1800_v25 = vld [vmem:[%s2465_s1 + $0x2a0] ss:$16 sps:$4 sm:$0xff]   ;;  %v1803_v26 = vld [vmem:[%s2465_s1 + $0x2a8] ss:$16 sps:$4 sm:$0xff]  }
  0x1f   :  { %1057 = vmatpush1.bf16.msra.mxu0 %v1717_v30  ;;  %1216 = vmatpush1.bf16.msra.mxu1 %v1718_v31  ;;  %v1854_v24 = vld [vmem:[%s2466_s0 + $0x2c] ss:$20 sps:$4 sm:$0xff]   ;;  %v1808_v27 = vld [vmem:[%s2465_s1 + $0x2c4] ss:$16 sps:$4 sm:$0xff]   ;;  %v1862_v29 = vld [vmem:[%s2466_s0 + $0x28] ss:$20 sps:$4 sm:$0xff]  }
  0x20   :  { %1058 = vmatprep.subr.bf16.mxu0 %v1719_v32  ;;  %1217 = vmatprep.subr.bf16.mxu1 %v1721_v33  ;;  %v1811_v28 = vld [vmem:[%s2465_s1 + $0x2cc] ss:$16 sps:$4 sm:$0xff]   ;;  %v1806_v30 = vld [vmem:[%s2465_s1 + $0x2c0] ss:$16 sps:$4 sm:$0xff]   ;;  %v1809_v31 = vld [vmem:[%s2465_s1 + $0x2c8] ss:$16 sps:$4 sm:$0xff]  }
  0x21   :  { %v1814_v32 = vld [vmem:[%s2465_s1 + $0x2e4] ss:$16 sps:$4 sm:$0xff]   ;;  %v1817_v33 = vld [vmem:[%s2465_s1 + $0x2ec] ss:$16 sps:$4 sm:$0xff]   ;;  %v1833_v48 = vld [vmem:[%s2465_s1 + $0x348] ss:$16 sps:$4 sm:$0xff]  }
  0x23   :  { %1059 = vmatpush1.bf16.msra.mxu0 %v1723_v34  ;;  %1218 = vmatpush1.bf16.msra.mxu1 %v1724_v35  ;;  %v1871_v34 = vld [vmem:[%s2466_s0 + $0xc] ss:$20 sps:$4 sm:$0xff]  }
  0x24   :  { %1060 = vmatprep.subr.bf16.mxu0 %v1725_v36  ;;  %1219 = vmatprep.subr.bf16.mxu1 %v1727_v37  ;;  %v1812_v35 = vld [vmem:[%s2465_s1 + $0x2e0] ss:$16 sps:$4 sm:$0xff]   ;;  %v1815_v36 = vld [vmem:[%s2465_s1 + $0x2e8] ss:$16 sps:$4 sm:$0xff]   ;;  %v1820_v37 = vld [vmem:[%s2465_s1 + $0x304] ss:$16 sps:$4 sm:$0xff]  }
  0x27   :  { %1061 = vmatpush1.bf16.msra.mxu0 %v1729_v38  ;;  %1220 = vmatpush1.bf16.msra.mxu1 %v1730_v39  ;;  %v1823_v38 = vld [vmem:[%s2465_s1 + $0x30c] ss:$16 sps:$4 sm:$0xff]   ;;  %v1818_v39 = vld [vmem:[%s2465_s1 + $0x300] ss:$16 sps:$4 sm:$0xff]  }
  0x28   :  { %1062 = vmatprep.subr.bf16.mxu0 %v1731_v40  ;;  %1221 = vmatprep.subr.bf16.mxu1 %v1733_v41  ;;  %v1821_v40 = vld [vmem:[%s2465_s1 + $0x308] ss:$16 sps:$4 sm:$0xff]   ;;  %v1826_v41 = vld [vmem:[%s2465_s1 + $0x324] ss:$16 sps:$4 sm:$0xff]  }
  0x2b   :  { %1063 = vmatpush1.bf16.msra.mxu0 %v1735_v42  ;;  %1222 = vmatpush1.bf16.msra.mxu1 %v1736_v43  ;;  %v1829_v42 = vld [vmem:[%s2465_s1 + $0x32c] ss:$16 sps:$4 sm:$0xff]   ;;  %v1824_v43 = vld [vmem:[%s2465_s1 + $0x320] ss:$16 sps:$4 sm:$0xff]  }
  0x2c   :  { %1064 = vmatprep.subr.bf16.mxu0 %v1737_v44  ;;  %1223 = vmatprep.subr.bf16.mxu1 %v1739_v45  ;;  %v1827_v44 = vld [vmem:[%s2465_s1 + $0x328] ss:$16 sps:$4 sm:$0xff]   ;;  %v1832_v45 = vld [vmem:[%s2465_s1 + $0x344] ss:$16 sps:$4 sm:$0xff]  }
  0x2f   :  { %1065 = vmatpush1.bf16.msra.mxu0 %v1741_v46  ;;  %1224 = vmatpush1.bf16.msra.mxu1 %v1742_v47  ;;  %v1835_v46 = vld [vmem:[%s2465_s1 + $0x34c] ss:$16 sps:$4 sm:$0xff]   ;;  %v1830_v47 = vld [vmem:[%s2465_s1 + $0x340] ss:$16 sps:$4 sm:$0xff]  }
  0x30   :  { %1066 = vmatprep.subr.bf16.mxu0 %v1743_v49  ;;  %1225 = vmatprep.subr.bf16.mxu1 %v1745_v50  ;;  %v1838_v49 = vld [vmem:[%s2465_s1 + $0x364] ss:$16 sps:$4 sm:$0xff]   ;;  %v1841_v50 = vld [vmem:[%s2465_s1 + $0x36c] ss:$16 sps:$4 sm:$0xff]  }
  0x33   :  { %1067 = vmatpush1.bf16.msra.mxu0 %v1747_v51  ;;  %1226 = vmatpush1.bf16.msra.mxu1 %v1748_v52  ;;  %v1836_v51 = vld [vmem:[%s2465_s1 + $0x360] ss:$16 sps:$4 sm:$0xff]   ;;  %v1839_v52 = vld [vmem:[%s2465_s1 + $0x368] ss:$16 sps:$4 sm:$0xff]  }
  0x34   :  { %1068 = vmatprep.subr.bf16.mxu0 %v1749_v53  ;;  %1227 = vmatprep.subr.bf16.mxu1 %v1751_v54  ;;  %v1844_v53 = vld [vmem:[%s2465_s1 + $0x384] ss:$16 sps:$4 sm:$0xff]   ;;  %v1847_v54 = vld [vmem:[%s2465_s1 + $0x38c] ss:$16 sps:$4 sm:$0xff]  }
  0x37   :  { %1069 = vmatpush1.bf16.msra.mxu0 %v1753_v55  ;;  %1228 = vmatpush1.bf16.msra.mxu1 %v1754_v56  ;;  %v1842_v55 = vld [vmem:[%s2465_s1 + $0x380] ss:$16 sps:$4 sm:$0xff]   ;;  %v1845_v56 = vld [vmem:[%s2465_s1 + $0x388] ss:$16 sps:$4 sm:$0xff]  }
  0x38   :  { %1070 = vmatprep.subr.bf16.mxu0 %v1755_v57  ;;  %1229 = vmatprep.subr.bf16.mxu1 %v1757_v58  ;;  %v1850_v57 = vld [vmem:[%s2465_s1 + $0x3a4] ss:$16 sps:$4 sm:$0xff]   ;;  %v1853_v58 = vld [vmem:[%s2465_s1 + $0x3ac] ss:$16 sps:$4 sm:$0xff]  }
  0x3b   :  { %1071 = vmatpush1.bf16.msra.mxu0 %v1759_v59  ;;  %1230 = vmatpush1.bf16.msra.mxu1 %v1760_v60  ;;  %v1848_v59 = vld [vmem:[%s2465_s1 + $0x3a0] ss:$16 sps:$4 sm:$0xff]   ;;  %v1851_v60 = vld [vmem:[%s2465_s1 + $0x3a8] ss:$16 sps:$4 sm:$0xff]  }
  0x3c   :  { %1072 = vmatprep.subr.bf16.mxu0 %v1761_v61  ;;  %1231 = vmatprep.subr.bf16.mxu1 %v1763_v62  ;;  %v1858_v61 = vld [vmem:[%s2465_s1 + $0x3c4] ss:$16 sps:$4 sm:$0xff]   ;;  %v1861_v62 = vld [vmem:[%s2465_s1 + $0x3cc] ss:$16 sps:$4 sm:$0xff]  }
  0x3f   :  { %1073 = vmatpush1.bf16.msra.mxu0 %v1765_v63  ;;  %1232 = vmatpush1.bf16.msra.mxu1 %v1766_v0  ;;  %v1856_v63 = vld [vmem:[%s2465_s1 + $0x3c0] ss:$16 sps:$4 sm:$0xff]   ;;  %v1859_v0 = vld [vmem:[%s2465_s1 + $0x3c8] ss:$16 sps:$4 sm:$0xff]  }
  0x40   :  { %1095 = vmatprep.subr.bf16.mxu0 %v1772_v1  ;;  %1254 = vmatprep.subr.bf16.mxu1 %v1775_v2  ;;  %v1865_v1 = vld [vmem:[%s2465_s1 + $0x3e4] ss:$16 sps:$4 sm:$0xff]   ;;  %v1868_v2 = vld [vmem:[%s2465_s1 + $0x3ec] ss:$16 sps:$4 sm:$0xff]  }
  0x42   :  { %1075 = vmatmul.mubr.bf16.vlgmr.msra.gmra.mrb[0].mxu0 %v1767_v3  ;;  %1234 = vmatmul.mubr.bf16.vlgmr.msra.gmra.mrb[0].mxu1 %v1767_v3  ;;  %v1863_v3 = vld [vmem:[%s2465_s1 + $0x3e0] ss:$16 sps:$4 sm:$0xff]  }
  0x43   :  { %1096 = vmatpush1.bf16.msra.mxu0 %v1770_v4  ;;  %1255 = vmatpush1.bf16.msra.mxu1 %v1773_v5  ;;  %v1866_v4 = vld [vmem:[%s2465_s1 + $0x3e8] ss:$16 sps:$4 sm:$0xff]   ;;  %v1874_v5 = vld [vmem:[%s2465_s1 + $0x404] ss:$16 sps:$4 sm:$0xff]  }
  0x44   :  { %1097 = vmatprep.subr.bf16.mxu0 %v1778_v6  ;;  %1256 = vmatprep.subr.bf16.mxu1 %v1781_v7  ;;  %v1877_v6 = vld [vmem:[%s2465_s1 + $0x40c] ss:$16 sps:$4 sm:$0xff]  }
  0x45   :  { %1084 = vmatprep.mubr.bf16.mxu0 %v1854_v24  ;;  %1243 = vmatprep.mubr.bf16.mxu1 %v1854_v24  ;;  %v1869_v7 = vld [vmem:[%s2466_s0 + $0x8] ss:$20 sps:$4 sm:$0xff]   ;;  %v1898_v24 = vld [vmem:[%s2465_s1 + $0x484] ss:$16 sps:$4 sm:$0xff]  }
  0x47   :  { %1098 = vmatpush1.bf16.msra.mxu0 %v1776_v8  ;;  %1257 = vmatpush1.bf16.msra.mxu1 %v1779_v9  ;;  %v1872_v8 = vld [vmem:[%s2465_s1 + $0x400] ss:$16 sps:$4 sm:$0xff]   ;;  %v1875_v9 = vld [vmem:[%s2465_s1 + $0x408] ss:$16 sps:$4 sm:$0xff]  }
  0x48   :  { %1099 = vmatprep.subr.bf16.mxu0 %v1784_v10  ;;  %1258 = vmatprep.subr.bf16.mxu1 %v1787_v11  ;;  %v1880_v10 = vld [vmem:[%s2465_s1 + $0x424] ss:$16 sps:$4 sm:$0xff]   ;;  %v1883_v11 = vld [vmem:[%s2465_s1 + $0x42c] ss:$16 sps:$4 sm:$0xff]  }
  0x4a   :  { %1085 = vmatmul.mubr.bf16.gmra.mrb[4].mxu0 %v1862_v29  ;;  %1244 = vmatmul.mubr.bf16.gmra.mrb[4].mxu1 %v1862_v29  ;;  %v1907_v29 = vld [vmem:[%s2465_s1 + $0x4a4] ss:$16 sps:$4 sm:$0xff]  }
  0x4b   :  { %1100 = vmatpush1.bf16.msra.mxu0 %v1782_v12  ;;  %1259 = vmatpush1.bf16.msra.mxu1 %v1785_v13  ;;  %v1902_v12 = vld [vmem:[%s2466_s0 + $0x34] ss:$20 sps:$4 sm:$0xff]   ;;  %v1878_v13 = vld [vmem:[%s2465_s1 + $0x420] ss:$16 sps:$4 sm:$0xff]  }
  0x4c   :  { %1101 = vmatprep.subr.bf16.mxu0 %v1790_v14  ;;  %1260 = vmatprep.subr.bf16.mxu1 %v1793_v15  ;;  %v1881_v14 = vld [vmem:[%s2465_s1 + $0x428] ss:$16 sps:$4 sm:$0xff]   ;;  %v1886_v15 = vld [vmem:[%s2465_s1 + $0x444] ss:$16 sps:$4 sm:$0xff]  }
  0x4d   :  { %1127 = vmatprep.mubr.bf16.mxu0 %v1871_v34  ;;  %1286 = vmatprep.mubr.bf16.mxu1 %v1871_v34  ;;  %v1916_v34 = vld [vmem:[%s2465_s1 + $0x4cc] ss:$16 sps:$4 sm:$0xff]  }
  0x4f   :  { %1102 = vmatpush1.bf16.msra.mxu0 %v1788_v16  ;;  %1261 = vmatpush1.bf16.msra.mxu1 %v1791_v17  ;;  %v1889_v16 = vld [vmem:[%s2465_s1 + $0x44c] ss:$16 sps:$4 sm:$0xff]   ;;  %v1904_v17 = vld [vmem:[%s2466_s0 + $0x30] ss:$20 sps:$4 sm:$0xff]  }
  0x50   :  { %1103 = vmatprep.subr.bf16.mxu0 %v1796_v18  ;;  %1262 = vmatprep.subr.bf16.mxu1 %v1799_v19  ;;  %v1884_v18 = vld [vmem:[%s2465_s1 + $0x440] ss:$16 sps:$4 sm:$0xff]   ;;  %v1887_v19 = vld [vmem:[%s2465_s1 + $0x448] ss:$16 sps:$4 sm:$0xff]  }
  0x53   :  { %1104 = vmatpush1.bf16.msra.mxu0 %v1794_v20  ;;  %1263 = vmatpush1.bf16.msra.mxu1 %v1797_v21  ;;  %v1892_v20 = vld [vmem:[%s2465_s1 + $0x464] ss:$16 sps:$4 sm:$0xff]   ;;  %v1895_v21 = vld [vmem:[%s2465_s1 + $0x46c] ss:$16 sps:$4 sm:$0xff]  }
  0x54   :  { %1105 = vmatprep.subr.bf16.mxu0 %v1802_v22  ;;  %1264 = vmatprep.subr.bf16.mxu1 %v1805_v23  ;;  %v1890_v22 = vld [vmem:[%s2465_s1 + $0x460] ss:$16 sps:$4 sm:$0xff]   ;;  %v1893_v23 = vld [vmem:[%s2465_s1 + $0x468] ss:$16 sps:$4 sm:$0xff]  }
  0x57   :  { %1106 = vmatpush1.bf16.msra.mxu0 %v1800_v25  ;;  %1265 = vmatpush1.bf16.msra.mxu1 %v1803_v26  ;;  %v1901_v25 = vld [vmem:[%s2465_s1 + $0x48c] ss:$16 sps:$4 sm:$0xff]   ;;  %v1919_v26 = vmov 0  }
  0x58   :  { %1107 = vmatprep.subr.bf16.mxu0 %v1808_v27  ;;  %1266 = vmatprep.subr.bf16.mxu1 %v1811_v28  ;;  %v1896_v27 = vld [vmem:[%s2465_s1 + $0x480] ss:$16 sps:$4 sm:$0xff]   ;;  %v1899_v28 = vld [vmem:[%s2465_s1 + $0x488] ss:$16 sps:$4 sm:$0xff]  }
  0x5b   :  { %1108 = vmatpush1.bf16.msra.mxu0 %v1806_v30  ;;  %1267 = vmatpush1.bf16.msra.mxu1 %v1809_v31  ;;  %v1910_v30 = vld [vmem:[%s2465_s1 + $0x4ac] ss:$16 sps:$4 sm:$0xff]   ;;  %v1905_v31 = vld [vmem:[%s2465_s1 + $0x4a0] ss:$16 sps:$4 sm:$0xff]  }
  0x5c   :  { %1109 = vmatprep.subr.bf16.mxu0 %v1814_v32  ;;  %1268 = vmatprep.subr.bf16.mxu1 %v1817_v33  ;;  %v1908_v32 = vld [vmem:[%s2465_s1 + $0x4a8] ss:$16 sps:$4 sm:$0xff]   ;;  %v1913_v33 = vld [vmem:[%s2465_s1 + $0x4c4] ss:$16 sps:$4 sm:$0xff]  }
  0x5f   :  { %1110 = vmatpush1.bf16.msra.mxu0 %v1812_v35  ;;  %1269 = vmatpush1.bf16.msra.mxu1 %v1815_v36  ;;  %v1911_v35 = vld [vmem:[%s2465_s1 + $0x4c0] ss:$16 sps:$4 sm:$0xff]   ;;  %v1914_v36 = vld [vmem:[%s2465_s1 + $0x4c8] ss:$16 sps:$4 sm:$0xff]  }
  0x60   :  { %1111 = vmatprep.subr.bf16.mxu0 %v1820_v37  ;;  %1270 = vmatprep.subr.bf16.mxu1 %v1823_v38  ;;  %v1917_v37 = vld [vmem:[%s2466_s0 + $0x10] ss:$20 sps:$4 sm:$0xff]   ;;  %v1918_v38 = vld [vmem:[%s2466_s0 + $0x38] ss:$20 sps:$4 sm:$0xff]  }
  0x63   :  { %1112 = vmatpush1.bf16.msra.mxu0 %v1818_v39  ;;  %1271 = vmatpush1.bf16.msra.mxu1 %v1821_v40  ;;  %v185_v39 = vlaneseq }
  0x64   :  { %1113 = vmatprep.subr.bf16.mxu0 %v1826_v41  ;;  %1272 = vmatprep.subr.bf16.mxu1 %v1829_v42 }
  0x65   :  { %v186_v40 = vshrl.u32 %v185_v39, 7 }
  0x67   :  { %1114 = vmatpush1.bf16.msra.mxu0 %v1824_v43  ;;  %1273 = vmatpush1.bf16.msra.mxu1 %v1827_v44  ;;  %v187_v41 = vsub.s32 0, %v186_v40  ;;  %v195_v42 = vsub.s32 2, %v186_v40  ;;  %v183_v43 = vld [vmem:[%s2467_s2] sm:$0xf]  ;;  %v191_v44 = vsub.s32 1, %v186_v40 }
  0x68   :  { %1115 = vmatprep.subr.bf16.mxu0 %v1832_v45  ;;  %1274 = vmatprep.subr.bf16.mxu1 %v1835_v46  ;;  %v199_v45 = vsub.s32 3, %v186_v40 }
  0x69   :  { %v188_v46 = vrot.slane %v183_v43, %v187_v41 }
  0x6b   :  { %1116 = vmatpush1.bf16.msra.mxu0 %v1830_v47  ;;  %1275 = vmatpush1.bf16.msra.mxu1 %v1833_v48  ;;  %v196_v47 = vrot.slane %v183_v43, %v195_v42  ;;  %v192_v48 = vrot.slane %v183_v43, %v191_v44 }
  0x6c   :  { %1117 = vmatprep.subr.bf16.mxu0 %v1838_v49  ;;  %1276 = vmatprep.subr.bf16.mxu1 %v1841_v50  ;;  %v200_v49 = vrot.slane %v183_v43, %v199_v45 }
  0x6f   :  { %1118 = vmatpush1.bf16.msra.mxu0 %v1836_v51  ;;  %1277 = vmatpush1.bf16.msra.mxu1 %v1839_v52 }
  0x70   :  { %1119 = vmatprep.subr.bf16.mxu0 %v1844_v53  ;;  %1278 = vmatprep.subr.bf16.mxu1 %v1847_v54 }
  0x73   :  { %1120 = vmatpush1.bf16.msra.mxu0 %v1842_v55  ;;  %1279 = vmatpush1.bf16.msra.mxu1 %v1845_v56 }
  0x74   :  { %1121 = vmatprep.subr.bf16.mxu0 %v1850_v57  ;;  %1280 = vmatprep.subr.bf16.mxu1 %v1853_v58 }
  0x77   :  { %1122 = vmatpush1.bf16.msra.mxu0 %v1848_v59  ;;  %1281 = vmatpush1.bf16.msra.mxu1 %v1851_v60 }
  0x78   :  { %1123 = vmatprep.subr.bf16.mxu0 %v1858_v61  ;;  %1282 = vmatprep.subr.bf16.mxu1 %v1861_v62 }
  0x7b   :  { %1124 = vmatpush1.bf16.msra.mxu0 %v1856_v63  ;;  %1283 = vmatpush1.bf16.msra.mxu1 %v1859_v0 }
  0x7c   :  { %1125 = vmatprep.subr.bf16.mxu0 %v1865_v1  ;;  %1284 = vmatprep.subr.bf16.mxu1 %v1868_v2 }
  0x7f   :  { %1126 = vmatpush1.bf16.msra.mxu0 %v1863_v3  ;;  %1285 = vmatpush1.bf16.msra.mxu1 %v1866_v4 }
  0x80   :  { %1148 = vmatprep.subr.bf16.mxu0 %v1874_v5  ;;  %1307 = vmatprep.subr.bf16.mxu1 %v1877_v6 }
  0x82   :  { %1128 = vmatmul.mubr.bf16.vlgmr.msra.gmra.mrb[0].mxu0 %v1869_v7  ;;  %1287 = vmatmul.mubr.bf16.vlgmr.msra.gmra.mrb[0].mxu1 %v1869_v7 }
  0x83   :  { %1149 = vmatpush1.bf16.msra.mxu0 %v1872_v8  ;;  %1308 = vmatpush1.bf16.msra.mxu1 %v1875_v9 }
  0x84   :  { %1150 = vmatprep.subr.bf16.mxu0 %v1880_v10  ;;  %1309 = vmatprep.subr.bf16.mxu1 %v1883_v11 }
  0x85   :  { %1137 = vmatprep.mubr.bf16.mxu0 %v1902_v12  ;;  %1296 = vmatprep.mubr.bf16.mxu1 %v1902_v12 }
  0x87   :  { %1151 = vmatpush1.bf16.msra.mxu0 %v1878_v13  ;;  %1310 = vmatpush1.bf16.msra.mxu1 %v1881_v14 }
  0x88   :  { %1152 = vmatprep.subr.bf16.mxu0 %v1886_v15  ;;  %1311 = vmatprep.subr.bf16.mxu1 %v1889_v16 }
  0x8a   :  { %1138 = vmatmul.mubr.bf16.gmra.mrb[4].mxu0 %v1904_v17  ;;  %1297 = vmatmul.mubr.bf16.gmra.mrb[4].mxu1 %v1904_v17 }
  0x8b   :  { %1153 = vmatpush1.bf16.msra.mxu0 %v1884_v18  ;;  %1312 = vmatpush1.bf16.msra.mxu1 %v1887_v19 }
  0x8c   :  { %1154 = vmatprep.subr.bf16.mxu0 %v1892_v20  ;;  %1313 = vmatprep.subr.bf16.mxu1 %v1895_v21 }
  0x8d   :  { %1180 = vmatprep.mubr.bf16.mxu0 %v1919_v26  ;;  %1339 = vmatprep.mubr.bf16.mxu1 %v1919_v26 }
  0x8f   :  { %1155 = vmatpush1.bf16.msra.mxu0 %v1890_v22  ;;  %1314 = vmatpush1.bf16.msra.mxu1 %v1893_v23 }
  0x90   :  { %1156 = vmatprep.subr.bf16.mxu0 %v1898_v24  ;;  %1315 = vmatprep.subr.bf16.mxu1 %v1901_v25 }
  0x93   :  { %1157 = vmatpush1.bf16.msra.mxu0 %v1896_v27  ;;  %1316 = vmatpush1.bf16.msra.mxu1 %v1899_v28 }
  0x94   :  { %1158 = vmatprep.subr.bf16.mxu0 %v1907_v29  ;;  %1317 = vmatprep.subr.bf16.mxu1 %v1910_v30 }
  0x97   :  { %1159 = vmatpush1.bf16.msra.mxu0 %v1905_v31  ;;  %1318 = vmatpush1.bf16.msra.mxu1 %v1908_v32 }
  0x98   :  { %1160 = vmatprep.subr.bf16.mxu0 %v1913_v33  ;;  %1319 = vmatprep.subr.bf16.mxu1 %v1916_v34 }
  0x9b   :  { %1161 = vmatpush1.bf16.msra.mxu0 %v1911_v35  ;;  %1320 = vmatpush1.bf16.msra.mxu1 %v1914_v36 }
  0x9e   :  { %1602 = vmatmul.mubr.msk.bf16.vlgmr.msra.gmra.mrb[0].mxu0 %vm1035_vm0, %v1917_v37  ;;  %1604 = vmatmul.mubr.msk.bf16.vlgmr.msra.gmra.mrb[0].mxu1 %vm1035_vm0, %v1917_v37 }
  0x9f   :  { %1190 = vmatprep.mubr.bf16.mxu0 %v1919_v26  ;;  %1349 = vmatprep.mubr.bf16.mxu1 %v1919_v26 }
  0xa6   :  { %1603 = vmatmul.mubr.msk.bf16.gmra.mrb[4].mxu0 %vm1035_vm0, %v1918_v38  ;;  %1605 = vmatmul.mubr.msk.bf16.gmra.mrb[4].mxu1 %vm1035_vm0, %v1918_v38 }
 0x171   :  { %v1182_v50 = vpop.f32.mrb[0].mxu0  ;;  %v1341_v51 = vpop.f32.mrb[0].mxu1 }
 0x172   :  { %v1622_v52 = vadd.f32 %v1182_v50, %v188_v46  ;;  %v1630_v53 = vadd.f32 %v1341_v51, %v196_v47  ;;  %v1184_v54 = vpop.f32.mrb[1].mxu0  ;;  %v1343_v55 = vpop.f32.mrb[1].mxu1 }
 0x173   :  { %v1623_v56 = vadd.f32 %v1184_v54, %v192_v48  ;;  %v1631_v57 = vadd.f32 %v1343_v55, %v200_v49  ;;  %v1186_v58 = vpop.f32.mrb[2].mxu0  ;;  %v1345_v59 = vpop.f32.mrb[2].mxu1 }
 0x174   :  { %v1360_v60 = vmax.f32 %v1622_v52, 0.0  ;;  %v1362_v61 = vmax.f32 %v1630_v53, 0.0  ;;  %v1624_v62 = vadd.f32 %v1186_v58, %v188_v46  ;;  %v1632_v63 = vadd.f32 %v1345_v59, %v196_v47  ;;  %v1188_v0 = vpop.f32.mrb[3].mxu0  ;;  %v1347_v1 = vpop.f32.mrb[3].mxu1 }
 0x175   :  { %v1361_v2 = vmax.f32 %v1623_v56, 0.0  ;;  %v1363_v3 = vmax.f32 %v1631_v57, 0.0  ;;  %v1625_v4 = vadd.f32 %v1188_v0, %v192_v48  ;;  %v1633_v5 = vadd.f32 %v1347_v1, %v200_v49 }
 0x176   :  { %v1364_v6 = vmax.f32 %v1624_v62, 0.0  ;;  %v1366_v7 = vmax.f32 %v1632_v63, 0.0 }
 0x177   :  { %v1614_v8 = vpack.c.bf16 %v1361_v2, %v1360_v60  ;;  %v1615_v9 = vpack.c.bf16 %v1363_v3, %v1362_v61  ;;  %v1365_v10 = vmax.f32 %v1625_v4, 0.0  ;;  %v1367_v11 = vmax.f32 %v1633_v5, 0.0 }
 0x179   :  { %1424 = vst [vmem:[%s2468_s3] sm:$0xff] %v1614_v8  ;;  %1425 = vst [vmem:[%s2468_s3 + $0x8] sm:$0xff] %v1615_v9  ;;  %v1616_v12 = vpack.c.bf16 %v1365_v10, %v1364_v6  ;;  %v1617_v13 = vpack.c.bf16 %v1367_v11, %v1366_v7  ;;  %v1192_v14 = vpop.f32.mrb[4].mxu0  ;;  %v1351_v15 = vpop.f32.mrb[4].mxu1 }
 0x17a   :  { %v1626_v16 = vadd.f32 %v1192_v14, %v188_v46  ;;  %v1634_v17 = vadd.f32 %v1351_v15, %v196_v47  ;;  %v1194_v18 = vpop.f32.mrb[5].mxu0  ;;  %v1353_v19 = vpop.f32.mrb[5].mxu1 }
 0x17b   :  { %1426 = vst [vmem:[%s2468_s3 + $0x10] sm:$0xff] %v1616_v12  ;;  %1427 = vst [vmem:[%s2468_s3 + $0x18] sm:$0xff] %v1617_v13  ;;  %v1627_v20 = vadd.f32 %v1194_v18, %v192_v48  ;;  %v1635_v21 = vadd.f32 %v1353_v19, %v200_v49  ;;  %v1196_v22 = vpop.f32.mrb[6].mxu0  ;;  %v1355_v23 = vpop.f32.mrb[6].mxu1 }
 0x17c   :  { %v1368_v24 = vmax.f32 %v1626_v16, 0.0  ;;  %v1370_v25 = vmax.f32 %v1634_v17, 0.0  ;;  %v1628_v26 = vadd.f32 %v1196_v22, %v188_v46  ;;  %v1636_v27 = vadd.f32 %v1355_v23, %v196_v47  ;;  %v1198_v28 = vpop.f32.mrb[7].mxu0  ;;  %v1357_v29 = vpop.f32.mrb[7].mxu1 }
 0x17d   :  { %v1369_v30 = vmax.f32 %v1627_v20, 0.0  ;;  %v1371_v31 = vmax.f32 %v1635_v21, 0.0  ;;  %v1629_v32 = vadd.f32 %v1198_v28, %v192_v48  ;;  %v1637_v33 = vadd.f32 %v1357_v29, %v200_v49 }
 0x17e   :  { %v1372_v34 = vmax.f32 %v1628_v26, 0.0  ;;  %v1374_v35 = vmax.f32 %v1636_v27, 0.0 }
 0x17f   :  { %v1618_v36 = vpack.c.bf16 %v1369_v30, %v1368_v24  ;;  %v1619_v37 = vpack.c.bf16 %v1371_v31, %v1370_v25  ;;  %v1373_v38 = vmax.f32 %v1629_v32, 0.0  ;;  %v1375_v39 = vmax.f32 %v1637_v33, 0.0 }
 0x181   :  { %1428 = vst [vmem:[%s2468_s3 + $0x20] sm:$0xff] %v1618_v36  ;;  %1429 = vst [vmem:[%s2468_s3 + $0x28] sm:$0xff] %v1619_v37  ;;  %v1620_v40 = vpack.c.bf16 %v1373_v38, %v1372_v34  ;;  %v1621_v41 = vpack.c.bf16 %v1375_v39, %v1374_v35 }
 0x183   :  { %1430 = vst [vmem:[%s2468_s3 + $0x30] sm:$0xff] %v1620_v40  ;;  %1431 = vst [vmem:[%s2468_s3 + $0x38] sm:$0xff] %v1621_v41 }

// kernel: conv_decoder_forward.9
= control target key start
LH: loop header
LB: loop body
LE: loop exit
PB: predicated region body
PF: predicated region fallthrough
CT: control target
= control target key end

     0   :  { %s2029_s12 = smov 0   ;;  %s2560_s0 = inlined_call_operand.vmem [shape: bf16[64,720], index: 0, kind: input, shape index: {}]   ;;  %s2561_s1 = inlined_call_operand.vmem [shape: bf16[720,384], index: 1, kind: input, shape index: {}]   ;;  %s2562_s2 = inlined_call_operand.vmem [shape: f32[1,384], index: 2, kind: input, shape index: {}]   ;;  %s2563_s3 = inlined_call_operand.vmem [shape: f32[64,384], index: 3, kind: output, shape index: {}]  }
   0x1 LB: > { %s1550_s13 = sadd.s32 4294967295, %s2006_s12   ;;  %p1554_p0 = scmp.ge.s32.totalorder %s2006_s12, 1  ;;  %s2006_s12 = sphi %s2029_s12, %s13_s12  }
   0x2   : > { %p139_p1 = scmp.lt.s32.totalorder %s2006_s12, 3 }
   0x4   : > { %p140_p2 = pnand %p1554_p0, %p139_p1 }
   0x5   : > { %v1802_v0 = vld [vmem:[%s2561_s1 + $0x4] ss:$12 sps:$4 sm:$0xff] (!%p140_p2)   ;;  %v1804_v1 = vld [vmem:[%s2561_s1] ss:$12 sps:$4 sm:$0xff] (!%p140_p2)   ;;  %v1805_v2 = vld [vmem:[%s2561_s1 + $0x1c] ss:$12 sps:$4 sm:$0xff] (!%p140_p2)  }
   0x6   : > { %143 = sbr.rel (%p140_p2) target bundleno = 398 (0x18e), region = 32  ;;  %1174 = vmatprep.subr.bf16.mxu0 (!%p140_p2), %v1802_v0  ;;  %v1807_v3 = vld [vmem:[%s2561_s1 + $0x18] ss:$12 sps:$4 sm:$0xff] (!%p140_p2)   ;;  %v1808_v4 = vld [vmem:[%s2561_s1 + $0x34] ss:$12 sps:$4 sm:$0xff] (!%p140_p2)   ;;  %s1555_s21 = sshll.u32 (!%p140_p2), %s1550_s13, 2 }
   0x7   : > { %1175 = vmatpush1.bf16.msra.mxu0 (!%p140_p2), %v1804_v1  ;;  %v1810_v5 = vld [vmem:[%s2561_s1 + $0x30] ss:$12 sps:$4 sm:$0xff] (!%p140_p2)   ;;  %v1811_v6 = vld [vmem:[%s2561_s1 + $0x4c] ss:$12 sps:$4 sm:$0xff] (!%p140_p2)   ;;  %v1813_v7 = vld [vmem:[%s2561_s1 + $0x48] ss:$12 sps:$4 sm:$0xff] (!%p140_p2)  }
   0x8   : > { %1176 = vmatprep.subr.bf16.mxu0 (!%p140_p2), %v1805_v2  ;;  %v1825_v8 = vld [vmem:[%s2561_s1 + $0x304] ss:$12 sps:$4 sm:$0xff] (!%p140_p2)   ;;  %v1828_v9 = vld [vmem:[%s2561_s1 + $0x300] ss:$12 sps:$4 sm:$0xff] (!%p140_p2)   ;;  %v1831_v11 = vld [vmem:[%s2561_s1 + $0x31c] ss:$12 sps:$4 sm:$0xff] (!%p140_p2)  }
   0x9   : > { %v1814_v10 = vld [vmem:[%s2561_s1 + $0x64] ss:$12 sps:$4 sm:$0xff] (!%p140_p2)   ;;  %1280 = vmatprep.subr.bf16.mxu1 (!%p140_p2), %v1825_v8  ;;  %v1816_v13 = vld [vmem:[%s2561_s1 + $0x60] ss:$12 sps:$4 sm:$0xff] (!%p140_p2)   ;;  %v1817_v14 = vld [vmem:[%s2561_s1 + $0x7c] ss:$12 sps:$4 sm:$0xff] (!%p140_p2)  }
   0xa   : > { %1281 = vmatpush1.bf16.msra.mxu1 (!%p140_p2), %v1828_v9  ;;  %v1834_v12 = vld [vmem:[%s2561_s1 + $0x318] ss:$12 sps:$4 sm:$0xff] (!%p140_p2)   ;;  %v1837_v15 = vld [vmem:[%s2561_s1 + $0x334] ss:$12 sps:$4 sm:$0xff] (!%p140_p2)   ;;  %v1840_v16 = vld [vmem:[%s2561_s1 + $0x330] ss:$12 sps:$4 sm:$0xff] (!%p140_p2)  }
   0xb   : > { %1177 = vmatpush1.bf16.msra.mxu0 (!%p140_p2), %v1807_v3  ;;  %1282 = vmatprep.subr.bf16.mxu1 (!%p140_p2), %v1831_v11  ;;  %v1819_v17 = vld [vmem:[%s2561_s1 + $0x78] ss:$12 sps:$4 sm:$0xff] (!%p140_p2)   ;;  %p166_p3 = scmp.lt.s32.totalorder (!%p140_p2), %s1555_s21, 7  ;;  %v1820_v19 = vld [vmem:[%s2561_s1 + $0x94] ss:$12 sps:$4 sm:$0xff] (!%p140_p2)   ;;  %vm1167_vm0 = vcmask (!%p140_p2), 654336  }
   0xc   : > { %1178 = vmatprep.subr.bf16.mxu0 (!%p140_p2), %v1808_v4  ;;  %v1843_v18 = vld [vmem:[%s2561_s1 + $0x34c] ss:$12 sps:$4 sm:$0xff] (!%p140_p2)   ;;  %v1822_v20 = vld [vmem:[%s2561_s1 + $0x90] ss:$12 sps:$4 sm:$0xff] (!%p140_p2)   ;;  %v1846_v21 = vld [vmem:[%s2561_s1 + $0x348] ss:$12 sps:$4 sm:$0xff] (!%p140_p2)  }
   0xd   : > { %v1849_v22 = vld [vmem:[%s2561_s1 + $0x364] ss:$12 sps:$4 sm:$0xff]   ;;  %s2565_s21 = smov (!%p166_p3, %s1555_s21), 7  ;;  %v1823_v23 = vld [vmem:[%s2561_s1 + $0xac] ss:$12 sps:$4 sm:$0xff]  }
   0xe   : > { %1283 = vmatpush1.bf16.msra.mxu1 %v1834_v12  ;;  %v1852_v24 = vld [vmem:[%s2561_s1 + $0x360] ss:$12 sps:$4 sm:$0xff]   ;;  %v1827_v25 = vld [vmem:[%s2561_s1 + $0xa8] ss:$12 sps:$4 sm:$0xff]   ;;  %s1792_s18 = smul.u32 24, %s2565_s21 }
   0xf   : > { %1179 = vmatpush1.bf16.msra.mxu0 %v1810_v5  ;;  %1284 = vmatprep.subr.bf16.mxu1 %v1837_v15  ;;  %v1855_v26 = vld [vmem:[%s2561_s1 + $0x37c] ss:$12 sps:$4 sm:$0xff]   ;;  %v1829_v27 = vld [vmem:[%s2561_s1 + $0xc4] ss:$12 sps:$4 sm:$0xff]   ;;  %v1833_v28 = vld [vmem:[%s2561_s1 + $0xc0] ss:$12 sps:$4 sm:$0xff]  }
  0x10   : > { %1180 = vmatprep.subr.bf16.mxu0 %v1811_v6  ;;  %v1858_v29 = vld [vmem:[%s2561_s1 + $0x378] ss:$12 sps:$4 sm:$0xff]   ;;  %v1861_v30 = vld [vmem:[%s2561_s1 + $0x394] ss:$12 sps:$4 sm:$0xff]   ;;  %s2140_s13 = scalar_lea.vmem %s2560_s0, %s1792_s18  ;;  %v1835_v31 = vld [vmem:[%s2561_s1 + $0xdc] ss:$12 sps:$4 sm:$0xff]   ;;  %s2539_s5 = scalar_lea.vmem %s2563_s3, %s1792_s18 }
  0x11   : > { %v1864_v32 = vld [vmem:[%s2561_s1 + $0x390] ss:$12 sps:$4 sm:$0xff]   ;;  %v1839_v34 = vld [vmem:[%s2561_s1 + $0xd8] ss:$12 sps:$4 sm:$0xff]   ;;  %v1841_v36 = vld [vmem:[%s2561_s1 + $0xf4] ss:$12 sps:$4 sm:$0xff]  }
  0x12   : > { %1285 = vmatpush1.bf16.msra.mxu1 %v1840_v16  ;;  %v2149_v33 = vld [vmem:[%s2140_s13 + $0x4] ss:$24 sps:$4 sm:$0xff]   ;;  %v1867_v35 = vld [vmem:[%s2561_s1 + $0x3ac] ss:$12 sps:$4 sm:$0xff]   ;;  %v1870_v37 = vld [vmem:[%s2561_s1 + $0x3a8] ss:$12 sps:$4 sm:$0xff]  }
  0x13   : > { %1181 = vmatpush1.bf16.msra.mxu0 %v1813_v7  ;;  %1286 = vmatprep.subr.bf16.mxu1 %v1843_v18  ;;  %v1845_v38 = vld [vmem:[%s2561_s1 + $0xf0] ss:$12 sps:$4 sm:$0xff]   ;;  %v1847_v40 = vld [vmem:[%s2561_s1 + $0x10c] ss:$12 sps:$4 sm:$0xff]   ;;  %v1851_v42 = vld [vmem:[%s2561_s1 + $0x108] ss:$12 sps:$4 sm:$0xff]  }
  0x14   : > { %1182 = vmatprep.subr.bf16.mxu0 %v1814_v10  ;;  %1206 = vmatprep.mubr.bf16.mxu0 %v2149_v33  ;;  %v1873_v39 = vld [vmem:[%s2561_s1 + $0x3c4] ss:$12 sps:$4 sm:$0xff]   ;;  %v1876_v41 = vld [vmem:[%s2561_s1 + $0x3c0] ss:$12 sps:$4 sm:$0xff]   ;;  %v1883_v43 = vld [vmem:[%s2561_s1 + $0x3dc] ss:$12 sps:$4 sm:$0xff]  }
  0x15   : > { %v1853_v44 = vld [vmem:[%s2561_s1 + $0x124] ss:$12 sps:$4 sm:$0xff]   ;;  %v1857_v45 = vld [vmem:[%s2561_s1 + $0x120] ss:$12 sps:$4 sm:$0xff]   ;;  %v1859_v49 = vld [vmem:[%s2561_s1 + $0x13c] ss:$12 sps:$4 sm:$0xff]  }
  0x16   : > { %1287 = vmatpush1.bf16.msra.mxu1 %v1846_v21  ;;  %v1885_v46 = vld [vmem:[%s2561_s1 + $0x3d8] ss:$12 sps:$4 sm:$0xff]   ;;  %v1889_v47 = vld [vmem:[%s2561_s1 + $0x3f4] ss:$12 sps:$4 sm:$0xff]   ;;  %v1891_v51 = vld [vmem:[%s2561_s1 + $0x3f0] ss:$12 sps:$4 sm:$0xff]  }
  0x17   : > { %1183 = vmatpush1.bf16.msra.mxu0 %v1816_v13  ;;  %1288 = vmatprep.subr.bf16.mxu1 %v1849_v22  ;;  %v2195_v48 = vld [vmem:[%s2140_s13 + $0x14] ss:$24 sps:$4 sm:$0xff]   ;;  %v1863_v50 = vld [vmem:[%s2561_s1 + $0x138] ss:$12 sps:$4 sm:$0xff]   ;;  %v1869_v54 = vld [vmem:[%s2561_s1 + $0x150] ss:$12 sps:$4 sm:$0xff]  }
  0x18   : > { %1184 = vmatprep.subr.bf16.mxu0 %v1817_v14  ;;  %1706 = vmatprep.mubr.msk.bf16.mxu1 %vm1167_vm0, %v2195_v48  ;;  %v1895_v52 = vld [vmem:[%s2561_s1 + $0x40c] ss:$12 sps:$4 sm:$0xff]   ;;  %v1865_v53 = vld [vmem:[%s2561_s1 + $0x154] ss:$12 sps:$4 sm:$0xff]   ;;  %v1901_v56 = vld [vmem:[%s2561_s1 + $0x424] ss:$12 sps:$4 sm:$0xff]  }
  0x19   : > { %v1897_v55 = vld [vmem:[%s2561_s1 + $0x408] ss:$12 sps:$4 sm:$0xff]   ;;  %v1871_v57 = vld [vmem:[%s2561_s1 + $0x16c] ss:$12 sps:$4 sm:$0xff]   ;;  %v1882_v62 = vld [vmem:[%s2561_s1 + $0x184] ss:$12 sps:$4 sm:$0xff]  }
  0x1a   : > { %1289 = vmatpush1.bf16.msra.mxu1 %v1852_v24  ;;  %v1875_v58 = vld [vmem:[%s2561_s1 + $0x168] ss:$12 sps:$4 sm:$0xff]   ;;  %v1903_v59 = vld [vmem:[%s2561_s1 + $0x420] ss:$12 sps:$4 sm:$0xff]   ;;  %v1886_v4 = vld [vmem:[%s2561_s1 + $0x198] ss:$12 sps:$4 sm:$0xff]  }
  0x1b   : > { %1185 = vmatpush1.bf16.msra.mxu0 %v1819_v17  ;;  %1290 = vmatprep.subr.bf16.mxu1 %v1855_v26  ;;  %v1910_v60 = vld [vmem:[%s2561_s1 + $0x248] ss:$12 sps:$4 sm:$0xff]   ;;  %v2236_v61 = vld [vmem:[%s2140_s13] ss:$24 sps:$4 sm:$0xff]   ;;  %v2271_v8 = vld [vmem:[%s2140_s13 + $0x44] ss:$24 sps:$4 sm:$0xff]  }
  0x1c   : > { %1186 = vmatprep.subr.bf16.mxu0 %v1820_v19  ;;  %v1880_v63 = vld [vmem:[%s2561_s1 + $0x180] ss:$12 sps:$4 sm:$0xff]   ;;  %v2245_v0 = vld [vmem:[%s2140_s13 + $0x10] ss:$24 sps:$4 sm:$0xff]   ;;  %v1920_v7 = vld [vmem:[%s2561_s1 + $0x278] ss:$12 sps:$4 sm:$0xff]  }
  0x1d   : > { %v1911_v1 = vld [vmem:[%s2561_s1 + $0x188] ss:$12 sps:$4 sm:$0xff]   ;;  %v1915_v2 = vld [vmem:[%s2561_s1 + $0x260] ss:$12 sps:$4 sm:$0xff]   ;;  %v1892_v9 = vld [vmem:[%s2561_s1 + $0x1b0] ss:$12 sps:$4 sm:$0xff]  }
  0x1e   : > { %1291 = vmatpush1.bf16.msra.mxu1 %v1858_v29  ;;  %v1888_v3 = vld [vmem:[%s2561_s1 + $0x19c] ss:$12 sps:$4 sm:$0xff]   ;;  %v1916_v5 = vld [vmem:[%s2561_s1 + $0x1a0] ss:$12 sps:$4 sm:$0xff]   ;;  %v1921_v10 = vld [vmem:[%s2561_s1 + $0x1b8] ss:$12 sps:$4 sm:$0xff]  }
  0x1f   : > { %1187 = vmatpush1.bf16.msra.mxu0 %v1822_v20  ;;  %1292 = vmatprep.subr.bf16.mxu1 %v1861_v30  ;;  %v1894_v6 = vld [vmem:[%s2561_s1 + $0x1b4] ss:$12 sps:$4 sm:$0xff]   ;;  %v1925_v12 = vld [vmem:[%s2561_s1 + $0x290] ss:$12 sps:$4 sm:$0xff]   ;;  %v1900_v13 = vld [vmem:[%s2561_s1 + $0x1cc] ss:$12 sps:$4 sm:$0xff]  }
  0x20   : > { %1188 = vmatprep.subr.bf16.mxu0 %v1823_v23  ;;  %v2282_v11 = vld [vmem:[%s2140_s13 + $0x40] ss:$24 sps:$4 sm:$0xff]   ;;  %v1926_v14 = vld [vmem:[%s2561_s1 + $0x1d0] ss:$12 sps:$4 sm:$0xff]   ;;  %v1898_v15 = vld [vmem:[%s2561_s1 + $0x1c8] ss:$12 sps:$4 sm:$0xff]  }
  0x21   : > { %v1930_v16 = vld [vmem:[%s2561_s1 + $0x2a8] ss:$12 sps:$4 sm:$0xff]   ;;  %v1906_v17 = vld [vmem:[%s2561_s1 + $0x1e4] ss:$12 sps:$4 sm:$0xff]   ;;  %v1904_v20 = vld [vmem:[%s2561_s1 + $0x1e0] ss:$12 sps:$4 sm:$0xff]  }
  0x22   : > { %1293 = vmatpush1.bf16.msra.mxu1 %v1864_v32  ;;  %v1955_v18 = vld [vmem:[%s2140_s13 + $0xc] ss:$24 sps:$4 sm:$0xff]   ;;  %v1931_v19 = vld [vmem:[%s2561_s1 + $0x1e8] ss:$12 sps:$4 sm:$0xff]   ;;  %v1917_v29 = vld [vmem:[%s2561_s1 + $0x210] ss:$12 sps:$4 sm:$0xff]  }
  0x23   : > { %1189 = vmatpush1.bf16.msra.mxu0 %v1827_v25  ;;  %1294 = vmatprep.subr.bf16.mxu1 %v1867_v35  ;;  %v1935_v21 = vld [vmem:[%s2561_s1 + $0x2c0] ss:$12 sps:$4 sm:$0xff]   ;;  %v1914_v22 = vld [vmem:[%s2561_s1 + $0x1fc] ss:$12 sps:$4 sm:$0xff]   ;;  %v1912_v23 = vld [vmem:[%s2561_s1 + $0x1f8] ss:$12 sps:$4 sm:$0xff]  }
  0x24   : > { %1190 = vmatprep.subr.bf16.mxu0 %v1829_v27  ;;  %v2320_v24 = vld [vmem:[%s2140_s13 + $0x34] ss:$24 sps:$4 sm:$0xff]   ;;  %v2323_v25 = vld [vmem:[%s2140_s13 + $0x30] ss:$24 sps:$4 sm:$0xff]   ;;  %v1942_v27 = vld [vmem:[%s2561_s1 + $0x2d8] ss:$12 sps:$4 sm:$0xff]  }
  0x25   : > { %v1936_v26 = vld [vmem:[%s2561_s1 + $0x200] ss:$12 sps:$4 sm:$0xff]   ;;  %v1944_v30 = vld [vmem:[%s2561_s1 + $0x218] ss:$12 sps:$4 sm:$0xff]   ;;  %v1922_v35 = vld [vmem:[%s2561_s1 + $0x228] ss:$12 sps:$4 sm:$0xff]  }
  0x26   : > { %1295 = vmatpush1.bf16.msra.mxu1 %v1870_v37  ;;  %v1924_v32 = vld [vmem:[%s2561_s1 + $0x22c] ss:$12 sps:$4 sm:$0xff]  }
  0x27   : > { %1191 = vmatpush1.bf16.msra.mxu0 %v1833_v28  ;;  %1296 = vmatprep.subr.bf16.mxu1 %v1873_v39  ;;  %v1919_v28 = vld [vmem:[%s2561_s1 + $0x214] ss:$12 sps:$4 sm:$0xff]  }
  0x28   : > { %1192 = vmatprep.subr.bf16.mxu0 %v1835_v31  ;;  %v1948_v31 = vld [vmem:[%s2561_s1 + $0x2f0] ss:$12 sps:$4 sm:$0xff]   ;;  %v1927_v37 = vld [vmem:[%s2561_s1 + $0x240] ss:$12 sps:$4 sm:$0xff]   ;;  %v1956_v39 = vld [vmem:[%s2561_s1 + $0x308] ss:$12 sps:$4 sm:$0xff]  }
  0x2a   : > { %1297 = vmatpush1.bf16.msra.mxu1 %v1876_v41  ;;  %v2008_v41 = vmov 0  }
  0x2b   : > { %1193 = vmatpush1.bf16.msra.mxu0 %v1839_v34  ;;  %1298 = vmatprep.subr.bf16.mxu1 %v1883_v43  ;;  %v1949_v34 = vld [vmem:[%s2561_s1 + $0x230] ss:$12 sps:$4 sm:$0xff]   ;;  %v1960_v43 = vld [vmem:[%s2561_s1 + $0x320] ss:$12 sps:$4 sm:$0xff]  }
  0x2c   : > { %1194 = vmatprep.subr.bf16.mxu0 %v1841_v36  ;;  %v1929_v36 = vld [vmem:[%s2561_s1 + $0x244] ss:$12 sps:$4 sm:$0xff]  }
  0x2e   : > { %1299 = vmatpush1.bf16.msra.mxu1 %v1885_v46  ;;  %v1937_v46 = vld [vmem:[%s2561_s1 + $0x270] ss:$12 sps:$4 sm:$0xff]  }
  0x2f   : > { %1195 = vmatpush1.bf16.msra.mxu0 %v1845_v38  ;;  %1300 = vmatprep.subr.bf16.mxu1 %v1889_v47  ;;  %v2361_v38 = vld [vmem:[%s2140_s13 + $0x8] ss:$24 sps:$4 sm:$0xff]   ;;  %v1967_v47 = vld [vmem:[%s2561_s1 + $0x338] ss:$12 sps:$4 sm:$0xff]  }
  0x30   : > { %1196 = vmatprep.subr.bf16.mxu0 %v1847_v40  ;;  %v1934_v40 = vld [vmem:[%s2561_s1 + $0x25c] ss:$12 sps:$4 sm:$0xff]  }
  0x32   : > { %1301 = vmatpush1.bf16.msra.mxu1 %v1891_v51  ;;  %v1971_v51 = vld [vmem:[%s2561_s1 + $0x350] ss:$12 sps:$4 sm:$0xff]  }
  0x33   : > { %1197 = vmatpush1.bf16.msra.mxu0 %v1851_v42  ;;  %1302 = vmatprep.subr.bf16.mxu1 %v1895_v52  ;;  %v2371_v42 = vld [vmem:[%s2140_s13 + $0x3c] ss:$24 sps:$4 sm:$0xff]  }
  0x34   : > { %1198 = vmatprep.subr.bf16.mxu0 %v1853_v44  ;;  %v1932_v44 = vld [vmem:[%s2561_s1 + $0x258] ss:$12 sps:$4 sm:$0xff]   ;;  %v1945_v52 = vld [vmem:[%s2561_s1 + $0x288] ss:$12 sps:$4 sm:$0xff]  }
  0x36   : > { %1303 = vmatpush1.bf16.msra.mxu1 %v1897_v55  ;;  %v1959_v55 = vld [vmem:[%s2561_s1 + $0x2bc] ss:$12 sps:$4 sm:$0xff]  }
  0x37   : > { %1199 = vmatpush1.bf16.msra.mxu0 %v1857_v45  ;;  %1304 = vmatprep.subr.bf16.mxu1 %v1901_v56  ;;  %v1939_v45 = vld [vmem:[%s2561_s1 + $0x274] ss:$12 sps:$4 sm:$0xff]  }
  0x38   : > { %1200 = vmatprep.subr.bf16.mxu0 %v1859_v49  ;;  %v1980_v49 = vld [vmem:[%s2140_s13 + $0x38] ss:$24 sps:$4 sm:$0xff]   ;;  %v1977_v56 = vld [vmem:[%s2561_s1 + $0x380] ss:$12 sps:$4 sm:$0xff]  }
  0x3a   : > { %1305 = vmatpush1.bf16.msra.mxu1 %v1903_v59  ;;  %v1983_v59 = vld [vmem:[%s2561_s1 + $0x398] ss:$12 sps:$4 sm:$0xff]  }
  0x3b   : > { %1201 = vmatpush1.bf16.msra.mxu0 %v1863_v50  ;;  %1740 = vmatprep.subr.bf16.mxu1 %v1910_v60  ;;  %v1947_v50 = vld [vmem:[%s2561_s1 + $0x28c] ss:$12 sps:$4 sm:$0xff]   ;;  %v1964_v60 = vld [vmem:[%s2561_s1 + $0x2d0] ss:$12 sps:$4 sm:$0xff]  }
  0x3c   : > { %1202 = vmatprep.subr.bf16.mxu0 %v1865_v53  ;;  %v1952_v53 = vld [vmem:[%s2561_s1 + $0x2a4] ss:$12 sps:$4 sm:$0xff]  }
  0x3d   : > { %1313 = vmatmul.mubr.bf16.vlgmr.msra.gmra.mrb[0].mxu1 %v2245_v0 }
  0x3e   : > { %1741 = vmatpush3.bf16.msra.mxu1 %v1911_v1  ;;  %1707 = vmatprep.mubr.msk.bf16.mxu1 %vm1167_vm0, %v2271_v8  ;;  %v1968_v1 = vld [vmem:[%s2561_s1 + $0x2e8] ss:$12 sps:$4 sm:$0xff]  }
  0x3f   : > { %1203 = vmatpush1.bf16.msra.mxu0 %v1869_v54  ;;  %1742 = vmatprep.subr.bf16.mxu1 %v1915_v2  ;;  %v1974_v54 = vld [vmem:[%s2561_s1 + $0x368] ss:$12 sps:$4 sm:$0xff]  }
  0x40   : > { %1204 = vmatprep.subr.bf16.mxu0 %v1871_v57  ;;  %v1957_v57 = vld [vmem:[%s2561_s1 + $0x2b8] ss:$12 sps:$4 sm:$0xff]   ;;  %v1972_v2 = vld [vmem:[%s2561_s1 + $0xc8] ss:$12 sps:$4 sm:$0xff]  }
  0x42   : > { %1743 = vmatpush3.bf16.msra.mxu1 %v1916_v5  ;;  %v1975_v5 = vld [vmem:[%s2561_s1 + $0xe0] ss:$12 sps:$4 sm:$0xff]  }
  0x43   : > { %1205 = vmatpush1.bf16.msra.mxu0 %v1875_v58  ;;  %1744 = vmatprep.subr.bf16.mxu1 %v1920_v7  ;;  %v1966_v58 = vld [vmem:[%s2561_s1 + $0x2d4] ss:$12 sps:$4 sm:$0xff]  }
  0x44   : > { %1227 = vmatprep.subr.bf16.mxu0 %v1882_v62  ;;  %v1970_v62 = vld [vmem:[%s2561_s1 + $0x2ec] ss:$12 sps:$4 sm:$0xff]  }
  0x45   : > { %1323 = vmatmul.mubr.bf16.gmra.mrb[4].mxu1 %v2282_v11  ;;  %v1976_v7 = vld [vmem:[%s2561_s1 + $0x20] ss:$12 sps:$4 sm:$0xff]  }
  0x46   : > { %1207 = vmatmul.mubr.bf16.vlgmr.msra.gmra.mrb[0].mxu0 %v2236_v61  ;;  %1745 = vmatpush3.bf16.msra.mxu1 %v1921_v10  ;;  %v1995_v10 = vld [vmem:[%s2561_s1 + $0x3f8] ss:$12 sps:$4 sm:$0xff]  }
  0x47   : > { %1228 = vmatpush1.bf16.msra.mxu0 %v1880_v63  ;;  %1746 = vmatprep.subr.bf16.mxu1 %v1925_v12  ;;  %v1986_v63 = vld [vmem:[%s2561_s1 + $0x3b0] ss:$12 sps:$4 sm:$0xff]   ;;  %v1982_v12 = vld [vmem:[%s2561_s1 + $0x38] ss:$12 sps:$4 sm:$0xff]  }
  0x48   : > { %1229 = vmatprep.subr.bf16.mxu0 %v1888_v3  ;;  %1414 = vmatprep.mubr.bf16.mxu1 %v1955_v18  ;;  %v1989_v3 = vld [vmem:[%s2561_s1 + $0x3c8] ss:$12 sps:$4 sm:$0xff]  }
  0x49   : > { %1216 = vmatprep.mubr.bf16.mxu0 %v2320_v24 }
  0x4a   : > { %1747 = vmatpush3.bf16.msra.mxu1 %v1926_v14  ;;  %v1998_v14 = vld [vmem:[%s2561_s1 + $0x410] ss:$12 sps:$4 sm:$0xff]  }
  0x4b   : > { %1230 = vmatpush1.bf16.msra.mxu0 %v1886_v4  ;;  %1748 = vmatprep.subr.bf16.mxu1 %v1930_v16  ;;  %v1973_v4 = vld [vmem:[%s2561_s1 + $0x8] ss:$12 sps:$4 sm:$0xff]  }
  0x4c   : > { %1231 = vmatprep.subr.bf16.mxu0 %v1894_v6  ;;  %v1992_v6 = vld [vmem:[%s2561_s1 + $0x3e0] ss:$12 sps:$4 sm:$0xff]   ;;  %v1987_v16 = vld [vmem:[%s2561_s1 + $0x128] ss:$12 sps:$4 sm:$0xff]  }
  0x4e   : > { %1749 = vmatpush3.bf16.msra.mxu1 %v1931_v19  ;;  %1217 = vmatmul.mubr.bf16.gmra.mrb[4].mxu0 %v2323_v25  ;;  %v1990_v19 = vld [vmem:[%s2561_s1 + $0x140] ss:$12 sps:$4 sm:$0xff]  }
  0x4f   : > { %1232 = vmatpush1.bf16.msra.mxu0 %v1892_v9  ;;  %1750 = vmatprep.subr.bf16.mxu1 %v1935_v21  ;;  %v1981_v9 = vld [vmem:[%s2561_s1 + $0xf8] ss:$12 sps:$4 sm:$0xff]  }
  0x50   : > { %1233 = vmatprep.subr.bf16.mxu0 %v1900_v13  ;;  %1259 = vmatprep.mubr.bf16.mxu0 %v1955_v18  ;;  %v1984_v13 = vld [vmem:[%s2561_s1 + $0x110] ss:$12 sps:$4 sm:$0xff]   ;;  %v1988_v18 = vld [vmem:[%s2561_s1 + $0x68] ss:$12 sps:$4 sm:$0xff]   ;;  %v1994_v21 = vld [vmem:[%s2561_s1 + $0x98] ss:$12 sps:$4 sm:$0xff]  }
  0x52   : > { %1751 = vmatpush3.bf16.msra.mxu1 %v1936_v26 }
  0x53   : > { %1234 = vmatpush1.bf16.msra.mxu0 %v1898_v15  ;;  %1752 = vmatprep.subr.bf16.mxu1 %v1942_v27  ;;  %v1985_v15 = vld [vmem:[%s2561_s1 + $0x50] ss:$12 sps:$4 sm:$0xff]  }
  0x54   : > { %1235 = vmatprep.subr.bf16.mxu0 %v1906_v17  ;;  %v1999_v17 = vld [vmem:[%s2561_s1 + $0x428] ss:$12 sps:$4 sm:$0xff]  }
  0x56   : > { %1753 = vmatpush3.bf16.msra.mxu1 %v1944_v30 }
  0x57   : > { %1236 = vmatpush1.bf16.msra.mxu0 %v1904_v20  ;;  %1754 = vmatprep.subr.bf16.mxu1 %v1948_v31  ;;  %v1993_v20 = vld [vmem:[%s2561_s1 + $0x158] ss:$12 sps:$4 sm:$0xff]  }
  0x58   : > { %1237 = vmatprep.subr.bf16.mxu0 %v1914_v22  ;;  %v1996_v22 = vld [vmem:[%s2561_s1 + $0x170] ss:$12 sps:$4 sm:$0xff]  }
  0x5a   : > { %1755 = vmatpush3.bf16.msra.mxu1 %v1949_v34 }
  0x5b   : > { %1238 = vmatpush1.bf16.msra.mxu0 %v1912_v23  ;;  %1431 = vmatprep.subr.bf16.mxu1 %v2008_v41  ;;  %v1997_v23 = vld [vmem:[%s2561_s1 + $0xb0] ss:$12 sps:$4 sm:$0xff]  }
  0x5c   : > { %1239 = vmatprep.subr.bf16.mxu0 %v1919_v28 }
  0x5d   : > { %1415 = vmatmul.mubr.bf16.vlgmr.msra.gmra.mrb[8].mxu1 %v2361_v38 }
  0x5e   : > { %1432 = vmatpush1.bf16.msra.mxu1 %v1956_v39  ;;  %1422 = vmatprep.mubr.bf16.mxu1 %v2371_v42 }
  0x5f   : > { %1240 = vmatpush1.bf16.msra.mxu0 %v1917_v29  ;;  %1433 = vmatprep.subr.bf16.mxu1 %v2008_v41 }
  0x60   : > { %1241 = vmatprep.subr.bf16.mxu0 %v1924_v32 }
  0x62   : > { %1434 = vmatpush1.bf16.msra.mxu1 %v1960_v43 }
  0x63   : > { %1242 = vmatpush1.bf16.msra.mxu0 %v1922_v35  ;;  %1435 = vmatprep.subr.bf16.mxu1 %v2008_v41 }
  0x64   : > { %1243 = vmatprep.subr.bf16.mxu0 %v1929_v36 }
  0x65   : > { %1423 = vmatmul.mubr.bf16.gmra.mrb[12].mxu1 %v1980_v49 }
  0x66   : > { %1436 = vmatpush1.bf16.msra.mxu1 %v1967_v47  ;;  %1708 = vmatprep.mubr.msk.bf16.mxu1 %vm1167_vm0, %v2195_v48  ;;  %v1950_v48 = vld [vmem:[%s2561_s1 + $0x2a0] ss:$12 sps:$4 sm:$0xff]  }
  0x67   : > { %1244 = vmatpush1.bf16.msra.mxu0 %v1927_v37  ;;  %1437 = vmatprep.subr.bf16.mxu1 %v2008_v41 }
  0x68   : > { %1245 = vmatprep.subr.bf16.mxu0 %v1934_v40 }
  0x6a   : > { %1438 = vmatpush1.bf16.msra.mxu1 %v1971_v51 }
  0x6b   : > { %1246 = vmatpush1.bf16.msra.mxu0 %v1932_v44  ;;  %1439 = vmatprep.subr.bf16.mxu1 %v2008_v41  ;;  %v372_v44 = vld [vmem:[%s2562_s2] sm:$0x7] }
  0x6c   : > { %1247 = vmatprep.subr.bf16.mxu0 %v1939_v45 }
  0x6e   : > { %1440 = vmatpush1.bf16.msra.mxu1 %v1974_v54 }
  0x6f   : > { %1248 = vmatpush1.bf16.msra.mxu0 %v1937_v46  ;;  %1441 = vmatprep.subr.bf16.mxu1 %v2008_v41 }
  0x70   : > { %1249 = vmatprep.subr.bf16.mxu0 %v1947_v50 }
  0x72   : > { %1442 = vmatpush1.bf16.msra.mxu1 %v1977_v56 }
  0x73   : > { %1250 = vmatpush1.bf16.msra.mxu0 %v1945_v52  ;;  %1443 = vmatprep.subr.bf16.mxu1 %v2008_v41 }
  0x74   : > { %1251 = vmatprep.subr.bf16.mxu0 %v1952_v53 }
  0x76   : > { %1444 = vmatpush1.bf16.msra.mxu1 %v1983_v59 }
  0x77   : > { %1252 = vmatpush1.bf16.msra.mxu0 %v1950_v48  ;;  %1445 = vmatprep.subr.bf16.mxu1 %v2008_v41 }
  0x78   : > { %1253 = vmatprep.subr.bf16.mxu0 %v1959_v55 }
  0x7a   : > { %1446 = vmatpush1.bf16.msra.mxu1 %v1986_v63 }
  0x7b   : > { %1254 = vmatpush1.bf16.msra.mxu0 %v1957_v57  ;;  %1447 = vmatprep.subr.bf16.mxu1 %v2008_v41 }
  0x7c   : > { %1255 = vmatprep.subr.bf16.mxu0 %v1966_v58 }
  0x7e   : > { %1448 = vmatpush1.bf16.msra.mxu1 %v1989_v3 }
  0x7f   : > { %1256 = vmatpush1.bf16.msra.mxu0 %v1964_v60  ;;  %1449 = vmatprep.subr.bf16.mxu1 %v2008_v41 }
  0x80   : > { %1257 = vmatprep.subr.bf16.mxu0 %v1970_v62 }
  0x82   : > { %1450 = vmatpush1.bf16.msra.mxu1 %v1992_v6 }
  0x83   : > { %1258 = vmatpush1.bf16.msra.mxu0 %v1968_v1  ;;  %1451 = vmatprep.subr.bf16.mxu1 %v2008_v41 }
  0x84   : > { %1712 = vmatprep.subr.bf16.mxu0 %v1972_v2 }
  0x86   : > { %1260 = vmatmul.mubr.bf16.vlgmr.msra.gmra.mrb[0].mxu0 %v2361_v38  ;;  %1452 = vmatpush1.bf16.msra.mxu1 %v1995_v10 }
  0x87   : > { %1713 = vmatpush3.bf16.msra.mxu0 %v1973_v4  ;;  %1269 = vmatprep.mubr.bf16.mxu0 %v2371_v42 }
  0x88   : > { %1714 = vmatprep.subr.bf16.mxu0 %v1975_v5  ;;  %1453 = vmatprep.subr.bf16.mxu1 %v2008_v41 }
  0x8a   : > { %1454 = vmatpush1.bf16.msra.mxu1 %v1998_v14 }
  0x8b   : > { %1715 = vmatpush3.bf16.msra.mxu0 %v1976_v7  ;;  %1455 = vmatprep.subr.bf16.mxu1 %v2008_v41  ;;  %v374_v41 = vlaneseq }
  0x8c   : > { %1716 = vmatprep.subr.bf16.mxu0 %v1981_v9 }
  0x8d   : > { %v375_v42 = vshrl.u32 %v374_v41, 7 }
  0x8e   : > { %1270 = vmatmul.mubr.bf16.gmra.mrb[4].mxu0 %v1980_v49  ;;  %1456 = vmatpush1.bf16.msra.mxu1 %v1999_v17 }
  0x8f   : > { %1717 = vmatpush3.bf16.msra.mxu0 %v1982_v12  ;;  %1365 = vmatprep.mubr.bf16.mxu0 %v2149_v33  ;;  %v1991_v33 = vld [vmem:[%s2561_s1 + $0x80] ss:$12 sps:$4 sm:$0xff]   ;;  %v376_v43 = vsub.s32 0, %v375_v42  ;;  %v380_v45 = vsub.s32 1, %v375_v42  ;;  %v384_v17 = vsub.s32 2, %v375_v42 }
  0x90   : > { %1718 = vmatprep.subr.bf16.mxu0 %v1984_v13 }
  0x91   : > { %1464 = vmatmul.mubr.bf16.vlgmr.msra.gmra.mrb[16].mxu1 %v2245_v0  ;;  %v377_v46 = vrot.slane %v372_v44, %v376_v43  ;;  %v381_v47 = vrot.slane %v372_v44, %v380_v45 }
  0x92   : > { %1709 = vmatprep.mubr.msk.bf16.mxu1 %vm1167_vm0, %v2271_v8 }
  0x93   : > { %1719 = vmatpush3.bf16.msra.mxu0 %v1985_v15 }
  0x94   : > { %1720 = vmatprep.subr.bf16.mxu0 %v1987_v16 }
  0x97   : > { %1721 = vmatpush3.bf16.msra.mxu0 %v1988_v18 }
  0x98   : > { %1722 = vmatprep.subr.bf16.mxu0 %v1990_v19 }
  0x99   : > { %1472 = vmatmul.mubr.bf16.gmra.mrb[20].mxu1 %v2282_v11 }
  0x9b   : > { %1723 = vmatpush3.bf16.msra.mxu0 %v1991_v33 }
  0x9c   : > { %1724 = vmatprep.subr.bf16.mxu0 %v1993_v20 }
  0x9f   : > { %1725 = vmatpush3.bf16.msra.mxu0 %v1994_v21  ;;  %v385_v21 = vrot.slane %v372_v44, %v384_v17 }
  0xa0   : > { %1726 = vmatprep.subr.bf16.mxu0 %v1996_v22 }
  0xa3   : > { %1727 = vmatpush3.bf16.msra.mxu0 %v1997_v23 }
  0xa6   : > { %1366 = vmatmul.mubr.bf16.vlgmr.msra.gmra.mrb[8].mxu0 %v2236_v61 }
  0xa7   : > { %1373 = vmatprep.mubr.bf16.mxu0 %v2320_v24 }
  0xae   : > { %1374 = vmatmul.mubr.bf16.gmra.mrb[12].mxu0 %v2323_v25 }
 0x110   : > { %v1314_v0 = vpop.f32.mrb[0].mxu1 }
 0x111   : > { %v1316_v8 = vpop.f32.mrb[1].mxu1 }
 0x112   : > { %v1318_v26 = vpop.f32.mrb[2].mxu1 }
 0x113   : > { %v1320_v27 = vpop.f32.mrb[3].mxu1 }
 0x118   : > { %v1324_v28 = vpop.f32.mrb[4].mxu1 }
 0x119   : > { %v1326_v29 = vpop.f32.mrb[5].mxu1 }
 0x11a   : > { %v1328_v30 = vpop.f32.mrb[6].mxu1 }
 0x11b   : > { %v1330_v31 = vpop.f32.mrb[7].mxu1 }
 0x130   : > { %v1756_v32 = vpop.f32.mrb[8].mxu1 }
 0x131   : > { %v1757_v34 = vpop.f32.mrb[9].mxu1 }
 0x132   : > { %v2523_v35 = vadd.f32 %v1757_v34, %v1756_v32  ;;  %v1759_v11 = vpop.f32.mrb[10].mxu1 }
 0x133   : > { %v1760_v36 = vpop.f32.mrb[11].mxu1 }
 0x134   : > { %v2525_v37 = vadd.f32 %v1760_v36, %v1759_v11 }
 0x138   : > { %v1762_v61 = vpop.f32.mrb[12].mxu1 }
 0x139   : > { %v1763_v24 = vpop.f32.mrb[13].mxu1 }
 0x13a   : > { %v2527_v25 = vadd.f32 %v1763_v24, %v1762_v61  ;;  %v1765_v38 = vpop.f32.mrb[14].mxu1 }
 0x13b   : > { %v1766_v39 = vpop.f32.mrb[15].mxu1 }
 0x13c   : > { %v2529_v40 = vadd.f32 %v1766_v39, %v1765_v38 }
 0x159   : > { %v1261_v49 = vpop.f32.mrb[0].mxu0 }
 0x15a   : > { %v1768_v50 = vadd.f32 %v1261_v49, %v377_v46  ;;  %v1263_v51 = vpop.f32.mrb[1].mxu0 }
 0x15b   : > { %v1770_v52 = vadd.f32 %v1263_v51, %v381_v47  ;;  %v1265_v53 = vpop.f32.mrb[2].mxu0 }
 0x15c   : > { %v1769_v54 = vadd.f32 %v1768_v50, %v1314_v0  ;;  %v1772_v48 = vadd.f32 %v1265_v53, %v377_v46  ;;  %v1267_v55 = vpop.f32.mrb[3].mxu0 }
 0x15d   : > { %v1771_v56 = vadd.f32 %v1770_v52, %v1316_v8  ;;  %v1774_v57 = vadd.f32 %v1267_v55, %v381_v47 }
 0x15e   : > { %1480 = vst [vmem:[%s2539_s5] sm:$0xff] %v1769_v54  ;;  %v1773_v58 = vadd.f32 %v1772_v48, %v1318_v26 }
 0x15f   : > { %1481 = vst [vmem:[%s2539_s5 + $0x8] sm:$0xff] %v1771_v56  ;;  %v1775_v59 = vadd.f32 %v1774_v57, %v1320_v27 }
 0x160   : > { %1483 = vst [vmem:[%s2539_s5 + $0x18] sm:$0xff] %v1773_v58 }
 0x161   : > { %1484 = vst [vmem:[%s2539_s5 + $0x20] sm:$0xff] %v1775_v59  ;;  %v1271_v60 = vpop.f32.mrb[4].mxu0 }
 0x162   : > { %v1776_v62 = vadd.f32 %v1271_v60, %v377_v46  ;;  %v1273_v63 = vpop.f32.mrb[5].mxu0 }
 0x163   : > { %v1778_v1 = vadd.f32 %v1273_v63, %v381_v47  ;;  %v1275_v2 = vpop.f32.mrb[6].mxu0 }
 0x164   : > { %v1777_v3 = vadd.f32 %v1776_v62, %v1324_v28  ;;  %v1780_v4 = vadd.f32 %v1275_v2, %v377_v46  ;;  %v1277_v5 = vpop.f32.mrb[7].mxu0  ;;  %v1465_v12 = vpop.f32.mrb[16].mxu1 }
 0x165   : > { %v1779_v6 = vadd.f32 %v1778_v1, %v1326_v29  ;;  %v1782_v7 = vadd.f32 %v1277_v5, %v381_v47  ;;  %v1467_v13 = vpop.f32.mrb[17].mxu1 }
 0x166   : > { %1486 = vst [vmem:[%s2539_s5 + $0x30] sm:$0xff] %v1777_v3  ;;  %v1781_v9 = vadd.f32 %v1780_v4, %v1328_v30  ;;  %v1468_v14 = vpop.f32.mrb[18].mxu1 }
 0x167   : > { %1487 = vst [vmem:[%s2539_s5 + $0x38] sm:$0xff] %v1779_v6  ;;  %v1783_v10 = vadd.f32 %v1782_v7, %v1330_v31  ;;  %v1470_v15 = vpop.f32.mrb[19].mxu1 }
 0x168   : > { %1489 = vst [vmem:[%s2539_s5 + $0x48] sm:$0xff] %v1781_v9 }
 0x169   : > { %1490 = vst [vmem:[%s2539_s5 + $0x50] sm:$0xff] %v1783_v10 }
 0x16c   : > { %v1473_v16 = vpop.f32.mrb[20].mxu1 }
 0x16d   : > { %v1475_v18 = vpop.f32.mrb[21].mxu1 }
 0x16e   : > { %v1476_v19 = vpop.f32.mrb[22].mxu1 }
 0x16f   : > { %v1478_v33 = vpop.f32.mrb[23].mxu1 }
 0x179   : > { %v1728_v20 = vpop.f32.mrb[8].mxu0 }
 0x17a   : > { %v1729_v22 = vpop.f32.mrb[9].mxu0 }
 0x17b   : > { %v1730_v23 = vadd.f32 %v1729_v22, %v1728_v20  ;;  %v1731_v0 = vpop.f32.mrb[10].mxu0 }
 0x17c   : > { %v1732_v8 = vpop.f32.mrb[11].mxu0 }
 0x17d   : > { %v1368_v26 = vadd.f32 %v1730_v23, %v385_v21  ;;  %v1733_v27 = vadd.f32 %v1732_v8, %v1731_v0 }
 0x17f   : > { %v1371_v28 = vadd.f32 %v1733_v27, %v385_v21  ;;  %v1417_v29 = vadd.f32 %v2523_v35, %v1368_v26 }
 0x181   : > { %v1466_v30 = vadd.f32 %v1465_v12, %v1417_v29  ;;  %v1420_v31 = vadd.f32 %v2525_v37, %v1371_v28  ;;  %v1734_v32 = vpop.f32.mrb[12].mxu0 }
 0x182   : > { %v1735_v34 = vpop.f32.mrb[13].mxu0 }
 0x183   : > { %1482 = vst [vmem:[%s2539_s5 + $0x10] sm:$0xff] %v1466_v30  ;;  %v1469_v11 = vadd.f32 %v1468_v14, %v1420_v31  ;;  %v1736_v36 = vadd.f32 %v1735_v34, %v1734_v32  ;;  %v1737_v61 = vpop.f32.mrb[14].mxu0 }
 0x184   : > { %v1738_v24 = vpop.f32.mrb[15].mxu0 }
 0x185   : > { %1485 = vst [vmem:[%s2539_s5 + $0x28] sm:$0xff] %v1469_v11  ;;  %v1376_v38 = vadd.f32 %v1736_v36, %v385_v21  ;;  %v1739_v39 = vadd.f32 %v1738_v24, %v1737_v61 }
 0x187   : > { %v1379_v41 = vadd.f32 %v1739_v39, %v385_v21  ;;  %v1425_v42 = vadd.f32 %v2527_v25, %v1376_v38 }
 0x189   : > { %v1474_v43 = vadd.f32 %v1473_v16, %v1425_v42  ;;  %v1428_v35 = vadd.f32 %v2529_v40, %v1379_v41 }
 0x18b   : > { %1488 = vst [vmem:[%s2539_s5 + $0x40] sm:$0xff] %v1474_v43  ;;  %v1477_v44 = vadd.f32 %v1476_v19, %v1428_v35 }
 0x18d   : > { %1491 = vst [vmem:[%s2539_s5 + $0x58] sm:$0xff] %v1477_v44 }
 0x18e PF: > { %s13_s12 = sadd.s32 1, %s2006_s12  }
 0x18f   : > { %p10_p4 = scmp.ge.s32.totalorder %s13_s12, 4  }
 0x191   :  { %12 = sbr.rel (!%p10_p4) target bundleno = 1 (0x1), region = 62 }

</bundles_post_ra>
